<compile_context>
chip_gen: v7x
topology: tpu7x:2x2x1
jax: 0.10.0
libtpu: 0.0.40
codegen_flags: <defaults>
</compile_context>

<pallas_src>
import functools

import jax
import jax.numpy as jnp
import numpy as np
from jax import lax
from jax.experimental import pallas as pl
from jax.experimental.pallas import tpu as pltpu


def _round_up(x, m):
    return (x + m - 1) // m * m


def _pad_gate_axis(w, H, Hp):
    """Zero-pad the trailing (4*H) gate axis to (4*Hp) per gate block (i,f,g,o),
    preserving PyTorch's gate ordering."""
    if Hp == H:
        return w
    lead = w.shape[:-1]
    w4 = w.reshape(lead + (4, H))
    w4 = jnp.pad(w4, [(0, 0)] * (len(lead) + 1) + [(0, Hp - H)])
    return w4.reshape(lead + (4 * Hp,))


def _pick_chunk_steps(T, B, max_steps):
    """Largest Tc dividing T with Tc <= max_steps and Tc*B a multiple of 16
    (sublane-tile aligned row blocks for the bf16 arrays).  Falls back to the
    whole sequence (full-array blocks are always legal)."""
    for d in range(max(1, min(T, max_steps)), 0, -1):
        if T % d == 0 and (d * B) % 16 == 0:
            return d
    return T


# --------------------- Kernel 1: 2-layer LSTM recurrence -------------------- #

def _lstm_recurrence_kernel(xproj_ref, whh0_ref, w1_ref, b1_ref,
                            h1_all_ref, hn_ref, cn_ref, state_ref,
                            *, Tc, B, Hp):
    """One grid step = one chunk of Tc time steps of the 2-layer LSTM.

    xproj_ref : (Tc*B, 4*Hp) bf16   precomputed  x_t @ W_ih0 + b0
    whh0_ref  : (Hp, 4*Hp)   bf16   layer-0 recurrent weight
    w1_ref    : (2*Hp, 4*Hp) bf16   layer-1 fused [W_ih1; W_hh1]
    b1_ref    : (1, 4*Hp)    f32
    h1_all_ref: (Tc*B, Hp)   bf16   per-step layer-1 hidden states (-> vocab proj)
    hn_ref    : (2*B, Hp)    f32    final hidden [layer0 rows; layer1 rows]
    cn_ref    : (2*B, Hp)    f32    final cell
    state_ref : (4*B, Hp)    f32    VMEM carry [h0; c0; h1; c1] across chunks
    """
    G = 4 * Hp

    @pl.when(pl.program_id(0) == 0)
    def _():
        state_ref[...] = jnp.zeros_like(state_ref)

    # Hoist weight loads and the bias broadcast out of the time loop.
    whh0 = whh0_ref[...]
    w1 = w1_ref[...]
    b1 = jnp.broadcast_to(b1_ref[...], (B, G))

    st = state_ref[...]
    h0, c0 = st[0 * B:1 * B, :], st[1 * B:2 * B, :]
    h1, c1 = st[2 * B:3 * B, :], st[3 * B:4 * B, :]
    carry = (h0, c0, h1, c1)

    def split_gates(g):
        # PyTorch gate order i, f, g, o; slices are lane-aligned (Hp % 128 == 0).
        i = jax.nn.sigmoid(g[:, 0 * Hp:1 * Hp])
        f = jax.nn.sigmoid(g[:, 1 * Hp:2 * Hp])
        c = jnp.tanh(g[:, 2 * Hp:3 * Hp])
        o = jax.nn.sigmoid(g[:, 3 * Hp:4 * Hp])
        return i, f, c, o

    def one_step(xp_f32, carry):
        h0, c0, h1, c1 = carry
        # Layer 0 (input projection + bias already folded into xproj).
        g0 = xp_f32 + jnp.dot(h0.astype(jnp.bfloat16), whh0,
                              preferred_element_type=jnp.float32)
        i0, f0, gg0, o0 = split_gates(g0)
        c0 = f0 * c0 + i0 * gg0
        h0 = o0 * jnp.tanh(c0)
        # Layer 1: single fused matmul  [h0 ; h1_prev] @ [W_ih1 ; W_hh1].
        xh = jnp.concatenate([h0, h1], axis=1).astype(jnp.bfloat16)
        g1 = jnp.dot(xh, w1, preferred_element_type=jnp.float32) + b1
        i1, f1, gg1, o1 = split_gates(g1)
        c1 = f1 * c1 + i1 * gg1
        h1 = o1 * jnp.tanh(c1)
        return (h0, c0, h1, c1)

    if Tc <= 16:
        # Short chunk: static unroll -> all row offsets are Python ints, i.e.
        # aligned static windows on the packed bf16 refs.
        for t in range(Tc):
            r0, r1 = t * B, (t + 1) * B
            carry = one_step(xproj_ref[r0:r1, :].astype(jnp.float32), carry)
            h1_all_ref[r0:r1, :] = carry[2].astype(jnp.bfloat16)
    else:
        # Long chunk: bounded unroll keeps instruction count / vreg pressure sane.
        def body(t, carry):
            row = pl.multiple_of(t * B, B)
            carry = one_step(xproj_ref[pl.ds(row, B), :].astype(jnp.float32),
                             carry)
            h1_all_ref[pl.ds(row, B), :] = carry[2].astype(jnp.bfloat16)
            return carry
        carry = lax.fori_loop(0, Tc, body, carry, unroll=min(8, Tc))

    h0, c0, h1, c1 = carry
    state_ref[...] = jnp.concatenate([h0, c0, h1, c1], axis=0)
    # Constant-index output blocks: written every chunk (cheap), flushed to HBM
    # once at grid end, thus holding the final state.
    hn_ref[...] = jnp.concatenate([h0, h1], axis=0)
    cn_ref[...] = jnp.concatenate([c0, c1], axis=0)


# ----------------------- Kernel 2: vocab projection ------------------------- #

def _vocab_proj_kernel(h_ref, w_ref, b_ref, o_ref):
    # Lane-dense (TM, Hp) @ (Hp, TV) matmul per (row, vocab) tile.
    o_ref[...] = (jnp.dot(h_ref[...], w_ref[...],
                          preferred_element_type=jnp.float32) + b_ref[...])


# ------------------------------ JAX wrapper --------------------------------- #

def text_generation_forward(x_tokens, params, max_chunk_steps=8,
                            vmem_budget=32 * 1024 * 1024):
    """Equivalent to TextGenerationModel.forward(x, reset=True).

    x_tokens: (T, B) int32 token ids (time-major, like nn.LSTM default).
    Returns logits (T, B, V) and (h_n, c_n) each (num_layers=2, B, H).
    """
    T, B = x_tokens.shape
    emb_table = params["embedding"]
    V = params["w_out"].shape[1]
    H = params["w_hh0"].shape[0]
    L = 2

    Hp = _round_up(H, 128)                               # lane-aligned hidden
    Vp = _round_up(V, 128)                               # lane-dense logits
    G = 4 * Hp
    TB = T * B

    # ---- numerics-neutral zero padding; bf16 MXU operands ----
    w_ih0 = _pad_gate_axis(params["w_ih0"], H, Hp)                       # (E, G) f32
    b0 = _pad_gate_axis(params["b0"], H, Hp)                             # (1, G) f32
    w_hh0 = _pad_gate_axis(
        jnp.pad(params["w_hh0"], ((0, Hp - H), (0, 0))), H, Hp).astype(jnp.bfloat16)
    w_ih1 = _pad_gate_axis(jnp.pad(params["w_ih1"], ((0, Hp - H), (0, 0))), H, Hp)
    w_hh1 = _pad_gate_axis(jnp.pad(params["w_hh1"], ((0, Hp - H), (0, 0))), H, Hp)
    w1 = jnp.concatenate([w_ih1, w_hh1], axis=0).astype(jnp.bfloat16)    # (2Hp, G)
    b1 = _pad_gate_axis(params["b1"], H, Hp)                             # (1, G) f32
    w_out = jnp.pad(params["w_out"],
                    ((0, Hp - H), (0, Vp - V))).astype(jnp.bfloat16)     # (Hp, Vp)
    b_out = jnp.pad(params["b_out"], ((0, 0), (0, Vp - V)))              # (1, Vp) f32

    # ---- layer-0 input projection folded into the embedding path (XLA glue) ----
    x_flat = x_tokens.reshape(-1)                        # row index = t*B + b
    if TB <= V:
        # gather-then-matmul: cost scales with T*B, not vocabulary size
        emb = jnp.take(emb_table, x_flat, axis=0)                        # (TB, E)
        xproj = (jnp.dot(emb, w_ih0) + b0).astype(jnp.bfloat16)          # (TB, G)
    else:
        table0 = (jnp.dot(emb_table, w_ih0) + b0).astype(jnp.bfloat16)   # (V, G)
        xproj = jnp.take(table0, x_flat, axis=0)                         # (TB, G)

    # ---- kernel 1: chunked, pipelined serial recurrence ----
    w_bytes = (Hp * G + 2 * Hp * G) * 2 + G * 4          # resident bf16 weights + bias
    per_step_io = B * (G + Hp) * 2                       # bf16 xproj + bf16 h1 rows
    avail = max(vmem_budget - 2 * w_bytes - 8 * B * Hp * 4, per_step_io)
    Tc = _pick_chunk_steps(T, B, min(max_chunk_steps, avail // (2 * per_step_io)))
    k1_est = (2 * w_bytes + 2 * Tc * B * (G + Hp) * 2
              + 4 * B * Hp * 4 + 4 * 2 * B * Hp * 4)
    k1_vmem = min(64 * 1024 * 1024, max(32 * 1024 * 1024, 2 * k1_est))

    rec_kernel = functools.partial(_lstm_recurrence_kernel, Tc=Tc, B=B, Hp=Hp)
    h1_all, h_n, c_n = pl.pallas_call(
        rec_kernel,
        out_shape=(
            jax.ShapeDtypeStruct((TB, Hp), jnp.bfloat16),
            jax.ShapeDtypeStruct((L * B, Hp), jnp.float32),
            jax.ShapeDtypeStruct((L * B, Hp), jnp.float32),
        ),
        grid=(T // Tc,),
        in_specs=[
            pl.BlockSpec((Tc * B, G), lambda i: (i, 0)),      # xproj chunk
            pl.BlockSpec((Hp, G), lambda i: (0, 0)),          # W_hh layer 0
            pl.BlockSpec((2 * Hp, G), lambda i: (0, 0)),      # fused layer-1 weight
            pl.BlockSpec((1, G), lambda i: (0, 0)),           # layer-1 bias
        ],
        out_specs=(
            pl.BlockSpec((Tc * B, Hp), lambda i: (i, 0)),
            pl.BlockSpec((L * B, Hp), lambda i: (0, 0)),
            pl.BlockSpec((L * B, Hp), lambda i: (0, 0)),
        ),
        scratch_shapes=[pltpu.VMEM((4 * B, Hp), jnp.float32)],
        compiler_params=pltpu.CompilerParams(
            dimension_semantics=("arbitrary",),
            vmem_limit_bytes=k1_vmem),
    )(xproj, w_hh0, w1, b1)

    # ---- kernel 2: vocab projection over a 2-D 'parallel' grid ----
    TM = TB
    for d in range(min(TB // 2, 512), 15, -1):           # >=2 row blocks when possible
        if TB % d == 0 and d % 16 == 0:
            TM = d
            break
    TV = min(Vp, 128)
    for cand in range(Vp, 127, -128):                    # largest vocab tile in budget
        if Vp % cand:
            continue
        need = 2 * (Hp * cand * 2 + TM * cand * 4 + cand * 4) + 2 * TM * Hp * 2
        if need <= vmem_budget:
            TV = cand
            break
    if (TB // TM) * (Vp // TV) < 2 and Vp % 256 == 0:
        TV = Vp // 2                                     # keep both v7x cores busy
    k2_est = 2 * (TM * Hp * 2 + Hp * TV * 2 + TM * TV * 4 + TV * 4)
    k2_vmem = min(64 * 1024 * 1024, max(32 * 1024 * 1024, 2 * k2_est))

    logits = pl.pallas_call(
        _vocab_proj_kernel,
        out_shape=jax.ShapeDtypeStruct((TB, Vp), jnp.float32),
        grid=(TB // TM, Vp // TV),
        in_specs=[
            pl.BlockSpec((TM, Hp), lambda i, j: (i, 0)),
            pl.BlockSpec((Hp, TV), lambda i, j: (0, j)),
            pl.BlockSpec((1, TV), lambda i, j: (0, j)),
        ],
        out_specs=pl.BlockSpec((TM, TV), lambda i, j: (i, j)),
        compiler_params=pltpu.CompilerParams(
            dimension_semantics=("parallel", "parallel"),
            vmem_limit_bytes=k2_vmem),
    )(h1_all, w_out, b_out)

    outs = logits.reshape(T, B, Vp)[:, :, :V]
    h_n = h_n.reshape(L, B, Hp)[:, :, :H]
    c_n = c_n.reshape(L, B, Hp)[:, :, :H]
    return outs, (h_n, c_n)


# --------------------------- pure-JAX reference ----------------------------- #

def reference_forward(x_tokens, params):
    emb = jnp.take(params["embedding"], x_tokens, axis=0)   # (T, B, E)
    H = params["w_hh0"].shape[0]
    B = x_tokens.shape[1]

    def cell(x, h, c, wih, whh, b):
        g = x @ wih + h @ whh + b
        i = jax.nn.sigmoid(g[:, 0 * H:1 * H])
        f = jax.nn.sigmoid(g[:, 1 * H:2 * H])
        gg = jnp.tanh(g[:, 2 * H:3 * H])
        o = jax.nn.sigmoid(g[:, 3 * H:4 * H])
        c_new = f * c + i * gg
        return o * jnp.tanh(c_new), c_new

    def step(carry, x_t):
        h0, c0, h1, c1 = carry
        h0, c0 = cell(x_t, h0, c0, params["w_ih0"], params["w_hh0"], params["b0"])
        h1, c1 = cell(h0, h1, c1, params["w_ih1"], params["w_hh1"], params["b1"])
        out = h1 @ params["w_out"] + params["b_out"]
        return (h0, c0, h1, c1), out

    z = jnp.zeros((B, H), jnp.float32)
    (h0, c0, h1, c1), outs = lax.scan(step, (z, z, z, z), emb)
    return outs, (jnp.stack([h0, h1]), jnp.stack([c0, c1]))


# --------------------------------- main ------------------------------------ #

if __name__ == "__main__":
    # Small shapes consistent with the module (time-major like PyTorch nn.LSTM).
    T, B = 16, 2           # seq_len, batch  (-> 2 recurrence chunks of 8 steps)
    E, H, V = 32, 32, 64   # dim_embed, lstm_num_hidden, vocabulary_size

    key = jax.random.PRNGKey(0)
    ks = jax.random.split(key, 10)
    s = 0.1
    params = {
        "embedding": jax.random.normal(ks[0], (V, E), jnp.float32) * s,
        # PyTorch weight_ih_l0 is (4H, E); stored transposed for x @ W.
        "w_ih0": jax.random.normal(ks[1], (E, 4 * H), jnp.float32) * s,
        "w_hh0": jax.random.normal(ks[2], (H, 4 * H), jnp.float32) * s,
        "b0": jax.random.normal(ks[3], (1, 4 * H), jnp.float32) * s,   # b_ih + b_hh
        "w_ih1": jax.random.normal(ks[4], (H, 4 * H), jnp.float32) * s,
        "w_hh1": jax.random.normal(ks[5], (H, 4 * H), jnp.float32) * s,
        "b1": jax.random.normal(ks[6], (1, 4 * H), jnp.float32) * s,
        # nn.Linear(H, V): weight (V, H) -> stored transposed (H, V)
        "w_out": jax.random.normal(ks[7], (H, V), jnp.float32) * s,
        "b_out": jax.random.normal(ks[8], (1, V), jnp.float32) * s,
    }
    x_tokens = jax.random.randint(ks[9], (T, B), 0, V, dtype=jnp.int32)

    fwd = jax.jit(text_generation_forward)
    outs, (h_n, c_n) = fwd(x_tokens, params)
    outs = jax.block_until_ready(outs)

    ref_outs, (ref_hn, ref_cn) = reference_forward(x_tokens, params)
    ref_outs = jax.block_until_ready(ref_outs)

    # bf16 MXU operands -> loosened tolerance vs the f32 reference.
    np.testing.assert_allclose(np.asarray(outs), np.asarray(ref_outs),
                               rtol=5e-2, atol=5e-3)
    np.testing.assert_allclose(np.asarray(h_n), np.asarray(ref_hn),
                               rtol=5e-2, atol=5e-3)
    np.testing.assert_allclose(np.asarray(c_n), np.asarray(ref_cn),
                               rtol=5e-2, atol=5e-3)

    print("KERNEL_OK")
</pallas_src>

<mosaic_0001>
module attributes {stable_mosaic.version = 11 : i64} {
  func.func @_vocab_proj_kernel(%arg0: i32, %arg1: i32, %arg2: memref<16x128xbf16, #tpu.memory_space<vmem>>, %arg3: memref<128x128xbf16, #tpu.memory_space<vmem>>, %arg4: memref<1x128xf32, #tpu.memory_space<vmem>>, %arg5: memref<16x128xf32, #tpu.memory_space<vmem>>) attributes {dimension_semantics = [#tpu.dimension_semantics<parallel>, #tpu.dimension_semantics<parallel>], iteration_bounds = array<i64: 2, 1>, scalar_prefetch = 0 : i64, scratch_operands = 0 : i64, tpu.core_type = #tpu.core_type<tc>, window_params = [{transform_indices = @transform_0, window_bounds = array<i64: 16, 128>}, {transform_indices = @transform_1, window_bounds = array<i64: 128, 128>}, {transform_indices = @transform_2, window_bounds = array<i64: 1, 128>}, {transform_indices = @transform_3, window_bounds = array<i64: 16, 128>}]} {
    %c0 = arith.constant 0 : index
    %c0_0 = arith.constant 0 : index
    %0 = vector.load %arg2[%c0, %c0_0] : memref<16x128xbf16, #tpu.memory_space<vmem>>, vector<16x128xbf16>
    %c0_1 = arith.constant 0 : index
    %c0_2 = arith.constant 0 : index
    %1 = vector.load %arg3[%c0_1, %c0_2] : memref<128x128xbf16, #tpu.memory_space<vmem>>, vector<128x128xbf16>
    %cst = arith.constant dense<0.000000e+00> : vector<16x128xf32>
    %2 = tpu.matmul %0, %1, %cst {dimension_numbers = #tpu.dot_dimension_numbers<[1], [0], [0], [1], [0, 0, 1, 1], [], []>} : vector<16x128xbf16>, vector<128x128xbf16>, vector<16x128xf32> -> vector<16x128xf32>
    %c0_3 = arith.constant 0 : index
    %c0_4 = arith.constant 0 : index
    %3 = vector.load %arg4[%c0_3, %c0_4] : memref<1x128xf32, #tpu.memory_space<vmem>>, vector<1x128xf32>
    %4 = vector.broadcast %3 : vector<1x128xf32> to vector<16x128xf32>
    %5 = arith.addf %2, %4 : vector<16x128xf32>
    %c0_5 = arith.constant 0 : index
    %c0_6 = arith.constant 0 : index
    %6 = vector.load %arg5[%c0_5, %c0_6] : memref<16x128xf32, #tpu.memory_space<vmem>>, vector<16x128xf32>
    tpu.vector_store %arg5[%c0_5, %c0_6], %5 {strides = array<i32>} : memref<16x128xf32, #tpu.memory_space<vmem>>, vector<16x128xf32>,
    return
  }
  func.func @transform_0(%arg0: i32, %arg1: i32) -> (i32, i32) {
    %c0_i32 = arith.constant 0 : i32
    %c0_i32_0 = arith.constant 0 : i32
    return %arg0, %c0_i32 : i32, i32
  }
  func.func @transform_1(%arg0: i32, %arg1: i32) -> (i32, i32) {
    %c0_i32 = arith.constant 0 : i32
    %c0_i32_0 = arith.constant 0 : i32
    return %c0_i32, %arg1 : i32, i32
  }
  func.func @transform_2(%arg0: i32, %arg1: i32) -> (i32, i32) {
    %c0_i32 = arith.constant 0 : i32
    %c0_i32_0 = arith.constant 0 : i32
    return %c0_i32, %arg1 : i32, i32
  }
  func.func @transform_3(%arg0: i32, %arg1: i32) -> (i32, i32) {
    %c0_i32 = arith.constant 0 : i32
    return %arg0, %arg1 : i32, i32
  }
}

module attributes {stable_mosaic.version = 11 : i64} {
  func.func @_lstm_recurrence_kernel(%arg0: i32, %arg1: memref<16x512xbf16, #tpu.memory_space<vmem>>, %arg2: memref<128x512xbf16, #tpu.memory_space<vmem>>, %arg3: memref<256x512xbf16, #tpu.memory_space<vmem>>, %arg4: memref<1x512xf32, #tpu.memory_space<vmem>>, %arg5: memref<16x128xbf16, #tpu.memory_space<vmem>>, %arg6: memref<4x128xf32, #tpu.memory_space<vmem>>, %arg7: memref<4x128xf32, #tpu.memory_space<vmem>>, %arg8: memref<8x128xf32, #tpu.memory_space<vmem>>) attributes {dimension_semantics = [#tpu.dimension_semantics<arbitrary>], iteration_bounds = array<i64: 2>, scalar_prefetch = 0 : i64, scratch_operands = 1 : i64, tpu.core_type = #tpu.core_type<tc>, window_params = [{transform_indices = @transform_0, window_bounds = array<i64: 16, 512>}, {pipeline_mode = #tpu.pipeline_mode<synchronous>, transform_indices = @transform_1, window_bounds = array<i64: 128, 512>}, {pipeline_mode = #tpu.pipeline_mode<synchronous>, transform_indices = @transform_2, window_bounds = array<i64: 256, 512>}, {pipeline_mode = #tpu.pipeline_mode<synchronous>, transform_indices = @transform_3, window_bounds = array<i64: 1, 512>}, {transform_indices = @transform_4, window_bounds = array<i64: 16, 128>}, {pipeline_mode = #tpu.pipeline_mode<synchronous>, transform_indices = @transform_5, window_bounds = array<i64: 4, 128>}, {pipeline_mode = #tpu.pipeline_mode<synchronous>, transform_indices = @transform_6, window_bounds = array<i64: 4, 128>}]} {
    %c0_i32 = arith.constant 0 : i32
    %0 = arith.cmpi eq, %arg0, %c0_i32 : i32
    %1 = arith.extui %0 : i1 to i32
    %c0_i32_0 = arith.constant 0 : i32
    %2 = arith.cmpi ne, %1, %c0_i32_0 : i32
    scf.if %2 {
      %cst_102 = arith.constant 0.000000e+00 : f32
      %507 = vector.broadcast %cst_102 : f32 to vector<8x128xf32>
      %c0_103 = arith.constant 0 : index
      %c0_104 = arith.constant 0 : index
      %508 = vector.load %arg8[%c0_103, %c0_104] : memref<8x128xf32, #tpu.memory_space<vmem>>, vector<8x128xf32>
      tpu.vector_store %arg8[%c0_103, %c0_104], %507 {strides = array<i32>} : memref<8x128xf32, #tpu.memory_space<vmem>>, vector<8x128xf32>,
    } else {
    }
    %c0 = arith.constant 0 : index
    %c0_1 = arith.constant 0 : index
    %3 = vector.load %arg2[%c0, %c0_1] : memref<128x512xbf16, #tpu.memory_space<vmem>>, vector<128x512xbf16>
    %c0_2 = arith.constant 0 : index
    %c0_3 = arith.constant 0 : index
    %4 = vector.load %arg3[%c0_2, %c0_3] : memref<256x512xbf16, #tpu.memory_space<vmem>>, vector<256x512xbf16>
    %c0_4 = arith.constant 0 : index
    %c0_5 = arith.constant 0 : index
    %5 = vector.load %arg4[%c0_4, %c0_5] : memref<1x512xf32, #tpu.memory_space<vmem>>, vector<1x512xf32>
    %6 = vector.shape_cast %5 : vector<1x512xf32> to vector<1x512xf32>
    %7 = vector.broadcast %6 : vector<1x512xf32> to vector<2x512xf32>
    %c0_6 = arith.constant 0 : index
    %c0_7 = arith.constant 0 : index
    %8 = vector.load %arg8[%c0_6, %c0_7] : memref<8x128xf32, #tpu.memory_space<vmem>>, vector<8x128xf32>
    %9 = vector.extract_strided_slice %8 {offsets = [0, 0], sizes = [2, 128], strides = [1, 1]} : vector<8x128xf32> to vector<2x128xf32>
    %10 = vector.extract_strided_slice %8 {offsets = [2, 0], sizes = [2, 128], strides = [1, 1]} : vector<8x128xf32> to vector<2x128xf32>
    %11 = vector.extract_strided_slice %8 {offsets = [4, 0], sizes = [2, 128], strides = [1, 1]} : vector<8x128xf32> to vector<2x128xf32>
    %12 = vector.extract_strided_slice %8 {offsets = [6, 0], sizes = [2, 128], strides = [1, 1]} : vector<8x128xf32> to vector<2x128xf32>
    %c0_8 = arith.constant 0 : index
    %c0_9 = arith.constant 0 : index
    %13 = vector.load %arg1[%c0_8, %c0_9] : memref<16x512xbf16, #tpu.memory_space<vmem>>, vector<2x512xbf16>
    %14 = arith.extf %13 : vector<2x512xbf16> to vector<2x512xf32>
    %15 = arith.truncf %9 : vector<2x128xf32> to vector<2x128xbf16>
    %cst = arith.constant dense<0.000000e+00> : vector<2x512xf32>
    %16 = tpu.matmul %15, %3, %cst {dimension_numbers = #tpu.dot_dimension_numbers<[1], [0], [0], [1], [0, 0, 1, 1], [], []>} : vector<2x128xbf16>, vector<128x512xbf16>, vector<2x512xf32> -> vector<2x512xf32>
    %17 = arith.addf %14, %16 : vector<2x512xf32>
    %18 = vector.extract_strided_slice %17 {offsets = [0, 0], sizes = [2, 128], strides = [1, 1]} : vector<2x512xf32> to vector<2x128xf32>
    %19 = arith.negf %18 : vector<2x128xf32>
    %20 = math.exp %19 : vector<2x128xf32>
    %cst_10 = arith.constant 1.000000e+00 : f32
    %21 = vector.broadcast %cst_10 : f32 to vector<2x128xf32>
    %22 = arith.addf %21, %20 : vector<2x128xf32>
    %23 = arith.divf %21, %22 : vector<2x128xf32>
    %24 = vector.extract_strided_slice %17 {offsets = [0, 128], sizes = [2, 128], strides = [1, 1]} : vector<2x512xf32> to vector<2x128xf32>
    %25 = arith.negf %24 : vector<2x128xf32>
    %26 = math.exp %25 : vector<2x128xf32>
    %cst_11 = arith.constant 1.000000e+00 : f32
    %27 = vector.broadcast %cst_11 : f32 to vector<2x128xf32>
    %28 = arith.addf %27, %26 : vector<2x128xf32>
    %29 = arith.divf %27, %28 : vector<2x128xf32>
    %30 = vector.extract_strided_slice %17 {offsets = [0, 256], sizes = [2, 128], strides = [1, 1]} : vector<2x512xf32> to vector<2x128xf32>
    %31 = math.tanh %30 : vector<2x128xf32>
    %32 = vector.extract_strided_slice %17 {offsets = [0, 384], sizes = [2, 128], strides = [1, 1]} : vector<2x512xf32> to vector<2x128xf32>
    %33 = arith.negf %32 : vector<2x128xf32>
    %34 = math.exp %33 : vector<2x128xf32>
    %cst_12 = arith.constant 1.000000e+00 : f32
    %35 = vector.broadcast %cst_12 : f32 to vector<2x128xf32>
    %36 = arith.addf %35, %34 : vector<2x128xf32>
    %37 = arith.divf %35, %36 : vector<2x128xf32>
    %38 = arith.mulf %29, %10 : vector<2x128xf32>
    %39 = arith.mulf %23, %31 : vector<2x128xf32>
    %40 = arith.addf %38, %39 : vector<2x128xf32>
    %41 = math.tanh %40 : vector<2x128xf32>
    %42 = arith.mulf %37, %41 : vector<2x128xf32>
    %43 = tpu.concatenate %42, %11 in 1 : vector<2x128xf32>, vector<2x128xf32> -> vector<2x256xf32>
    %44 = arith.truncf %43 : vector<2x256xf32> to vector<2x256xbf16>
    %cst_13 = arith.constant dense<0.000000e+00> : vector<2x512xf32>
    %45 = tpu.matmul %44, %4, %cst_13 {dimension_numbers = #tpu.dot_dimension_numbers<[1], [0], [0], [1], [0, 0, 1, 1], [], []>} : vector<2x256xbf16>, vector<256x512xbf16>, vector<2x512xf32> -> vector<2x512xf32>
    %46 = arith.addf %45, %7 : vector<2x512xf32>
    %47 = vector.extract_strided_slice %46 {offsets = [0, 0], sizes = [2, 128], strides = [1, 1]} : vector<2x512xf32> to vector<2x128xf32>
    %48 = arith.negf %47 : vector<2x128xf32>
    %49 = math.exp %48 : vector<2x128xf32>
    %cst_14 = arith.constant 1.000000e+00 : f32
    %50 = vector.broadcast %cst_14 : f32 to vector<2x128xf32>
    %51 = arith.addf %50, %49 : vector<2x128xf32>
    %52 = arith.divf %50, %51 : vector<2x128xf32>
    %53 = vector.extract_strided_slice %46 {offsets = [0, 128], sizes = [2, 128], strides = [1, 1]} : vector<2x512xf32> to vector<2x128xf32>
    %54 = arith.negf %53 : vector<2x128xf32>
    %55 = math.exp %54 : vector<2x128xf32>
    %cst_15 = arith.constant 1.000000e+00 : f32
    %56 = vector.broadcast %cst_15 : f32 to vector<2x128xf32>
    %57 = arith.addf %56, %55 : vector<2x128xf32>
    %58 = arith.divf %56, %57 : vector<2x128xf32>
    %59 = vector.extract_strided_slice %46 {offsets = [0, 256], sizes = [2, 128], strides = [1, 1]} : vector<2x512xf32> to vector<2x128xf32>
    %60 = math.tanh %59 : vector<2x128xf32>
    %61 = vector.extract_strided_slice %46 {offsets = [0, 384], sizes = [2, 128], strides = [1, 1]} : vector<2x512xf32> to vector<2x128xf32>
    %62 = arith.negf %61 : vector<2x128xf32>
    %63 = math.exp %62 : vector<2x128xf32>
    %cst_16 = arith.constant 1.000000e+00 : f32
    %64 = vector.broadcast %cst_16 : f32 to vector<2x128xf32>
    %65 = arith.addf %64, %63 : vector<2x128xf32>
    %66 = arith.divf %64, %65 : vector<2x128xf32>
    %67 = arith.mulf %58, %12 : vector<2x128xf32>
    %68 = arith.mulf %52, %60 : vector<2x128xf32>
    %69 = arith.addf %67, %68 : vector<2x128xf32>
    %70 = math.tanh %69 : vector<2x128xf32>
    %71 = arith.mulf %66, %70 : vector<2x128xf32>
    %72 = arith.truncf %71 : vector<2x128xf32> to vector<2x128xbf16>
    %c0_17 = arith.constant 0 : index
    %c0_18 = arith.constant 0 : index
    %73 = vector.load %arg5[%c0_17, %c0_18] : memref<16x128xbf16, #tpu.memory_space<vmem>>, vector<2x128xbf16>
    tpu.vector_store %arg5[%c0_17, %c0_18], %72 {strides = array<i32>} : memref<16x128xbf16, #tpu.memory_space<vmem>>, vector<2x128xbf16>,
    %c2 = arith.constant 2 : index
    %c0_19 = arith.constant 0 : index
    %74 = vector.load %arg1[%c2, %c0_19] : memref<16x512xbf16, #tpu.memory_space<vmem>>, vector<2x512xbf16>
    %75 = arith.extf %74 : vector<2x512xbf16> to vector<2x512xf32>
    %76 = arith.truncf %42 : vector<2x128xf32> to vector<2x128xbf16>
    %cst_20 = arith.constant dense<0.000000e+00> : vector<2x512xf32>
    %77 = tpu.matmul %76, %3, %cst_20 {dimension_numbers = #tpu.dot_dimension_numbers<[1], [0], [0], [1], [0, 0, 1, 1], [], []>} : vector<2x128xbf16>, vector<128x512xbf16>, vector<2x512xf32> -> vector<2x512xf32>
    %78 = arith.addf %75, %77 : vector<2x512xf32>
    %79 = vector.extract_strided_slice %78 {offsets = [0, 0], sizes = [2, 128], strides = [1, 1]} : vector<2x512xf32> to vector<2x128xf32>
    %80 = arith.negf %79 : vector<2x128xf32>
    %81 = math.exp %80 : vector<2x128xf32>
    %cst_21 = arith.constant 1.000000e+00 : f32
    %82 = vector.broadcast %cst_21 : f32 to vector<2x128xf32>
    %83 = arith.addf %82, %81 : vector<2x128xf32>
    %84 = arith.divf %82, %83 : vector<2x128xf32>
    %85 = vector.extract_strided_slice %78 {offsets = [0, 128], sizes = [2, 128], strides = [1, 1]} : vector<2x512xf32> to vector<2x128xf32>
    %86 = arith.negf %85 : vector<2x128xf32>
    %87 = math.exp %86 : vector<2x128xf32>
    %cst_22 = arith.constant 1.000000e+00 : f32
    %88 = vector.broadcast %cst_22 : f32 to vector<2x128xf32>
    %89 = arith.addf %88, %87 : vector<2x128xf32>
    %90 = arith.divf %88, %89 : vector<2x128xf32>
    %91 = vector.extract_strided_slice %78 {offsets = [0, 256], sizes = [2, 128], strides = [1, 1]} : vector<2x512xf32> to vector<2x128xf32>
    %92 = math.tanh %91 : vector<2x128xf32>
    %93 = vector.extract_strided_slice %78 {offsets = [0, 384], sizes = [2, 128], strides = [1, 1]} : vector<2x512xf32> to vector<2x128xf32>
    %94 = arith.negf %93 : vector<2x128xf32>
    %95 = math.exp %94 : vector<2x128xf32>
    %cst_23 = arith.constant 1.000000e+00 : f32
    %96 = vector.broadcast %cst_23 : f32 to vector<2x128xf32>
    %97 = arith.addf %96, %95 : vector<2x128xf32>
    %98 = arith.divf %96, %97 : vector<2x128xf32>
    %99 = arith.mulf %90, %40 : vector<2x128xf32>
    %100 = arith.mulf %84, %92 : vector<2x128xf32>
    %101 = arith.addf %99, %100 : vector<2x128xf32>
    %102 = math.tanh %101 : vector<2x128xf32>
    %103 = arith.mulf %98, %102 : vector<2x128xf32>
    %104 = tpu.concatenate %103, %71 in 1 : vector<2x128xf32>, vector<2x128xf32> -> vector<2x256xf32>
    %105 = arith.truncf %104 : vector<2x256xf32> to vector<2x256xbf16>
    %cst_24 = arith.constant dense<0.000000e+00> : vector<2x512xf32>
    %106 = tpu.matmul %105, %4, %cst_24 {dimension_numbers = #tpu.dot_dimension_numbers<[1], [0], [0], [1], [0, 0, 1, 1], [], []>} : vector<2x256xbf16>, vector<256x512xbf16>, vector<2x512xf32> -> vector<2x512xf32>
    %107 = arith.addf %106, %7 : vector<2x512xf32>
    %108 = vector.extract_strided_slice %107 {offsets = [0, 0], sizes = [2, 128], strides = [1, 1]} : vector<2x512xf32> to vector<2x128xf32>
    %109 = arith.negf %108 : vector<2x128xf32>
    %110 = math.exp %109 : vector<2x128xf32>
    %cst_25 = arith.constant 1.000000e+00 : f32
    %111 = vector.broadcast %cst_25 : f32 to vector<2x128xf32>
    %112 = arith.addf %111, %110 : vector<2x128xf32>
    %113 = arith.divf %111, %112 : vector<2x128xf32>
    %114 = vector.extract_strided_slice %107 {offsets = [0, 128], sizes = [2, 128], strides = [1, 1]} : vector<2x512xf32> to vector<2x128xf32>
    %115 = arith.negf %114 : vector<2x128xf32>
    %116 = math.exp %115 : vector<2x128xf32>
    %cst_26 = arith.constant 1.000000e+00 : f32
    %117 = vector.broadcast %cst_26 : f32 to vector<2x128xf32>
    %118 = arith.addf %117, %116 : vector<2x128xf32>
    %119 = arith.divf %117, %118 : vector<2x128xf32>
    %120 = vector.extract_strided_slice %107 {offsets = [0, 256], sizes = [2, 128], strides = [1, 1]} : vector<2x512xf32> to vector<2x128xf32>
    %121 = math.tanh %120 : vector<2x128xf32>
    %122 = vector.extract_strided_slice %107 {offsets = [0, 384], sizes = [2, 128], strides = [1, 1]} : vector<2x512xf32> to vector<2x128xf32>
    %123 = arith.negf %122 : vector<2x128xf32>
    %124 = math.exp %123 : vector<2x128xf32>
    %cst_27 = arith.constant 1.000000e+00 : f32
    %125 = vector.broadcast %cst_27 : f32 to vector<2x128xf32>
    %126 = arith.addf %125, %124 : vector<2x128xf32>
    %127 = arith.divf %125, %126 : vector<2x128xf32>
    %128 = arith.mulf %119, %69 : vector<2x128xf32>
    %129 = arith.mulf %113, %121 : vector<2x128xf32>
    %130 = arith.addf %128, %129 : vector<2x128xf32>
    %131 = math.tanh %130 : vector<2x128xf32>
    %132 = arith.mulf %127, %131 : vector<2x128xf32>
    %133 = arith.truncf %132 : vector<2x128xf32> to vector<2x128xbf16>
    %c2_28 = arith.constant 2 : index
    %c0_29 = arith.constant 0 : index
    %134 = vector.load %arg5[%c2_28, %c0_29] : memref<16x128xbf16, #tpu.memory_space<vmem>>, vector<2x128xbf16>
    tpu.vector_store %arg5[%c2_28, %c0_29], %133 {strides = array<i32>} : memref<16x128xbf16, #tpu.memory_space<vmem>>, vector<2x128xbf16>,
    %c4 = arith.constant 4 : index
    %c0_30 = arith.constant 0 : index
    %135 = vector.load %arg1[%c4, %c0_30] : memref<16x512xbf16, #tpu.memory_space<vmem>>, vector<2x512xbf16>
    %136 = arith.extf %135 : vector<2x512xbf16> to vector<2x512xf32>
    %137 = arith.truncf %103 : vector<2x128xf32> to vector<2x128xbf16>
    %cst_31 = arith.constant dense<0.000000e+00> : vector<2x512xf32>
    %138 = tpu.matmul %137, %3, %cst_31 {dimension_numbers = #tpu.dot_dimension_numbers<[1], [0], [0], [1], [0, 0, 1, 1], [], []>} : vector<2x128xbf16>, vector<128x512xbf16>, vector<2x512xf32> -> vector<2x512xf32>
    %139 = arith.addf %136, %138 : vector<2x512xf32>
    %140 = vector.extract_strided_slice %139 {offsets = [0, 0], sizes = [2, 128], strides = [1, 1]} : vector<2x512xf32> to vector<2x128xf32>
    %141 = arith.negf %140 : vector<2x128xf32>
    %142 = math.exp %141 : vector<2x128xf32>
    %cst_32 = arith.constant 1.000000e+00 : f32
    %143 = vector.broadcast %cst_32 : f32 to vector<2x128xf32>
    %144 = arith.addf %143, %142 : vector<2x128xf32>
    %145 = arith.divf %143, %144 : vector<2x128xf32>
    %146 = vector.extract_strided_slice %139 {offsets = [0, 128], sizes = [2, 128], strides = [1, 1]} : vector<2x512xf32> to vector<2x128xf32>
    %147 = arith.negf %146 : vector<2x128xf32>
    %148 = math.exp %147 : vector<2x128xf32>
    %cst_33 = arith.constant 1.000000e+00 : f32
    %149 = vector.broadcast %cst_33 : f32 to vector<2x128xf32>
    %150 = arith.addf %149, %148 : vector<2x128xf32>
    %151 = arith.divf %149, %150 : vector<2x128xf32>
    %152 = vector.extract_strided_slice %139 {offsets = [0, 256], sizes = [2, 128], strides = [1, 1]} : vector<2x512xf32> to vector<2x128xf32>
    %153 = math.tanh %152 : vector<2x128xf32>
    %154 = vector.extract_strided_slice %139 {offsets = [0, 384], sizes = [2, 128], strides = [1, 1]} : vector<2x512xf32> to vector<2x128xf32>
    %155 = arith.negf %154 : vector<2x128xf32>
    %156 = math.exp %155 : vector<2x128xf32>
    %cst_34 = arith.constant 1.000000e+00 : f32
    %157 = vector.broadcast %cst_34 : f32 to vector<2x128xf32>
    %158 = arith.addf %157, %156 : vector<2x128xf32>
    %159 = arith.divf %157, %158 : vector<2x128xf32>
    %160 = arith.mulf %151, %101 : vector<2x128xf32>
    %161 = arith.mulf %145, %153 : vector<2x128xf32>
    %162 = arith.addf %160, %161 : vector<2x128xf32>
    %163 = math.tanh %162 : vector<2x128xf32>
    %164 = arith.mulf %159, %163 : vector<2x128xf32>
    %165 = tpu.concatenate %164, %132 in 1 : vector<2x128xf32>, vector<2x128xf32> -> vector<2x256xf32>
    %166 = arith.truncf %165 : vector<2x256xf32> to vector<2x256xbf16>
    %cst_35 = arith.constant dense<0.000000e+00> : vector<2x512xf32>
    %167 = tpu.matmul %166, %4, %cst_35 {dimension_numbers = #tpu.dot_dimension_numbers<[1], [0], [0], [1], [0, 0, 1, 1], [], []>} : vector<2x256xbf16>, vector<256x512xbf16>, vector<2x512xf32> -> vector<2x512xf32>
    %168 = arith.addf %167, %7 : vector<2x512xf32>
    %169 = vector.extract_strided_slice %168 {offsets = [0, 0], sizes = [2, 128], strides = [1, 1]} : vector<2x512xf32> to vector<2x128xf32>
    %170 = arith.negf %169 : vector<2x128xf32>
    %171 = math.exp %170 : vector<2x128xf32>
    %cst_36 = arith.constant 1.000000e+00 : f32
    %172 = vector.broadcast %cst_36 : f32 to vector<2x128xf32>
    %173 = arith.addf %172, %171 : vector<2x128xf32>
    %174 = arith.divf %172, %173 : vector<2x128xf32>
    %175 = vector.extract_strided_slice %168 {offsets = [0, 128], sizes = [2, 128], strides = [1, 1]} : vector<2x512xf32> to vector<2x128xf32>
    %176 = arith.negf %175 : vector<2x128xf32>
    %177 = math.exp %176 : vector<2x128xf32>
    %cst_37 = arith.constant 1.000000e+00 : f32
    %178 = vector.broadcast %cst_37 : f32 to vector<2x128xf32>
    %179 = arith.addf %178, %177 : vector<2x128xf32>
    %180 = arith.divf %178, %179 : vector<2x128xf32>
    %181 = vector.extract_strided_slice %168 {offsets = [0, 256], sizes = [2, 128], strides = [1, 1]} : vector<2x512xf32> to vector<2x128xf32>
    %182 = math.tanh %181 : vector<2x128xf32>
    %183 = vector.extract_strided_slice %168 {offsets = [0, 384], sizes = [2, 128], strides = [1, 1]} : vector<2x512xf32> to vector<2x128xf32>
    %184 = arith.negf %183 : vector<2x128xf32>
    %185 = math.exp %184 : vector<2x128xf32>
    %cst_38 = arith.constant 1.000000e+00 : f32
    %186 = vector.broadcast %cst_38 : f32 to vector<2x128xf32>
    %187 = arith.addf %186, %185 : vector<2x128xf32>
    %188 = arith.divf %186, %187 : vector<2x128xf32>
    %189 = arith.mulf %180, %130 : vector<2x128xf32>
    %190 = arith.mulf %174, %182 : vector<2x128xf32>
    %191 = arith.addf %189, %190 : vector<2x128xf32>
    %192 = math.tanh %191 : vector<2x128xf32>
    %193 = arith.mulf %188, %192 : vector<2x128xf32>
    %194 = arith.truncf %193 : vector<2x128xf32> to vector<2x128xbf16>
    %c4_39 = arith.constant 4 : index
    %c0_40 = arith.constant 0 : index
    %195 = vector.load %arg5[%c4_39, %c0_40] : memref<16x128xbf16, #tpu.memory_space<vmem>>, vector<2x128xbf16>
    tpu.vector_store %arg5[%c4_39, %c0_40], %194 {strides = array<i32>} : memref<16x128xbf16, #tpu.memory_space<vmem>>, vector<2x128xbf16>,
    %c6 = arith.constant 6 : index
    %c0_41 = arith.constant 0 : index
    %196 = vector.load %arg1[%c6, %c0_41] : memref<16x512xbf16, #tpu.memory_space<vmem>>, vector<2x512xbf16>
    %197 = arith.extf %196 : vector<2x512xbf16> to vector<2x512xf32>
    %198 = arith.truncf %164 : vector<2x128xf32> to vector<2x128xbf16>
    %cst_42 = arith.constant dense<0.000000e+00> : vector<2x512xf32>
    %199 = tpu.matmul %198, %3, %cst_42 {dimension_numbers = #tpu.dot_dimension_numbers<[1], [0], [0], [1], [0, 0, 1, 1], [], []>} : vector<2x128xbf16>, vector<128x512xbf16>, vector<2x512xf32> -> vector<2x512xf32>
    %200 = arith.addf %197, %199 : vector<2x512xf32>
    %201 = vector.extract_strided_slice %200 {offsets = [0, 0], sizes = [2, 128], strides = [1, 1]} : vector<2x512xf32> to vector<2x128xf32>
    %202 = arith.negf %201 : vector<2x128xf32>
    %203 = math.exp %202 : vector<2x128xf32>
    %cst_43 = arith.constant 1.000000e+00 : f32
    %204 = vector.broadcast %cst_43 : f32 to vector<2x128xf32>
    %205 = arith.addf %204, %203 : vector<2x128xf32>
    %206 = arith.divf %204, %205 : vector<2x128xf32>
    %207 = vector.extract_strided_slice %200 {offsets = [0, 128], sizes = [2, 128], strides = [1, 1]} : vector<2x512xf32> to vector<2x128xf32>
    %208 = arith.negf %207 : vector<2x128xf32>
    %209 = math.exp %208 : vector<2x128xf32>
    %cst_44 = arith.constant 1.000000e+00 : f32
    %210 = vector.broadcast %cst_44 : f32 to vector<2x128xf32>
    %211 = arith.addf %210, %209 : vector<2x128xf32>
    %212 = arith.divf %210, %211 : vector<2x128xf32>
    %213 = vector.extract_strided_slice %200 {offsets = [0, 256], sizes = [2, 128], strides = [1, 1]} : vector<2x512xf32> to vector<2x128xf32>
    %214 = math.tanh %213 : vector<2x128xf32>
    %215 = vector.extract_strided_slice %200 {offsets = [0, 384], sizes = [2, 128], strides = [1, 1]} : vector<2x512xf32> to vector<2x128xf32>
    %216 = arith.negf %215 : vector<2x128xf32>
    %217 = math.exp %216 : vector<2x128xf32>
    %cst_45 = arith.constant 1.000000e+00 : f32
    %218 = vector.broadcast %cst_45 : f32 to vector<2x128xf32>
    %219 = arith.addf %218, %217 : vector<2x128xf32>
    %220 = arith.divf %218, %219 : vector<2x128xf32>
    %221 = arith.mulf %212, %162 : vector<2x128xf32>
    %222 = arith.mulf %206, %214 : vector<2x128xf32>
    %223 = arith.addf %221, %222 : vector<2x128xf32>
    %224 = math.tanh %223 : vector<2x128xf32>
    %225 = arith.mulf %220, %224 : vector<2x128xf32>
    %226 = tpu.concatenate %225, %193 in 1 : vector<2x128xf32>, vector<2x128xf32> -> vector<2x256xf32>
    %227 = arith.truncf %226 : vector<2x256xf32> to vector<2x256xbf16>
    %cst_46 = arith.constant dense<0.000000e+00> : vector<2x512xf32>
    %228 = tpu.matmul %227, %4, %cst_46 {dimension_numbers = #tpu.dot_dimension_numbers<[1], [0], [0], [1], [0, 0, 1, 1], [], []>} : vector<2x256xbf16>, vector<256x512xbf16>, vector<2x512xf32> -> vector<2x512xf32>
    %229 = arith.addf %228, %7 : vector<2x512xf32>
    %230 = vector.extract_strided_slice %229 {offsets = [0, 0], sizes = [2, 128], strides = [1, 1]} : vector<2x512xf32> to vector<2x128xf32>
    %231 = arith.negf %230 : vector<2x128xf32>
    %232 = math.exp %231 : vector<2x128xf32>
    %cst_47 = arith.constant 1.000000e+00 : f32
    %233 = vector.broadcast %cst_47 : f32 to vector<2x128xf32>
    %234 = arith.addf %233, %232 : vector<2x128xf32>
    %235 = arith.divf %233, %234 : vector<2x128xf32>
    %236 = vector.extract_strided_slice %229 {offsets = [0, 128], sizes = [2, 128], strides = [1, 1]} : vector<2x512xf32> to vector<2x128xf32>
    %237 = arith.negf %236 : vector<2x128xf32>
    %238 = math.exp %237 : vector<2x128xf32>
    %cst_48 = arith.constant 1.000000e+00 : f32
    %239 = vector.broadcast %cst_48 : f32 to vector<2x128xf32>
    %240 = arith.addf %239, %238 : vector<2x128xf32>
    %241 = arith.divf %239, %240 : vector<2x128xf32>
    %242 = vector.extract_strided_slice %229 {offsets = [0, 256], sizes = [2, 128], strides = [1, 1]} : vector<2x512xf32> to vector<2x128xf32>
    %243 = math.tanh %242 : vector<2x128xf32>
    %244 = vector.extract_strided_slice %229 {offsets = [0, 384], sizes = [2, 128], strides = [1, 1]} : vector<2x512xf32> to vector<2x128xf32>
    %245 = arith.negf %244 : vector<2x128xf32>
    %246 = math.exp %245 : vector<2x128xf32>
    %cst_49 = arith.constant 1.000000e+00 : f32
    %247 = vector.broadcast %cst_49 : f32 to vector<2x128xf32>
    %248 = arith.addf %247, %246 : vector<2x128xf32>
    %249 = arith.divf %247, %248 : vector<2x128xf32>
    %250 = arith.mulf %241, %191 : vector<2x128xf32>
    %251 = arith.mulf %235, %243 : vector<2x128xf32>
    %252 = arith.addf %250, %251 : vector<2x128xf32>
    %253 = math.tanh %252 : vector<2x128xf32>
    %254 = arith.mulf %249, %253 : vector<2x128xf32>
    %255 = arith.truncf %254 : vector<2x128xf32> to vector<2x128xbf16>
    %c6_50 = arith.constant 6 : index
    %c0_51 = arith.constant 0 : index
    %256 = vector.load %arg5[%c6_50, %c0_51] : memref<16x128xbf16, #tpu.memory_space<vmem>>, vector<2x128xbf16>
    tpu.vector_store %arg5[%c6_50, %c0_51], %255 {strides = array<i32>} : memref<16x128xbf16, #tpu.memory_space<vmem>>, vector<2x128xbf16>,
    %c8 = arith.constant 8 : index
    %c0_52 = arith.constant 0 : index
    %257 = vector.load %arg1[%c8, %c0_52] : memref<16x512xbf16, #tpu.memory_space<vmem>>, vector<2x512xbf16>
    %258 = arith.extf %257 : vector<2x512xbf16> to vector<2x512xf32>
    %259 = arith.truncf %225 : vector<2x128xf32> to vector<2x128xbf16>
    %cst_53 = arith.constant dense<0.000000e+00> : vector<2x512xf32>
    %260 = tpu.matmul %259, %3, %cst_53 {dimension_numbers = #tpu.dot_dimension_numbers<[1], [0], [0], [1], [0, 0, 1, 1], [], []>} : vector<2x128xbf16>, vector<128x512xbf16>, vector<2x512xf32> -> vector<2x512xf32>
    %261 = arith.addf %258, %260 : vector<2x512xf32>
    %262 = vector.extract_strided_slice %261 {offsets = [0, 0], sizes = [2, 128], strides = [1, 1]} : vector<2x512xf32> to vector<2x128xf32>
    %263 = arith.negf %262 : vector<2x128xf32>
    %264 = math.exp %263 : vector<2x128xf32>
    %cst_54 = arith.constant 1.000000e+00 : f32
    %265 = vector.broadcast %cst_54 : f32 to vector<2x128xf32>
    %266 = arith.addf %265, %264 : vector<2x128xf32>
    %267 = arith.divf %265, %266 : vector<2x128xf32>
    %268 = vector.extract_strided_slice %261 {offsets = [0, 128], sizes = [2, 128], strides = [1, 1]} : vector<2x512xf32> to vector<2x128xf32>
    %269 = arith.negf %268 : vector<2x128xf32>
    %270 = math.exp %269 : vector<2x128xf32>
    %cst_55 = arith.constant 1.000000e+00 : f32
    %271 = vector.broadcast %cst_55 : f32 to vector<2x128xf32>
    %272 = arith.addf %271, %270 : vector<2x128xf32>
    %273 = arith.divf %271, %272 : vector<2x128xf32>
    %274 = vector.extract_strided_slice %261 {offsets = [0, 256], sizes = [2, 128], strides = [1, 1]} : vector<2x512xf32> to vector<2x128xf32>
    %275 = math.tanh %274 : vector<2x128xf32>
    %276 = vector.extract_strided_slice %261 {offsets = [0, 384], sizes = [2, 128], strides = [1, 1]} : vector<2x512xf32> to vector<2x128xf32>
    %277 = arith.negf %276 : vector<2x128xf32>
    %278 = math.exp %277 : vector<2x128xf32>
    %cst_56 = arith.constant 1.000000e+00 : f32
    %279 = vector.broadcast %cst_56 : f32 to vector<2x128xf32>
    %280 = arith.addf %279, %278 : vector<2x128xf32>
    %281 = arith.divf %279, %280 : vector<2x128xf32>
    %282 = arith.mulf %273, %223 : vector<2x128xf32>
    %283 = arith.mulf %267, %275 : vector<2x128xf32>
    %284 = arith.addf %282, %283 : vector<2x128xf32>
    %285 = math.tanh %284 : vector<2x128xf32>
    %286 = arith.mulf %281, %285 : vector<2x128xf32>
    %287 = tpu.concatenate %286, %254 in 1 : vector<2x128xf32>, vector<2x128xf32> -> vector<2x256xf32>
    %288 = arith.truncf %287 : vector<2x256xf32> to vector<2x256xbf16>
    %cst_57 = arith.constant dense<0.000000e+00> : vector<2x512xf32>
    %289 = tpu.matmul %288, %4, %cst_57 {dimension_numbers = #tpu.dot_dimension_numbers<[1], [0], [0], [1], [0, 0, 1, 1], [], []>} : vector<2x256xbf16>, vector<256x512xbf16>, vector<2x512xf32> -> vector<2x512xf32>
    %290 = arith.addf %289, %7 : vector<2x512xf32>
    %291 = vector.extract_strided_slice %290 {offsets = [0, 0], sizes = [2, 128], strides = [1, 1]} : vector<2x512xf32> to vector<2x128xf32>
    %292 = arith.negf %291 : vector<2x128xf32>
    %293 = math.exp %292 : vector<2x128xf32>
    %cst_58 = arith.constant 1.000000e+00 : f32
    %294 = vector.broadcast %cst_58 : f32 to vector<2x128xf32>
    %295 = arith.addf %294, %293 : vector<2x128xf32>
    %296 = arith.divf %294, %295 : vector<2x128xf32>
    %297 = vector.extract_strided_slice %290 {offsets = [0, 128], sizes = [2, 128], strides = [1, 1]} : vector<2x512xf32> to vector<2x128xf32>
    %298 = arith.negf %297 : vector<2x128xf32>
    %299 = math.exp %298 : vector<2x128xf32>
    %cst_59 = arith.constant 1.000000e+00 : f32
    %300 = vector.broadcast %cst_59 : f32 to vector<2x128xf32>
    %301 = arith.addf %300, %299 : vector<2x128xf32>
    %302 = arith.divf %300, %301 : vector<2x128xf32>
    %303 = vector.extract_strided_slice %290 {offsets = [0, 256], sizes = [2, 128], strides = [1, 1]} : vector<2x512xf32> to vector<2x128xf32>
    %304 = math.tanh %303 : vector<2x128xf32>
    %305 = vector.extract_strided_slice %290 {offsets = [0, 384], sizes = [2, 128], strides = [1, 1]} : vector<2x512xf32> to vector<2x128xf32>
    %306 = arith.negf %305 : vector<2x128xf32>
    %307 = math.exp %306 : vector<2x128xf32>
    %cst_60 = arith.constant 1.000000e+00 : f32
    %308 = vector.broadcast %cst_60 : f32 to vector<2x128xf32>
    %309 = arith.addf %308, %307 : vector<2x128xf32>
    %310 = arith.divf %308, %309 : vector<2x128xf32>
    %311 = arith.mulf %302, %252 : vector<2x128xf32>
    %312 = arith.mulf %296, %304 : vector<2x128xf32>
    %313 = arith.addf %311, %312 : vector<2x128xf32>
    %314 = math.tanh %313 : vector<2x128xf32>
    %315 = arith.mulf %310, %314 : vector<2x128xf32>
    %316 = arith.truncf %315 : vector<2x128xf32> to vector<2x128xbf16>
    %c8_61 = arith.constant 8 : index
    %c0_62 = arith.constant 0 : index
    %317 = vector.load %arg5[%c8_61, %c0_62] : memref<16x128xbf16, #tpu.memory_space<vmem>>, vector<2x128xbf16>
    tpu.vector_store %arg5[%c8_61, %c0_62], %316 {strides = array<i32>} : memref<16x128xbf16, #tpu.memory_space<vmem>>, vector<2x128xbf16>,
    %c10 = arith.constant 10 : index
    %c0_63 = arith.constant 0 : index
    %318 = vector.load %arg1[%c10, %c0_63] : memref<16x512xbf16, #tpu.memory_space<vmem>>, vector<2x512xbf16>
    %319 = arith.extf %318 : vector<2x512xbf16> to vector<2x512xf32>
    %320 = arith.truncf %286 : vector<2x128xf32> to vector<2x128xbf16>
    %cst_64 = arith.constant dense<0.000000e+00> : vector<2x512xf32>
    %321 = tpu.matmul %320, %3, %cst_64 {dimension_numbers = #tpu.dot_dimension_numbers<[1], [0], [0], [1], [0, 0, 1, 1], [], []>} : vector<2x128xbf16>, vector<128x512xbf16>, vector<2x512xf32> -> vector<2x512xf32>
    %322 = arith.addf %319, %321 : vector<2x512xf32>
    %323 = vector.extract_strided_slice %322 {offsets = [0, 0], sizes = [2, 128], strides = [1, 1]} : vector<2x512xf32> to vector<2x128xf32>
    %324 = arith.negf %323 : vector<2x128xf32>
    %325 = math.exp %324 : vector<2x128xf32>
    %cst_65 = arith.constant 1.000000e+00 : f32
    %326 = vector.broadcast %cst_65 : f32 to vector<2x128xf32>
    %327 = arith.addf %326, %325 : vector<2x128xf32>
    %328 = arith.divf %326, %327 : vector<2x128xf32>
    %329 = vector.extract_strided_slice %322 {offsets = [0, 128], sizes = [2, 128], strides = [1, 1]} : vector<2x512xf32> to vector<2x128xf32>
    %330 = arith.negf %329 : vector<2x128xf32>
    %331 = math.exp %330 : vector<2x128xf32>
    %cst_66 = arith.constant 1.000000e+00 : f32
    %332 = vector.broadcast %cst_66 : f32 to vector<2x128xf32>
    %333 = arith.addf %332, %331 : vector<2x128xf32>
    %334 = arith.divf %332, %333 : vector<2x128xf32>
    %335 = vector.extract_strided_slice %322 {offsets = [0, 256], sizes = [2, 128], strides = [1, 1]} : vector<2x512xf32> to vector<2x128xf32>
    %336 = math.tanh %335 : vector<2x128xf32>
    %337 = vector.extract_strided_slice %322 {offsets = [0, 384], sizes = [2, 128], strides = [1, 1]} : vector<2x512xf32> to vector<2x128xf32>
    %338 = arith.negf %337 : vector<2x128xf32>
    %339 = math.exp %338 : vector<2x128xf32>
    %cst_67 = arith.constant 1.000000e+00 : f32
    %340 = vector.broadcast %cst_67 : f32 to vector<2x128xf32>
    %341 = arith.addf %340, %339 : vector<2x128xf32>
    %342 = arith.divf %340, %341 : vector<2x128xf32>
    %343 = arith.mulf %334, %284 : vector<2x128xf32>
    %344 = arith.mulf %328, %336 : vector<2x128xf32>
    %345 = arith.addf %343, %344 : vector<2x128xf32>
    %346 = math.tanh %345 : vector<2x128xf32>
    %347 = arith.mulf %342, %346 : vector<2x128xf32>
    %348 = tpu.concatenate %347, %315 in 1 : vector<2x128xf32>, vector<2x128xf32> -> vector<2x256xf32>
    %349 = arith.truncf %348 : vector<2x256xf32> to vector<2x256xbf16>
    %cst_68 = arith.constant dense<0.000000e+00> : vector<2x512xf32>
    %350 = tpu.matmul %349, %4, %cst_68 {dimension_numbers = #tpu.dot_dimension_numbers<[1], [0], [0], [1], [0, 0, 1, 1], [], []>} : vector<2x256xbf16>, vector<256x512xbf16>, vector<2x512xf32> -> vector<2x512xf32>
    %351 = arith.addf %350, %7 : vector<2x512xf32>
    %352 = vector.extract_strided_slice %351 {offsets = [0, 0], sizes = [2, 128], strides = [1, 1]} : vector<2x512xf32> to vector<2x128xf32>
    %353 = arith.negf %352 : vector<2x128xf32>
    %354 = math.exp %353 : vector<2x128xf32>
    %cst_69 = arith.constant 1.000000e+00 : f32
    %355 = vector.broadcast %cst_69 : f32 to vector<2x128xf32>
    %356 = arith.addf %355, %354 : vector<2x128xf32>
    %357 = arith.divf %355, %356 : vector<2x128xf32>
    %358 = vector.extract_strided_slice %351 {offsets = [0, 128], sizes = [2, 128], strides = [1, 1]} : vector<2x512xf32> to vector<2x128xf32>
    %359 = arith.negf %358 : vector<2x128xf32>
    %360 = math.exp %359 : vector<2x128xf32>
    %cst_70 = arith.constant 1.000000e+00 : f32
    %361 = vector.broadcast %cst_70 : f32 to vector<2x128xf32>
    %362 = arith.addf %361, %360 : vector<2x128xf32>
    %363 = arith.divf %361, %362 : vector<2x128xf32>
    %364 = vector.extract_strided_slice %351 {offsets = [0, 256], sizes = [2, 128], strides = [1, 1]} : vector<2x512xf32> to vector<2x128xf32>
    %365 = math.tanh %364 : vector<2x128xf32>
    %366 = vector.extract_strided_slice %351 {offsets = [0, 384], sizes = [2, 128], strides = [1, 1]} : vector<2x512xf32> to vector<2x128xf32>
    %367 = arith.negf %366 : vector<2x128xf32>
    %368 = math.exp %367 : vector<2x128xf32>
    %cst_71 = arith.constant 1.000000e+00 : f32
    %369 = vector.broadcast %cst_71 : f32 to vector<2x128xf32>
    %370 = arith.addf %369, %368 : vector<2x128xf32>
    %371 = arith.divf %369, %370 : vector<2x128xf32>
    %372 = arith.mulf %363, %313 : vector<2x128xf32>
    %373 = arith.mulf %357, %365 : vector<2x128xf32>
    %374 = arith.addf %372, %373 : vector<2x128xf32>
    %375 = math.tanh %374 : vector<2x128xf32>
    %376 = arith.mulf %371, %375 : vector<2x128xf32>
    %377 = arith.truncf %376 : vector<2x128xf32> to vector<2x128xbf16>
    %c10_72 = arith.constant 10 : index
    %c0_73 = arith.constant 0 : index
    %378 = vector.load %arg5[%c10_72, %c0_73] : memref<16x128xbf16, #tpu.memory_space<vmem>>, vector<2x128xbf16>
    tpu.vector_store %arg5[%c10_72, %c0_73], %377 {strides = array<i32>} : memref<16x128xbf16, #tpu.memory_space<vmem>>, vector<2x128xbf16>,
    %c12 = arith.constant 12 : index
    %c0_74 = arith.constant 0 : index
    %379 = vector.load %arg1[%c12, %c0_74] : memref<16x512xbf16, #tpu.memory_space<vmem>>, vector<2x512xbf16>
    %380 = arith.extf %379 : vector<2x512xbf16> to vector<2x512xf32>
    %381 = arith.truncf %347 : vector<2x128xf32> to vector<2x128xbf16>
    %cst_75 = arith.constant dense<0.000000e+00> : vector<2x512xf32>
    %382 = tpu.matmul %381, %3, %cst_75 {dimension_numbers = #tpu.dot_dimension_numbers<[1], [0], [0], [1], [0, 0, 1, 1], [], []>} : vector<2x128xbf16>, vector<128x512xbf16>, vector<2x512xf32> -> vector<2x512xf32>
    %383 = arith.addf %380, %382 : vector<2x512xf32>
    %384 = vector.extract_strided_slice %383 {offsets = [0, 0], sizes = [2, 128], strides = [1, 1]} : vector<2x512xf32> to vector<2x128xf32>
    %385 = arith.negf %384 : vector<2x128xf32>
    %386 = math.exp %385 : vector<2x128xf32>
    %cst_76 = arith.constant 1.000000e+00 : f32
    %387 = vector.broadcast %cst_76 : f32 to vector<2x128xf32>
    %388 = arith.addf %387, %386 : vector<2x128xf32>
    %389 = arith.divf %387, %388 : vector<2x128xf32>
    %390 = vector.extract_strided_slice %383 {offsets = [0, 128], sizes = [2, 128], strides = [1, 1]} : vector<2x512xf32> to vector<2x128xf32>
    %391 = arith.negf %390 : vector<2x128xf32>
    %392 = math.exp %391 : vector<2x128xf32>
    %cst_77 = arith.constant 1.000000e+00 : f32
    %393 = vector.broadcast %cst_77 : f32 to vector<2x128xf32>
    %394 = arith.addf %393, %392 : vector<2x128xf32>
    %395 = arith.divf %393, %394 : vector<2x128xf32>
    %396 = vector.extract_strided_slice %383 {offsets = [0, 256], sizes = [2, 128], strides = [1, 1]} : vector<2x512xf32> to vector<2x128xf32>
    %397 = math.tanh %396 : vector<2x128xf32>
    %398 = vector.extract_strided_slice %383 {offsets = [0, 384], sizes = [2, 128], strides = [1, 1]} : vector<2x512xf32> to vector<2x128xf32>
    %399 = arith.negf %398 : vector<2x128xf32>
    %400 = math.exp %399 : vector<2x128xf32>
    %cst_78 = arith.constant 1.000000e+00 : f32
    %401 = vector.broadcast %cst_78 : f32 to vector<2x128xf32>
    %402 = arith.addf %401, %400 : vector<2x128xf32>
    %403 = arith.divf %401, %402 : vector<2x128xf32>
    %404 = arith.mulf %395, %345 : vector<2x128xf32>
    %405 = arith.mulf %389, %397 : vector<2x128xf32>
    %406 = arith.addf %404, %405 : vector<2x128xf32>
    %407 = math.tanh %406 : vector<2x128xf32>
    %408 = arith.mulf %403, %407 : vector<2x128xf32>
    %409 = tpu.concatenate %408, %376 in 1 : vector<2x128xf32>, vector<2x128xf32> -> vector<2x256xf32>
    %410 = arith.truncf %409 : vector<2x256xf32> to vector<2x256xbf16>
    %cst_79 = arith.constant dense<0.000000e+00> : vector<2x512xf32>
    %411 = tpu.matmul %410, %4, %cst_79 {dimension_numbers = #tpu.dot_dimension_numbers<[1], [0], [0], [1], [0, 0, 1, 1], [], []>} : vector<2x256xbf16>, vector<256x512xbf16>, vector<2x512xf32> -> vector<2x512xf32>
    %412 = arith.addf %411, %7 : vector<2x512xf32>
    %413 = vector.extract_strided_slice %412 {offsets = [0, 0], sizes = [2, 128], strides = [1, 1]} : vector<2x512xf32> to vector<2x128xf32>
    %414 = arith.negf %413 : vector<2x128xf32>
    %415 = math.exp %414 : vector<2x128xf32>
    %cst_80 = arith.constant 1.000000e+00 : f32
    %416 = vector.broadcast %cst_80 : f32 to vector<2x128xf32>
    %417 = arith.addf %416, %415 : vector<2x128xf32>
    %418 = arith.divf %416, %417 : vector<2x128xf32>
    %419 = vector.extract_strided_slice %412 {offsets = [0, 128], sizes = [2, 128], strides = [1, 1]} : vector<2x512xf32> to vector<2x128xf32>
    %420 = arith.negf %419 : vector<2x128xf32>
    %421 = math.exp %420 : vector<2x128xf32>
    %cst_81 = arith.constant 1.000000e+00 : f32
    %422 = vector.broadcast %cst_81 : f32 to vector<2x128xf32>
    %423 = arith.addf %422, %421 : vector<2x128xf32>
    %424 = arith.divf %422, %423 : vector<2x128xf32>
    %425 = vector.extract_strided_slice %412 {offsets = [0, 256], sizes = [2, 128], strides = [1, 1]} : vector<2x512xf32> to vector<2x128xf32>
    %426 = math.tanh %425 : vector<2x128xf32>
    %427 = vector.extract_strided_slice %412 {offsets = [0, 384], sizes = [2, 128], strides = [1, 1]} : vector<2x512xf32> to vector<2x128xf32>
    %428 = arith.negf %427 : vector<2x128xf32>
    %429 = math.exp %428 : vector<2x128xf32>
    %cst_82 = arith.constant 1.000000e+00 : f32
    %430 = vector.broadcast %cst_82 : f32 to vector<2x128xf32>
    %431 = arith.addf %430, %429 : vector<2x128xf32>
    %432 = arith.divf %430, %431 : vector<2x128xf32>
    %433 = arith.mulf %424, %374 : vector<2x128xf32>
    %434 = arith.mulf %418, %426 : vector<2x128xf32>
    %435 = arith.addf %433, %434 : vector<2x128xf32>
    %436 = math.tanh %435 : vector<2x128xf32>
    %437 = arith.mulf %432, %436 : vector<2x128xf32>
    %438 = arith.truncf %437 : vector<2x128xf32> to vector<2x128xbf16>
    %c12_83 = arith.constant 12 : index
    %c0_84 = arith.constant 0 : index
    %439 = vector.load %arg5[%c12_83, %c0_84] : memref<16x128xbf16, #tpu.memory_space<vmem>>, vector<2x128xbf16>
    tpu.vector_store %arg5[%c12_83, %c0_84], %438 {strides = array<i32>} : memref<16x128xbf16, #tpu.memory_space<vmem>>, vector<2x128xbf16>,
    %c14 = arith.constant 14 : index
    %c0_85 = arith.constant 0 : index
    %440 = vector.load %arg1[%c14, %c0_85] : memref<16x512xbf16, #tpu.memory_space<vmem>>, vector<2x512xbf16>
    %441 = arith.extf %440 : vector<2x512xbf16> to vector<2x512xf32>
    %442 = arith.truncf %408 : vector<2x128xf32> to vector<2x128xbf16>
    %cst_86 = arith.constant dense<0.000000e+00> : vector<2x512xf32>
    %443 = tpu.matmul %442, %3, %cst_86 {dimension_numbers = #tpu.dot_dimension_numbers<[1], [0], [0], [1], [0, 0, 1, 1], [], []>} : vector<2x128xbf16>, vector<128x512xbf16>, vector<2x512xf32> -> vector<2x512xf32>
    %444 = arith.addf %441, %443 : vector<2x512xf32>
    %445 = vector.extract_strided_slice %444 {offsets = [0, 0], sizes = [2, 128], strides = [1, 1]} : vector<2x512xf32> to vector<2x128xf32>
    %446 = arith.negf %445 : vector<2x128xf32>
    %447 = math.exp %446 : vector<2x128xf32>
    %cst_87 = arith.constant 1.000000e+00 : f32
    %448 = vector.broadcast %cst_87 : f32 to vector<2x128xf32>
    %449 = arith.addf %448, %447 : vector<2x128xf32>
    %450 = arith.divf %448, %449 : vector<2x128xf32>
    %451 = vector.extract_strided_slice %444 {offsets = [0, 128], sizes = [2, 128], strides = [1, 1]} : vector<2x512xf32> to vector<2x128xf32>
    %452 = arith.negf %451 : vector<2x128xf32>
    %453 = math.exp %452 : vector<2x128xf32>
    %cst_88 = arith.constant 1.000000e+00 : f32
    %454 = vector.broadcast %cst_88 : f32 to vector<2x128xf32>
    %455 = arith.addf %454, %453 : vector<2x128xf32>
    %456 = arith.divf %454, %455 : vector<2x128xf32>
    %457 = vector.extract_strided_slice %444 {offsets = [0, 256], sizes = [2, 128], strides = [1, 1]} : vector<2x512xf32> to vector<2x128xf32>
    %458 = math.tanh %457 : vector<2x128xf32>
    %459 = vector.extract_strided_slice %444 {offsets = [0, 384], sizes = [2, 128], strides = [1, 1]} : vector<2x512xf32> to vector<2x128xf32>
    %460 = arith.negf %459 : vector<2x128xf32>
    %461 = math.exp %460 : vector<2x128xf32>
    %cst_89 = arith.constant 1.000000e+00 : f32
    %462 = vector.broadcast %cst_89 : f32 to vector<2x128xf32>
    %463 = arith.addf %462, %461 : vector<2x128xf32>
    %464 = arith.divf %462, %463 : vector<2x128xf32>
    %465 = arith.mulf %456, %406 : vector<2x128xf32>
    %466 = arith.mulf %450, %458 : vector<2x128xf32>
    %467 = arith.addf %465, %466 : vector<2x128xf32>
    %468 = math.tanh %467 : vector<2x128xf32>
    %469 = arith.mulf %464, %468 : vector<2x128xf32>
    %470 = tpu.concatenate %469, %437 in 1 : vector<2x128xf32>, vector<2x128xf32> -> vector<2x256xf32>
    %471 = arith.truncf %470 : vector<2x256xf32> to vector<2x256xbf16>
    %cst_90 = arith.constant dense<0.000000e+00> : vector<2x512xf32>
    %472 = tpu.matmul %471, %4, %cst_90 {dimension_numbers = #tpu.dot_dimension_numbers<[1], [0], [0], [1], [0, 0, 1, 1], [], []>} : vector<2x256xbf16>, vector<256x512xbf16>, vector<2x512xf32> -> vector<2x512xf32>
    %473 = arith.addf %472, %7 : vector<2x512xf32>
    %474 = vector.extract_strided_slice %473 {offsets = [0, 0], sizes = [2, 128], strides = [1, 1]} : vector<2x512xf32> to vector<2x128xf32>
    %475 = arith.negf %474 : vector<2x128xf32>
    %476 = math.exp %475 : vector<2x128xf32>
    %cst_91 = arith.constant 1.000000e+00 : f32
    %477 = vector.broadcast %cst_91 : f32 to vector<2x128xf32>
    %478 = arith.addf %477, %476 : vector<2x128xf32>
    %479 = arith.divf %477, %478 : vector<2x128xf32>
    %480 = vector.extract_strided_slice %473 {offsets = [0, 128], sizes = [2, 128], strides = [1, 1]} : vector<2x512xf32> to vector<2x128xf32>
    %481 = arith.negf %480 : vector<2x128xf32>
    %482 = math.exp %481 : vector<2x128xf32>
    %cst_92 = arith.constant 1.000000e+00 : f32
    %483 = vector.broadcast %cst_92 : f32 to vector<2x128xf32>
    %484 = arith.addf %483, %482 : vector<2x128xf32>
    %485 = arith.divf %483, %484 : vector<2x128xf32>
    %486 = vector.extract_strided_slice %473 {offsets = [0, 256], sizes = [2, 128], strides = [1, 1]} : vector<2x512xf32> to vector<2x128xf32>
    %487 = math.tanh %486 : vector<2x128xf32>
    %488 = vector.extract_strided_slice %473 {offsets = [0, 384], sizes = [2, 128], strides = [1, 1]} : vector<2x512xf32> to vector<2x128xf32>
    %489 = arith.negf %488 : vector<2x128xf32>
    %490 = math.exp %489 : vector<2x128xf32>
    %cst_93 = arith.constant 1.000000e+00 : f32
    %491 = vector.broadcast %cst_93 : f32 to vector<2x128xf32>
    %492 = arith.addf %491, %490 : vector<2x128xf32>
    %493 = arith.divf %491, %492 : vector<2x128xf32>
    %494 = arith.mulf %485, %435 : vector<2x128xf32>
    %495 = arith.mulf %479, %487 : vector<2x128xf32>
    %496 = arith.addf %494, %495 : vector<2x128xf32>
    %497 = math.tanh %496 : vector<2x128xf32>
    %498 = arith.mulf %493, %497 : vector<2x128xf32>
    %499 = arith.truncf %498 : vector<2x128xf32> to vector<2x128xbf16>
    %c14_94 = arith.constant 14 : index
    %c0_95 = arith.constant 0 : index
    %500 = vector.load %arg5[%c14_94, %c0_95] : memref<16x128xbf16, #tpu.memory_space<vmem>>, vector<2x128xbf16>
    tpu.vector_store %arg5[%c14_94, %c0_95], %499 {strides = array<i32>} : memref<16x128xbf16, #tpu.memory_space<vmem>>, vector<2x128xbf16>,
    %501 = tpu.concatenate %469, %467, %498, %496 in 0 : vector<2x128xf32>, vector<2x128xf32>, vector<2x128xf32>, vector<2x128xf32> -> vector<8x128xf32>
    %c0_96 = arith.constant 0 : index
    %c0_97 = arith.constant 0 : index
    %502 = vector.load %arg8[%c0_96, %c0_97] : memref<8x128xf32, #tpu.memory_space<vmem>>, vector<8x128xf32>
    tpu.vector_store %arg8[%c0_96, %c0_97], %501 {strides = array<i32>} : memref<8x128xf32, #tpu.memory_space<vmem>>, vector<8x128xf32>,
    %503 = tpu.concatenate %469, %498 in 0 : vector<2x128xf32>, vector<2x128xf32> -> vector<4x128xf32>
    %c0_98 = arith.constant 0 : index
    %c0_99 = arith.constant 0 : index
    %504 = vector.load %arg6[%c0_98, %c0_99] : memref<4x128xf32, #tpu.memory_space<vmem>>, vector<4x128xf32>
    tpu.vector_store %arg6[%c0_98, %c0_99], %503 {strides = array<i32>} : memref<4x128xf32, #tpu.memory_space<vmem>>, vector<4x128xf32>,
    %505 = tpu.concatenate %467, %496 in 0 : vector<2x128xf32>, vector<2x128xf32> -> vector<4x128xf32>
    %c0_100 = arith.constant 0 : index
    %c0_101 = arith.constant 0 : index
    %506 = vector.load %arg7[%c0_100, %c0_101] : memref<4x128xf32, #tpu.memory_space<vmem>>, vector<4x128xf32>
    tpu.vector_store %arg7[%c0_100, %c0_101], %505 {strides = array<i32>} : memref<4x128xf32, #tpu.memory_space<vmem>>, vector<4x128xf32>,
    return
  }
  func.func @transform_0(%arg0: i32) -> (i32, i32) {
    %c0_i32 = arith.constant 0 : i32
    %c0_i32_0 = arith.constant 0 : i32
    return %arg0, %c0_i32 : i32, i32
  }
  func.func @transform_1(%arg0: i32) -> (i32, i32) {
    %c0_i32 = arith.constant 0 : i32
    %c0_i32_0 = arith.constant 0 : i32
    %c0_i32_1 = arith.constant 0 : i32
    return %c0_i32, %c0_i32_0 : i32, i32
  }
  func.func @transform_2(%arg0: i32) -> (i32, i32) {
    %c0_i32 = arith.constant 0 : i32
    %c0_i32_0 = arith.constant 0 : i32
    %c0_i32_1 = arith.constant 0 : i32
    return %c0_i32, %c0_i32_0 : i32, i32
  }
  func.func @transform_3(%arg0: i32) -> (i32, i32) {
    %c0_i32 = arith.constant 0 : i32
    %c0_i32_0 = arith.constant 0 : i32
    %c0_i32_1 = arith.constant 0 : i32
    return %c0_i32, %c0_i32_0 : i32, i32
  }
  func.func @transform_4(%arg0: i32) -> (i32, i32) {
    %c0_i32 = arith.constant 0 : i32
    %c0_i32_0 = arith.constant 0 : i32
    return %arg0, %c0_i32 : i32, i32
  }
  func.func @transform_5(%arg0: i32) -> (i32, i32) {
    %c0_i32 = arith.constant 0 : i32
    %c0_i32_0 = arith.constant 0 : i32
    %c0_i32_1 = arith.constant 0 : i32
    return %c0_i32, %c0_i32_0 : i32, i32
  }
  func.func @transform_6(%arg0: i32) -> (i32, i32) {
    %c0_i32 = arith.constant 0 : i32
    %c0_i32_0 = arith.constant 0 : i32
    %c0_i32_1 = arith.constant 0 : i32
    return %c0_i32, %c0_i32_0 : i32, i32
  }
}

</mosaic_0001>

<bundles_post_ra>
// kernel: text_generation_forward.3
= control target key start
LH: loop header
LB: loop body
LE: loop exit
PB: predicated region body
PF: predicated region fallthrough
CT: control target
= control target key end

     0   :  { %8 = vsyncpa [#allocation3], 0  ;;  %s823_s0 = inlined_call_operand.vmem [shape: bf16[32,128], index: 0, kind: input, shape index: {}]   ;;  %s824_s1 = inlined_call_operand.vmem [shape: bf16[128,128], index: 1, kind: input, shape index: {}]   ;;  %s825_s2 = inlined_call_operand.vmem [shape: f32[1,128], index: 2, kind: input, shape index: {}]   ;;  %s826_s3 = inlined_call_operand.hbm [shape: f32[32,128], index: 3, kind: output, shape index: {}]  }
   0x1   :  { %10 = vsyncpa [#allocation3 + $0x1], 0  ;;  %s682_s12 = smov 0   ;;  %s684_s13 = smov 0  }
   0x2   :  { %s686_s14 = smov 0   ;;  %s688_s15 = smov 0  }
   0x3   :  { %s690_s16 = smov 0   ;;  %s692_s17 = smov 0  }
   0x4 LB: > { %s454_s18 = sadd.s32 4294967295, %s655_s17   ;;  %s455_s19 = sadd.s32 4294967294, %s655_s17   ;;  %s655_s17 = sphi %s692_s17, %s16_s17   ;;  %s651_s16 = sphi %s690_s16, %s833_s16   ;;  %s647_s15 = sphi %s688_s15, %s832_s15   ;;  %s643_s14 = sphi %s686_s14, %s831_s14   ;;  %s639_s13 = sphi %s684_s13, %s830_s13   ;;  %s635_s12 = sphi %s682_s12, %s829_s12  }
   0x5   : > { %s28_s20 = sadd.s32 1, %s651_s16  ;;  %s115_s21 = sadd.s32 1, %s643_s14 }
   0x6   : > { %p30_p0 = scmp.ge.s32.totalorder %s28_s20, 2  ;;  %p125_p1 = scmp.ne.s32.totalorder %s643_s14, %s639_s13 }
   0x7   : > { %p126_p2 = scmp.eq.s32.totalorder %s454_s18, 1  ;;  %p131_p3 = scmp.ne.s32.totalorder %s639_s13, %s635_s12 }
   0x8   : > { %s835_s20 = smov (%p30_p0, %s28_s20), 0  ;;  %p132_p5 = scmp.eq.s32.totalorder %s455_s19, 1 }
   0x9   : > { %p722_p4 = por %p126_p2, %p125_p1  ;;  %s110_s23 = ssub.s32 %s651_s16, %s835_s20 }
   0xa   : > { %p460_p6 = scmp.ge.s32.totalorder %s655_s17, 1  ;;  %p113_p7 = scmp.eq.s32.totalorder %s110_s23, 0 }
   0xb   : > { %p729_p8 = por %p132_p5, %p131_p3  ;;  %p172_p9 = scmp.lt.s32.totalorder %s655_s17, 3 }
   0xc   : > { %s735_s25 = scalar_select %p113_p7, %s643_s14, %s115_s21  }
   0xd   : > { %p173_p10 = pnand %p460_p6, %p172_p9 }
   0xe   : > { %v568_v0 = vld [vmem:[%s824_s1] sm:$0xff] (!%p173_p10)   ;;  %v657_v1 = vmov (!%p173_p10), 0.0   ;;  %v569_v2 = vld [vmem:[%s824_s1 + $0x8] sm:$0xff] (!%p173_p10)   ;;  %vm658_vm0 = vmmov (!%p173_p10), 0   ;;  %s462_s30 = sshll.u32 (!%p173_p10), %s647_s15, 1  ;;  %v570_v3 = vld [vmem:[%s824_s1 + $0x10] sm:$0xff] (!%p173_p10)  }
   0xf   : > { %176 = sbr.rel (%p173_p10) target bundleno = 278 (0x116), region = 32  ;;  %489 = vmatprep.subr.bf16.mxu0 (!%p173_p10), %v657_v1  ;;  %505 = vmatprep.mubr.msk.bf16.mxu0 (!%p173_p10), %vm658_vm0, %v657_v1  ;;  %p204_p11 = scmp.lt.s32.totalorder (!%p173_p10), %s462_s30, 3  ;;  %v571_v4 = vld [vmem:[%s824_s1 + $0x18] sm:$0xff] (!%p173_p10)   ;;  %v572_v5 = vld [vmem:[%s824_s1 + $0x20] sm:$0xff] (!%p173_p10)   ;;  %v573_v6 = vld [vmem:[%s824_s1 + $0x28] sm:$0xff] (!%p173_p10)  }
  0x10   : > { %490 = vmatpush3.bf16.msra.mxu0 (!%p173_p10), %v568_v0  ;;  %v574_v7 = vld [vmem:[%s824_s1 + $0x30] sm:$0xff] (!%p173_p10)   ;;  %v575_v8 = vld [vmem:[%s824_s1 + $0x38] sm:$0xff] (!%p173_p10)   ;;  %v464_v10 = vld [vmem:[%s825_s2] ss:$0 sm:$0xff] (!%p173_p10)  ;;  %s479_s10 = sshll.u32 (!%p173_p10), %s647_s15, 8  ;;  %s659_s21 = smov (!%p173_p10), [#allocation2]  }
  0x11   : > { %491 = vmatprep.subr.bf16.mxu0 (!%p173_p10), %v657_v1  ;;  %s775_s18 = scalar_lea.hbm (!%p173_p10), %s826_s3, %s479_s10  ;;  %s581_s23 = sshll.u32 (!%p173_p10), %s659_s21, 4  ;;  %s582_s23 = int_to_ptr.vmem [resolvable:$false] %s581_s23 }
  0x12   : > { %s583_s26 = scalar_lea.vmem (!%p173_p10), %s582_s23, 512 }
  0x14   : > { %492 = vmatpush3.bf16.msra.mxu0 (!%p173_p10), %v569_v2 }
  0x15   : > { %493 = vmatprep.subr.bf16.mxu0 (!%p173_p10), %v657_v1 }
  0x16   : > { %s837_s30 = smov (!%p204_p11, %s462_s30), 3 }
  0x17   : > { %s463_s6 = sshll.u32 %s837_s30, 2  ;;  %s200_s30 = sand.u32 1, %s639_s13  }
  0x18   : > { %s207_s9 = scalar_lea.vmem %s823_s0, %s463_s6  ;;  %494 = vmatpush3.bf16.msra.mxu0 %v570_v3  ;;  %s461_s4 = sshll.u32 %s200_s30, 4 }
  0x19   : > { %495 = vmatprep.subr.bf16.mxu0 %v657_v1  ;;  %v576_v9 = vld [vmem:[%s207_s9] sm:$0xff]   ;;  %s202_s7 = scalar_lea.vmem [#allocation2], %s461_s4  ;;  %s777_s19 = scalar_lea.sflag [#allocation3], %s200_s30 }
  0x1a   : > { %s355_s8 = sshll.u32 %s202_s7, 4  ;;  %s770_s8 = int_to_ptr.vmem [resolvable:$true] %s355_s8 }
  0x1b   : > { %s577_s15 = scalar_lea.vmem %s770_s8, 256  ;;  %p584_p1 = scmp.lt.s32.totalorder %s770_s8, %s582_s23 }
  0x1c   : > { %496 = vmatpush3.bf16.msra.mxu0 %v571_v4  ;;  %p578_p12 = scmp.ne.s32.totalorder %s770_s8, %s577_s15  ;;  %p585_p2 = scmp.lt.s32.totalorder %s583_s26, %s577_s15 }
  0x1d   : > { %497 = vmatprep.subr.bf16.mxu0 %v657_v1 }
  0x1e   : > { %p579_p13 = pnand %p578_p12, %p722_p4  ;;  %p586_p3 = por %p585_p2, %p584_p1 }
  0x20   : > { %498 = vmatpush3.bf16.msra.mxu0 %v572_v5  ;;  %p580_p0 = pneg %p579_p13 }
  0x21   : > { %499 = vmatprep.subr.bf16.mxu0 %v657_v1 }
  0x22   : > { %p587_p5 = pnand %p586_p3, %p580_p0 }
  0x24   : > { %500 = vmatpush3.bf16.msra.mxu0 %v573_v6 }
  0x25   : > { %501 = vmatprep.subr.bf16.mxu0 %v657_v1 }
  0x28   : > { %502 = vmatpush3.bf16.msra.mxu0 %v574_v7 }
  0x29   : > { %503 = vmatprep.subr.bf16.mxu0 %v657_v1 }
  0x2c   : > { %504 = vmatpush3.bf16.msra.mxu0 %v575_v8 }
  0x2f   : > { %506 = vmatmul.mubr.bf16.vlgmr.msra.gmra.mrb[0].mxu0 %v576_v9 }
 0x102   : > { %v331_v11 = vpop.f32.mrb[0].mxu0 }
 0x103   : > { %v332_v12 = vadd.f32 %v464_v10, %v331_v11  ;;  %v507_v13 = vpop.f32.mrb[1].mxu0 }
 0x104   : > { %v334_v14 = vpop.f32.mrb[2].mxu0 }
 0x105   : > { %338 = vst [vmem:[%s202_s7] sm:$0xff] %v332_v12  ;;  %v335_v15 = vadd.f32 %v464_v10, %v334_v14  ;;  %v508_v16 = vpop.f32.mrb[3].mxu0 }
 0x107   : > { %339 = vst [vmem:[%s202_s7 + $0x8] sm:$0xff] %v335_v15 }
 0x108   : > { %590 = shalt.err (!%p587_p5)
}
 0x109   : > { %s591_s27 = scalar_lea.hbm %s775_s18, 256  ;;  %s595_s30 = scalar_lea.hbm %s826_s3, 512 }
 0x10a   : > { %p592_p6 = scmp.ne.s32.totalorder %s775_s18, %s591_s27  ;;  %p596_p10 = scmp.lt.u32.totalorder %s775_s18, %s826_s3 }
 0x10b   : > { %p597_p11 = scmp.lt.u32.totalorder %s595_s30, %s591_s27  ;;  %p599_p13 = scmp.lt.u32.totalorder %s591_s27, %s775_s18 }
 0x10c   : > { %p593_p7 = pnand %p592_p6, %p722_p4 }
 0x10d   : > { %p598_p12 = por %p597_p11, %p596_p10 }
 0x10e   : > { %p594_p9 = pneg %p593_p7 }
 0x10f   : > { %p600_p0 = por %p599_p13, %p598_p12 }
 0x111   : > { %p601_p1 = pnand %p600_p0, %p594_p9 }
 0x113   : > { %604 = shalt.err (!%p601_p1)
}
 0x114   : > { %s660_s6 = smov 128   ;;  %s661_s7 = smov 8  }
 0x115   : > { %509 = dma.vmem_to_hbm [thread:$0]  (%p722_p4), %s770_s8, 256, %s775_s18, %s777_s19, %s660_s6, %s660_s6, %s661_s7  }
 0x116 PF: > { %p515_p2 = scmp.ge.s32.totalorder %s655_s17, 2  ;;  %s370_s10 = sand.u32 1, %s635_s12  }
 0x117   : > { %s371_s9 = scalar_lea.sflag [#allocation3], %s370_s10 }
 0x118   : > { %p512_p3 = pnand %p515_p2, %p729_p8 }
 0x11a   : > { %630 = dma.done.wait (!%p512_p3), %s371_s9, 256  }
 0x11b   : > { %632 = vsyncadd (!%p512_p3), %s371_s9, 4294967040  ;;  %s16_s17 = sadd.s32 1, %s655_s17   ;;  %s829_s12 = smov %s639_s13 }
 0x11c   : > { %p13_p5 = scmp.ge.s32.totalorder %s16_s17, 4   ;;  %s830_s13 = smov %s643_s14 }
 0x11d   : > { %s831_s14 = smov %s735_s25  ;;  %s832_s15 = smov %s651_s16 }
 0x11e   : > { %s833_s16 = smov %s835_s20  ;;  %15 = sbr.rel (!%p13_p5) target bundleno = 4 (0x4), region = 73 }
 0x125   :  { %376 = vsyncpa [#allocation3], 1 }
 0x126   :  { %378 = vsyncpa [#allocation3 + $0x1], 1 }

// kernel: text_generation_forward.2
= control target key start
LH: loop header
LB: loop body
LE: loop exit
PB: predicated region body
PF: predicated region fallthrough
CT: control target
= control target key end

     0   :  { %12 = vsyncpa [#allocation4], 0  ;;  %s6319_s0 = inlined_call_operand.vmem [shape: bf16[32,512], index: 0, kind: input, shape index: {}]   ;;  %s6320_s1 = inlined_call_operand.vmem [shape: bf16[128,512], index: 1, kind: input, shape index: {}]   ;;  %s6321_s2 = inlined_call_operand.vmem [shape: bf16[256,512], index: 2, kind: input, shape index: {}]   ;;  %s6322_s3 = inlined_call_operand.vmem [shape: f32[1,512], index: 3, kind: input, shape index: {}]   ;;  %s6323_s4 = inlined_call_operand.vmem [shape: bf16[32,128], index: 4, kind: output, shape index: {0}]   ;;  %s6324_s5 = inlined_call_operand.hbm [shape: f32[4,128], index: 5, kind: output, shape index: {1}]   ;;  %s6325_s6 = inlined_call_operand.hbm [shape: f32[4,128], index: 6, kind: output, shape index: {2}]  }
   0x1   :  { %13 = vsyncpa [#allocation6], 0  ;;  %s3880_s21 = smov 0  }
   0x2 LB: > { %s3886_s22 = sadd.s32 4294967295, %s3839_s21   ;;  %p2987_p0 = scmp.ge.s32.totalorder %s3839_s21, 1  ;;  %s3839_s21 = sphi %s3880_s21, %s19_s21  }
   0x3   : > { %p211_p1 = scmp.lt.s32.totalorder %s3839_s21, 3 }
   0x5   : > { %p212_p2 = pnand %p2987_p0, %p211_p1 }
   0x7   : > { %215 = sbr.rel (%p212_p2) target bundleno = 2673 (0xa71), region = 36 }
   0xe   : > { %s2988_s23 = sshll.u32 %s3886_s22, 1  ;;  %p2993_p4 = scmp.ne.s32.totalorder %s3886_s22, 0 }
   0xf   : > { %p243_p3 = scmp.lt.s32.totalorder %s2988_s23, 3  ;;  %v3841_v0 = vmov (!%p2993_p4), 0.0  }
  0x10   : > { %259 = sbr.rel (%p2993_p4) target bundleno = 23 (0x17), region = 40  ;;  %260 = vst [vmem:[#allocation2] sm:$0xff] (!%p2993_p4), %v3841_v0 }
  0x11   : > { %s7049_s23 = smov (!%p243_p3, %s2988_s23), 3 }
  0x12   : > { %s3150_s24 = sshll.u32 %s7049_s23, 4  ;;  %s2992_s25 = sshll.u32 %s7049_s23, 2 }
  0x13   : > { %s3894_s28 = scalar_lea.vmem %s6319_s0, %s3150_s24  ;;  %s3899_s7 = scalar_lea.vmem %s6323_s4, %s2992_s25 }
  0x17 PF: > { %v3905_v1 = vld [vmem:[%s6320_s1 + $0x4] ss:$16 sps:$4 sm:$0xff]   ;;  %v3910_v2 = vld [vmem:[%s6320_s1] ss:$16 sps:$4 sm:$0xff]   ;;  %v6326_v3 = vmov 0   ;;  %vm2864_vm0 = vcmask 1041408  }
  0x18   : > { %6620 = vst [vmem:[#allocation9_spill] sm:$0xff] %v3905_v1  ;;  %579 = vmatprep.mubr.bf16.mxu0 %v6326_v3  ;;  %620 = vmatprep.mubr.bf16.mxu1 %v6326_v3  ;;  %v3918_v4 = vld [vmem:[%s6320_s1 + $0x24] ss:$16 sps:$4 sm:$0xff]   ;;  %v3924_v5 = vld [vmem:[%s6320_s1 + $0x20] ss:$16 sps:$4 sm:$0xff]   ;;  %p3165_p5 = scmp.eq.s32.totalorder %s3886_s22, 1 }
  0x19   : > { %547 = vmatprep.subr.bf16.mxu0 %v3905_v1  ;;  %v3930_v6 = vld [vmem:[%s6320_s1 + $0x44] ss:$16 sps:$4 sm:$0xff]   ;;  %v3935_v7 = vld [vmem:[%s6320_s1 + $0xc] ss:$16 sps:$4 sm:$0xff]   ;;  %v3940_v8 = vld [vmem:[%s6320_s1 + $0x8] ss:$16 sps:$4 sm:$0xff]  }
  0x1a   : > { %548 = vmatpush1.bf16.msra.mxu0 %v3910_v2  ;;  %6621 = vst [vmem:[#allocation10_spill] sm:$0xff] %v3935_v7  ;;  %v3946_v9 = vld [vmem:[%s6320_s1 + $0x40] ss:$16 sps:$4 sm:$0xff]   ;;  %588 = vmatprep.subr.bf16.mxu1 %v3935_v7  ;;  %v3953_v10 = vld [vmem:[%s6320_s1 + $0x64] ss:$16 sps:$4 sm:$0xff]  }
  0x1b   : > { %549 = vmatprep.subr.bf16.mxu0 %v3918_v4  ;;  %589 = vmatpush1.bf16.msra.mxu1 %v3940_v8  ;;  %v3959_v11 = vld [vmem:[%s6320_s1 + $0x2c] ss:$16 sps:$4 sm:$0xff]   ;;  %v3964_v12 = vld [vmem:[%s6320_s1 + $0x28] ss:$16 sps:$4 sm:$0xff]   ;;  %v3971_v13 = vld [vmem:[%s6320_s1 + $0x60] ss:$16 sps:$4 sm:$0xff]  }
  0x1c   : > { %590 = vmatprep.subr.bf16.mxu1 %v3959_v11  ;;  %v3976_v14 = vld [vmem:[%s6320_s1 + $0x84] ss:$16 sps:$4 sm:$0xff]   ;;  %v3981_v15 = vld [vmem:[%s6320_s1 + $0x4c] ss:$16 sps:$4 sm:$0xff]   ;;  %v3988_v16 = vld [vmem:[%s6320_s1 + $0x48] ss:$16 sps:$4 sm:$0xff]  }
  0x1d   : > { %v3994_v17 = vld [vmem:[%s6320_s1 + $0x6c] ss:$16 sps:$4 sm:$0xff]   ;;  %v4000_v18 = vld [vmem:[%s6320_s1 + $0x80] ss:$16 sps:$4 sm:$0xff]   ;;  %v4006_v19 = vld [vmem:[%s6320_s1 + $0xa4] ss:$16 sps:$4 sm:$0xff]  }
  0x1e   : > { %550 = vmatpush1.bf16.msra.mxu0 %v3924_v5  ;;  %v4012_v20 = vld [vmem:[%s6320_s1 + $0x68] ss:$16 sps:$4 sm:$0xff]   ;;  %v4018_v21 = vld [vmem:[%s6320_s1 + $0x8c] ss:$16 sps:$4 sm:$0xff]   ;;  %v4024_v22 = vld [vmem:[%s6320_s1 + $0xa0] ss:$16 sps:$4 sm:$0xff]  }
  0x1f   : > { %551 = vmatprep.subr.bf16.mxu0 %v3930_v6  ;;  %591 = vmatpush1.bf16.msra.mxu1 %v3964_v12  ;;  %v4029_v23 = vld [vmem:[%s6320_s1 + $0xc4] ss:$16 sps:$4 sm:$0xff]   ;;  %v4036_v24 = vld [vmem:[%s6320_s1 + $0x88] ss:$16 sps:$4 sm:$0xff]   ;;  %v4042_v25 = vld [vmem:[%s6320_s1 + $0xac] ss:$16 sps:$4 sm:$0xff]  }
  0x20   : > { %592 = vmatprep.subr.bf16.mxu1 %v3981_v15  ;;  %v4048_v26 = vld [vmem:[%s6320_s1 + $0xc0] ss:$16 sps:$4 sm:$0xff]   ;;  %v4053_v27 = vld [vmem:[%s6320_s1 + $0xe4] ss:$16 sps:$4 sm:$0xff]   ;;  %v4060_v28 = vld [vmem:[%s6320_s1 + $0xa8] ss:$16 sps:$4 sm:$0xff]  }
  0x21   : > { %v4066_v29 = vld [vmem:[%s6320_s1 + $0xcc] ss:$16 sps:$4 sm:$0xff]   ;;  %v4071_v30 = vld [vmem:[%s6320_s1 + $0xe0] ss:$16 sps:$4 sm:$0xff]   ;;  %v4079_v32 = vld [vmem:[%s6320_s1 + $0xc8] ss:$16 sps:$4 sm:$0xff]  }
  0x22   : > { %552 = vmatpush1.bf16.msra.mxu0 %v3946_v9  ;;  %v4073_v31 = vld [vmem:[#allocation2] sm:$0xff]  ;;  %v4092_v34 = vld [vmem:[%s6320_s1 + $0xec] ss:$16 sps:$4 sm:$0xff]   ;;  %v4100_v36 = vld [vmem:[%s6320_s1 + $0xe8] ss:$16 sps:$4 sm:$0xff]  }
  0x23   : > { %553 = vmatprep.subr.bf16.mxu0 %v3953_v10  ;;  %593 = vmatpush1.bf16.msra.mxu1 %v3988_v16  ;;  %v4086_v33 = vld [vmem:[%s6321_s2 + $0x4] ss:$16 sps:$4 sm:$0xff]   ;;  %v386_v35 = vpack.c.bf16 %v4073_v31, %v4073_v31  ;;  %v4105_v37 = vld [vmem:[%s6321_s2] ss:$16 sps:$4 sm:$0xff]   ;;  %v4112_v38 = vld [vmem:[%s6321_s2 + $0xc] ss:$16 sps:$4 sm:$0xff]  }
  0x24   : > { %594 = vmatprep.subr.bf16.mxu1 %v3994_v17  ;;  %v4117_v39 = vld [vmem:[%s6321_s2 + $0x24] ss:$16 sps:$4 sm:$0xff]   ;;  %v4123_v40 = vld [vmem:[%s6321_s2 + $0x20] ss:$16 sps:$4 sm:$0xff]   ;;  %v4128_v41 = vld [vmem:[%s6321_s2 + $0x8] ss:$16 sps:$4 sm:$0xff]  }
  0x25   : > { %v4133_v42 = vld [vmem:[%s6321_s2 + $0x44] ss:$16 sps:$4 sm:$0xff]   ;;  %v4139_v43 = vld [vmem:[%s6321_s2 + $0x2c] ss:$16 sps:$4 sm:$0xff]   ;;  %v4147_v44 = vld [vmem:[%s6321_s2 + $0x40] ss:$16 sps:$4 sm:$0xff]  }
  0x26   : > { %554 = vmatpush1.bf16.msra.mxu0 %v3971_v13  ;;  %v4152_v45 = vld [vmem:[%s6321_s2 + $0x28] ss:$16 sps:$4 sm:$0xff]   ;;  %v4157_v46 = vld [vmem:[%s6321_s2 + $0x64] ss:$16 sps:$4 sm:$0xff]   ;;  %v4163_v47 = vld [vmem:[%s6321_s2 + $0x4c] ss:$16 sps:$4 sm:$0xff]  }
  0x27   : > { %555 = vmatprep.subr.bf16.mxu0 %v3976_v14  ;;  %595 = vmatpush1.bf16.msra.mxu1 %v4012_v20  ;;  %6622 = vst [vmem:[#allocation11_spill] sm:$0xff] %v4157_v46  ;;  %v4171_v48 = vld [vmem:[%s6321_s2 + $0x60] ss:$16 sps:$4 sm:$0xff]   ;;  %v4176_v49 = vld [vmem:[%s6321_s2 + $0x48] ss:$16 sps:$4 sm:$0xff]  }
  0x28   : > { %596 = vmatprep.subr.bf16.mxu1 %v4018_v21  ;;  %6623 = vst [vmem:[#allocation12_spill] sm:$0xff] %v4171_v48  ;;  %v4182_v50 = vld [vmem:[%s6321_s2 + $0x6c] ss:$16 sps:$4 sm:$0xff]   ;;  %v4192_v51 = vld [vmem:[%s6321_s2 + $0x68] ss:$16 sps:$4 sm:$0xff]  }
  0x29   : > { %6624 = vst [vmem:[#allocation13_spill] sm:$0xff] %v4182_v50  ;;  %6625 = vst [vmem:[#allocation14_spill] sm:$0xff] %v4192_v51  ;;  %v4199_v52 = vld [vmem:[%s6321_s2 + $0x84] ss:$16 sps:$4 sm:$0xff]   ;;  %v4204_v53 = vld [vmem:[%s6321_s2 + $0x8c] ss:$16 sps:$4 sm:$0xff]  }
  0x2a   : > { %556 = vmatpush1.bf16.msra.mxu0 %v4000_v18  ;;  %6626 = vst [vmem:[#allocation15_spill] sm:$0xff] %v4199_v52  ;;  %6627 = vst [vmem:[#allocation16_spill] sm:$0xff] %v4204_v53  ;;  %v4209_v54 = vld [vmem:[%s6321_s2 + $0x80] ss:$16 sps:$4 sm:$0xff]   ;;  %v4214_v55 = vld [vmem:[%s6321_s2 + $0x88] ss:$16 sps:$4 sm:$0xff]  }
  0x2b   : > { %557 = vmatprep.subr.bf16.mxu0 %v4006_v19  ;;  %597 = vmatpush1.bf16.msra.mxu1 %v4036_v24  ;;  %6628 = vst [vmem:[#allocation17_spill] sm:$0xff] %v4209_v54  ;;  %6629 = vst [vmem:[#allocation18_spill] sm:$0xff] %v4214_v55  ;;  %v4223_v56 = vld [vmem:[%s6321_s2 + $0xa4] ss:$16 sps:$4 sm:$0xff]   ;;  %v4228_v57 = vld [vmem:[%s6321_s2 + $0xac] ss:$16 sps:$4 sm:$0xff]  }
  0x2c   : > { %598 = vmatprep.subr.bf16.mxu1 %v4042_v25  ;;  %6630 = vst [vmem:[#allocation19_spill] sm:$0xff] %v4223_v56  ;;  %6631 = vst [vmem:[#allocation20_spill] sm:$0xff] %v4228_v57  ;;  %v4233_v58 = vld [vmem:[%s6321_s2 + $0xa0] ss:$16 sps:$4 sm:$0xff]   ;;  %v4238_v59 = vld [vmem:[%s6321_s2 + $0xa8] ss:$16 sps:$4 sm:$0xff]  }
  0x2d   : > { %6632 = vst [vmem:[#allocation21_spill] sm:$0xff] %v4233_v58  ;;  %6633 = vst [vmem:[#allocation22_spill] sm:$0xff] %v4238_v59  ;;  %v4247_v60 = vld [vmem:[%s6321_s2 + $0xc4] ss:$16 sps:$4 sm:$0xff]   ;;  %v4252_v61 = vld [vmem:[%s6321_s2 + $0xcc] ss:$16 sps:$4 sm:$0xff]  }
  0x2e   : > { %558 = vmatpush1.bf16.msra.mxu0 %v4024_v22  ;;  %6634 = vst [vmem:[#allocation23_spill] sm:$0xff] %v4247_v60  ;;  %6635 = vst [vmem:[#allocation24_spill] sm:$0xff] %v4252_v61  ;;  %v4257_v62 = vld [vmem:[%s6321_s2 + $0xc0] ss:$16 sps:$4 sm:$0xff]   ;;  %v4262_v63 = vld [vmem:[%s6321_s2 + $0xc8] ss:$16 sps:$4 sm:$0xff]  }
  0x2f   : > { %559 = vmatprep.subr.bf16.mxu0 %v4029_v23  ;;  %599 = vmatpush1.bf16.msra.mxu1 %v4060_v28  ;;  %6636 = vst [vmem:[#allocation25_spill] sm:$0xff] %v4257_v62  ;;  %6637 = vst [vmem:[#allocation26_spill] sm:$0xff] %v4262_v63  ;;  %v4271_v0 = vld [vmem:[%s6321_s2 + $0xe4] ss:$16 sps:$4 sm:$0xff]   ;;  %v4281_v3 = vld [vmem:[%s6321_s2 + $0xe0] ss:$16 sps:$4 sm:$0xff]  }
  0x30   : > { %600 = vmatprep.subr.bf16.mxu1 %v4066_v29  ;;  %6638 = vst [vmem:[#allocation27_spill] sm:$0xff] %v4271_v0  ;;  %6640 = vst [vmem:[#allocation29_spill] sm:$0xff] %v4281_v3 }
  0x32   : > { %560 = vmatpush1.bf16.msra.mxu0 %v4048_v26 }
  0x33   : > { %561 = vmatprep.subr.bf16.mxu0 %v4053_v27  ;;  %601 = vmatpush1.bf16.msra.mxu1 %v4079_v32 }
  0x34   : > { %602 = vmatprep.subr.bf16.mxu1 %v4092_v34 }
  0x36   : > { %562 = vmatpush1.bf16.msra.mxu0 %v4071_v30 }
  0x37   : > { %984 = vmatprep.subr.bf16.mxu0 %v4086_v33  ;;  %603 = vmatpush1.bf16.msra.mxu1 %v4100_v36 }
  0x38   : > { %1025 = vmatprep.subr.bf16.mxu1 %v4112_v38 }
  0x39   : > { %580 = vmatmul.mubr.bf16.vlgmr.msra.gmra.mrb[0].mxu0 %v386_v35 }
  0x3a   : > { %985 = vmatpush1.bf16.msra.mxu0 %v4105_v37  ;;  %621 = vmatmul.mubr.bf16.vlgmr.msra.gmra.mrb[0].mxu1 %v386_v35  ;;  %v4276_v35 = vld [vmem:[%s6321_s2 + $0xec] ss:$16 sps:$4 sm:$0xff]  }
  0x3b   : > { %986 = vmatprep.subr.bf16.mxu0 %v4117_v39  ;;  %1026 = vmatpush1.bf16.msra.mxu1 %v4128_v41  ;;  %6639 = vst [vmem:[#allocation28_spill] sm:$0xff] %v4276_v35 }
  0x3c   : > { %1027 = vmatprep.subr.bf16.mxu1 %v4139_v43 }
  0x3e   : > { %987 = vmatpush1.bf16.msra.mxu0 %v4123_v40 }
  0x3f   : > { %988 = vmatprep.subr.bf16.mxu0 %v4133_v42  ;;  %1028 = vmatpush1.bf16.msra.mxu1 %v4152_v45 }
  0x40   : > { %1029 = vmatprep.subr.bf16.mxu1 %v4163_v47 }
  0x42   : > { %989 = vmatpush1.bf16.msra.mxu0 %v4147_v44 }
  0x43   : > { %990 = vmatprep.subr.bf16.mxu0 %v4157_v46  ;;  %1030 = vmatpush1.bf16.msra.mxu1 %v4176_v49 }
  0x44   : > { %1031 = vmatprep.subr.bf16.mxu1 %v4182_v50 }
  0x46   : > { %991 = vmatpush1.bf16.msra.mxu0 %v4171_v48 }
  0x47   : > { %1032 = vmatpush1.bf16.msra.mxu1 %v4192_v51  ;;  %992 = vmatprep.subr.bf16.mxu0 %v4199_v52 }
  0x48   : > { %1033 = vmatprep.subr.bf16.mxu1 %v4204_v53 }
  0x4a   : > { %993 = vmatpush1.bf16.msra.mxu0 %v4209_v54 }
  0x4b   : > { %1034 = vmatpush1.bf16.msra.mxu1 %v4214_v55  ;;  %994 = vmatprep.subr.bf16.mxu0 %v4223_v56 }
  0x4c   : > { %1035 = vmatprep.subr.bf16.mxu1 %v4228_v57  ;;  %v381_v57 = vld [vmem:[%s3894_s28 + $0x8] sm:$0x11] }
  0x4e   : > { %995 = vmatpush1.bf16.msra.mxu0 %v4233_v58 }
  0x4f   : > { %1036 = vmatpush1.bf16.msra.mxu1 %v4238_v59  ;;  %996 = vmatprep.subr.bf16.mxu0 %v4247_v60  ;;  %v4449_v60 = vld [vmem:[%s6321_s2 + $0x1c0] ss:$16 sps:$4 sm:$0xff]   ;;  %v4454_v59 = vld [vmem:[%s6321_s2 + $0x1c8] ss:$16 sps:$4 sm:$0xff]  }
  0x50   : > { %1037 = vmatprep.subr.bf16.mxu1 %v4252_v61  ;;  %v4300_v61 = vld [vmem:[%s6321_s2 + $0x10c] ss:$16 sps:$4 sm:$0xff]   ;;  %6668 = vst [vmem:[#allocation57_spill] sm:$0xff] %v4449_v60  ;;  %6669 = vst [vmem:[#allocation58_spill] sm:$0xff] %v4454_v59 }
  0x51   : > { %6643 = vst [vmem:[#allocation32_spill] sm:$0xff] %v4300_v61 }
  0x52   : > { %997 = vmatpush1.bf16.msra.mxu0 %v4257_v62  ;;  %v4286_v62 = vld [vmem:[%s6321_s2 + $0xe8] ss:$16 sps:$4 sm:$0xff]  }
  0x53   : > { %1038 = vmatpush1.bf16.msra.mxu1 %v4262_v63  ;;  %6641 = vst [vmem:[#allocation30_spill] sm:$0xff] %v4286_v62  ;;  %998 = vmatprep.subr.bf16.mxu0 %v4271_v0  ;;  %v4295_v63 = vld [vmem:[%s6321_s2 + $0x104] ss:$16 sps:$4 sm:$0xff]   ;;  %v4305_v0 = vld [vmem:[%s6321_s2 + $0x100] ss:$16 sps:$4 sm:$0xff]  }
  0x54   : > { %1039 = vmatprep.subr.bf16.mxu1 %v4276_v35  ;;  %6642 = vst [vmem:[#allocation31_spill] sm:$0xff] %v4295_v63  ;;  %6644 = vst [vmem:[#allocation33_spill] sm:$0xff] %v4305_v0  ;;  %v4324_v35 = vld [vmem:[%s6321_s2 + $0x12c] ss:$16 sps:$4 sm:$0xff]  }
  0x55   : > { %6647 = vst [vmem:[#allocation36_spill] sm:$0xff] %v4324_v35 }
  0x56   : > { %999 = vmatpush1.bf16.msra.mxu0 %v4281_v3  ;;  %v4310_v3 = vld [vmem:[%s6321_s2 + $0x108] ss:$16 sps:$4 sm:$0xff]  }
  0x57   : > { %1040 = vmatpush1.bf16.msra.mxu1 %v4286_v62  ;;  %6645 = vst [vmem:[#allocation34_spill] sm:$0xff] %v4310_v3  ;;  %1000 = vmatprep.subr.bf16.mxu0 %v4295_v63  ;;  %v4319_v62 = vld [vmem:[%s6321_s2 + $0x124] ss:$16 sps:$4 sm:$0xff]   ;;  %v4329_v63 = vld [vmem:[%s6321_s2 + $0x120] ss:$16 sps:$4 sm:$0xff]  }
  0x58   : > { %1041 = vmatprep.subr.bf16.mxu1 %v4300_v61  ;;  %6646 = vst [vmem:[#allocation35_spill] sm:$0xff] %v4319_v62  ;;  %6648 = vst [vmem:[#allocation37_spill] sm:$0xff] %v4329_v63  ;;  %v4348_v61 = vld [vmem:[%s6321_s2 + $0x14c] ss:$16 sps:$4 sm:$0xff]  }
  0x59   : > { %6651 = vst [vmem:[#allocation40_spill] sm:$0xff] %v4348_v61 }
  0x5a   : > { %1001 = vmatpush1.bf16.msra.mxu0 %v4305_v0  ;;  %v4334_v0 = vld [vmem:[%s6321_s2 + $0x128] ss:$16 sps:$4 sm:$0xff]  }
  0x5b   : > { %1042 = vmatpush1.bf16.msra.mxu1 %v4310_v3  ;;  %6649 = vst [vmem:[#allocation38_spill] sm:$0xff] %v4334_v0  ;;  %1002 = vmatprep.subr.bf16.mxu0 %v4319_v62  ;;  %v4343_v3 = vld [vmem:[%s6321_s2 + $0x144] ss:$16 sps:$4 sm:$0xff]   ;;  %v4353_v62 = vld [vmem:[%s6321_s2 + $0x140] ss:$16 sps:$4 sm:$0xff]  }
  0x5c   : > { %1043 = vmatprep.subr.bf16.mxu1 %v4324_v35  ;;  %6650 = vst [vmem:[#allocation39_spill] sm:$0xff] %v4343_v3  ;;  %6652 = vst [vmem:[#allocation41_spill] sm:$0xff] %v4353_v62  ;;  %v4372_v35 = vld [vmem:[%s6321_s2 + $0x16c] ss:$16 sps:$4 sm:$0xff]  }
  0x5d   : > { %6655 = vst [vmem:[#allocation44_spill] sm:$0xff] %v4372_v35 }
  0x5e   : > { %1003 = vmatpush1.bf16.msra.mxu0 %v4329_v63  ;;  %v4358_v63 = vld [vmem:[%s6321_s2 + $0x148] ss:$16 sps:$4 sm:$0xff]  }
  0x5f   : > { %1044 = vmatpush1.bf16.msra.mxu1 %v4334_v0  ;;  %6653 = vst [vmem:[#allocation42_spill] sm:$0xff] %v4358_v63  ;;  %1004 = vmatprep.subr.bf16.mxu0 %v4343_v3  ;;  %v4367_v0 = vld [vmem:[%s6321_s2 + $0x164] ss:$16 sps:$4 sm:$0xff]   ;;  %v4377_v3 = vld [vmem:[%s6321_s2 + $0x160] ss:$16 sps:$4 sm:$0xff]  }
  0x60   : > { %1045 = vmatprep.subr.bf16.mxu1 %v4348_v61  ;;  %6654 = vst [vmem:[#allocation43_spill] sm:$0xff] %v4367_v0  ;;  %6656 = vst [vmem:[#allocation45_spill] sm:$0xff] %v4377_v3  ;;  %v4396_v61 = vld [vmem:[%s6321_s2 + $0x18c] ss:$16 sps:$4 sm:$0xff]  }
  0x61   : > { %6659 = vst [vmem:[#allocation48_spill] sm:$0xff] %v4396_v61 }
  0x62   : > { %1005 = vmatpush1.bf16.msra.mxu0 %v4353_v62  ;;  %v4382_v62 = vld [vmem:[%s6321_s2 + $0x168] ss:$16 sps:$4 sm:$0xff]  }
  0x63   : > { %1046 = vmatpush1.bf16.msra.mxu1 %v4358_v63  ;;  %6657 = vst [vmem:[#allocation46_spill] sm:$0xff] %v4382_v62  ;;  %1006 = vmatprep.subr.bf16.mxu0 %v4367_v0  ;;  %v4391_v63 = vld [vmem:[%s6321_s2 + $0x184] ss:$16 sps:$4 sm:$0xff]   ;;  %v4401_v0 = vld [vmem:[%s6321_s2 + $0x180] ss:$16 sps:$4 sm:$0xff]  }
  0x64   : > { %1047 = vmatprep.subr.bf16.mxu1 %v4372_v35  ;;  %6658 = vst [vmem:[#allocation47_spill] sm:$0xff] %v4391_v63  ;;  %6660 = vst [vmem:[#allocation49_spill] sm:$0xff] %v4401_v0  ;;  %v4420_v35 = vld [vmem:[%s6321_s2 + $0x1ac] ss:$16 sps:$4 sm:$0xff]  }
  0x65   : > { %6663 = vst [vmem:[#allocation52_spill] sm:$0xff] %v4420_v35 }
  0x66   : > { %1007 = vmatpush1.bf16.msra.mxu0 %v4377_v3  ;;  %v4406_v3 = vld [vmem:[%s6321_s2 + $0x188] ss:$16 sps:$4 sm:$0xff]  }
  0x67   : > { %1048 = vmatpush1.bf16.msra.mxu1 %v4382_v62  ;;  %6661 = vst [vmem:[#allocation50_spill] sm:$0xff] %v4406_v3  ;;  %1008 = vmatprep.subr.bf16.mxu0 %v4391_v63  ;;  %v4415_v62 = vld [vmem:[%s6321_s2 + $0x1a4] ss:$16 sps:$4 sm:$0xff]   ;;  %v4425_v63 = vld [vmem:[%s6321_s2 + $0x1a0] ss:$16 sps:$4 sm:$0xff]  }
  0x68   : > { %1049 = vmatprep.subr.bf16.mxu1 %v4396_v61  ;;  %6662 = vst [vmem:[#allocation51_spill] sm:$0xff] %v4415_v62  ;;  %6664 = vst [vmem:[#allocation53_spill] sm:$0xff] %v4425_v63  ;;  %v4440_v61 = vld [vmem:[%s6321_s2 + $0x1cc] ss:$16 sps:$4 sm:$0xff]  }
  0x69   : > { %6667 = vst [vmem:[#allocation56_spill] sm:$0xff] %v4440_v61 }
  0x6a   : > { %1009 = vmatpush1.bf16.msra.mxu0 %v4401_v0  ;;  %v4430_v0 = vld [vmem:[%s6321_s2 + $0x1a8] ss:$16 sps:$4 sm:$0xff]  }
  0x6b   : > { %1050 = vmatpush1.bf16.msra.mxu1 %v4406_v3  ;;  %6665 = vst [vmem:[#allocation54_spill] sm:$0xff] %v4430_v0  ;;  %v4435_v3 = vld [vmem:[%s6321_s2 + $0x1c4] ss:$16 sps:$4 sm:$0xff]   ;;  %1010 = vmatprep.subr.bf16.mxu0 %v4415_v62 }
  0x6c   : > { %6666 = vst [vmem:[#allocation55_spill] sm:$0xff] %v4435_v3  ;;  %1051 = vmatprep.subr.bf16.mxu1 %v4420_v35  ;;  %v660_v35 = vrot.slane %v4073_v31, 4 }
  0x6e   : > { %1011 = vmatpush1.bf16.msra.mxu0 %v4425_v63  ;;  %v4461_v63 = vld [vmem:[%s6321_s2 + $0x1e4] ss:$16 sps:$4 sm:$0xff]   ;;  %v663_v62 = vpack.c.bf16 %v660_v35, %v660_v35 }
  0x6f   : > { %1052 = vmatpush1.bf16.msra.mxu1 %v4430_v0  ;;  %1012 = vmatprep.subr.bf16.mxu0 %v4435_v3  ;;  %6670 = vst [vmem:[#allocation59_spill] sm:$0xff] %v4461_v63  ;;  %v4466_v0 = vld [vmem:[%s6321_s2 + $0x1ec] ss:$16 sps:$4 sm:$0xff]   ;;  %v4479_v3 = vld [vmem:[%s6321_s2 + $0x1e8] ss:$16 sps:$4 sm:$0xff]  }
  0x70   : > { %1053 = vmatprep.subr.bf16.mxu1 %v4440_v61  ;;  %6671 = vst [vmem:[#allocation60_spill] sm:$0xff] %v4466_v0  ;;  %v4474_v61 = vld [vmem:[%s6321_s2 + $0x1e0] ss:$16 sps:$4 sm:$0xff]   ;;  %6673 = vst [vmem:[#allocation62_spill] sm:$0xff] %v4479_v3  ;;  %1016 = vmatprep.mubr.bf16.mxu0 %v663_v62 }
  0x71   : > { %6672 = vst [vmem:[#allocation61_spill] sm:$0xff] %v4474_v61  ;;  %1057 = vmatprep.mubr.bf16.mxu1 %v663_v62  ;;  %v380_v35 = vld [vmem:[%s3894_s28] sm:$0x11]  ;;  %v385_v62 = vunpack.c.h.bf16 %v381_v57 }
  0x72   : > { %1013 = vmatpush1.bf16.msra.mxu0 %v4449_v60  ;;  %v383_v60 = vunpack.c.h.bf16 %v380_v35 }
  0x73   : > { %1054 = vmatpush1.bf16.msra.mxu1 %v4454_v59  ;;  %1014 = vmatprep.subr.bf16.mxu0 %v4461_v63  ;;  %v382_v59 = vunpack.c.l.bf16 %v380_v35 }
  0x74   : > { %1055 = vmatprep.subr.bf16.mxu1 %v4466_v0 }
  0x76   : > { %1015 = vmatpush1.bf16.msra.mxu0 %v4474_v61 }
  0x77   : > { %1056 = vmatpush1.bf16.msra.mxu1 %v4479_v3  ;;  %1100 = vmatprep.subr.bf16.mxu0 %v3905_v1 }
  0x78   : > { %1141 = vmatprep.subr.bf16.mxu1 %v3935_v7  ;;  %v384_v7 = vunpack.c.l.bf16 %v381_v57 }
 0x10c   : > { %v581_v58 = vpop.f32.mrb[0].mxu0 }
 0x10d   : > { %v629_v56 = vadd.f32 %v581_v58, %v382_v59  ;;  %v583_v55 = vpop.f32.mrb[1].mxu0  ;;  %v622_v61 = vpop.f32.mrb[0].mxu1 }
 0x10e   : > { %v630_v63 = vadd.f32 %v583_v55, %v383_v60  ;;  %v585_v54 = vpop.f32.mrb[2].mxu0  ;;  %v624_v3 = vpop.f32.mrb[1].mxu1  ;;  %v631_v35 = vadd.f32 %v622_v61, %v384_v7  ;;  %v6674_v61 = vmov 0  }
 0x10f   : > { %v3026_v0 = vmul.f32 -1.442695, %v629_v56  ;;  %v586_v53 = vpop.f32.mrb[3].mxu0  ;;  %v632_v1 = vadd.f32 %v624_v3, %v385_v62  ;;  %v626_v51 = vpop.f32.mrb[2].mxu1  ;;  %v653_v56 = vrot.slane %v4073_v31, 2  ;;  %v6697_v62 = vld [vmem:[#allocation33_spill] sm:$0xff] }
 0x110   : > { %v3027_v52 = vmul.f32 -1.442695, %v630_v63  ;;  %v627_v48 = vpop.f32.mrb[3].mxu1  ;;  %v6695_v63 = vld [vmem:[#allocation31_spill] sm:$0xff] }
 0x111   : > { %3325 = vpow2.f32 %v3026_v0  ;;  %v3028_v50 = vmul.f32 -1.442695, %v632_v1  ;;  %v6696_v0 = vld [vmem:[#allocation32_spill] sm:$0xff] }
 0x112   : > { %3327 = vpow2.f32 %v3027_v52 }
 0x113   : > { %3329 = vpow2.f32 %v3028_v50 }
 0x114   : > { %3331 = vtanh.f32 %v631_v35  ;;  %v6698_v35 = vld [vmem:[#allocation34_spill] sm:$0xff] }
 0x11b   : > { %v3326_v46 = vpop.eup %3325 }
 0x11c   : > { %v3328_v58 = vpop.eup %3327  ;;  %v636_v59 = vadd.f32 1.0, %v3326_v46 }
 0x11d   : > { %v642_v54 = vadd.f32 1.0, %v3328_v58  ;;  %v3330_v53 = vpop.eup %3329  ;;  %v6699_v58 = vld [vmem:[#allocation35_spill] sm:$0xff] }
 0x11e   : > { %3333 = vrcp.f32 %v636_v59  ;;  %v3332_v55 = vpop.eup %3331  ;;  %v649_v60 = vadd.f32 1.0, %v3330_v53  ;;  %v6700_v59 = vld [vmem:[#allocation36_spill] sm:$0xff]  ;;  %v6702_v53 = vld [vmem:[#allocation38_spill] sm:$0xff] }
 0x11f   : > { %3335 = vrcp.f32 %v642_v54  ;;  %v6701_v54 = vld [vmem:[#allocation37_spill] sm:$0xff] }
 0x120   : > { %3337 = vrcp.f32 %v649_v60  ;;  %v6706_v60 = vld [vmem:[#allocation42_spill] sm:$0xff] }
 0x128   : > { %v3334_v52 = vpop.eup %3333 }
 0x129   : > { %v3336_v3 = vpop.eup %3335  ;;  %v656_v51 = vmul.f32 %v3334_v52, %v3332_v55  ;;  %v6703_v55 = vld [vmem:[#allocation39_spill] sm:$0xff]  ;;  %v6705_v52 = vld [vmem:[#allocation41_spill] sm:$0xff] }
 0x12a   : > { %v655_v57 = vmul.f32 %v3336_v3, %v653_v56  ;;  %v3338_v1 = vpop.eup %3337  ;;  %v6704_v56 = vld [vmem:[#allocation40_spill] sm:$0xff]  ;;  %v6707_v3 = vld [vmem:[#allocation43_spill] sm:$0xff] }
 0x12c   : > { %v4490_v48 = vadd.f32 %v656_v51, %v655_v57  ;;  %v6708_v51 = vld [vmem:[#allocation44_spill] sm:$0xff]  ;;  %v6709_v57 = vld [vmem:[#allocation45_spill] sm:$0xff] }
 0x12e   : > { %3339 = vtanh.f32 %v4490_v48 }
 0x138   : > { %v3340_v7 = vpop.eup %3339 }
 0x139   : > { %v659_v46 = vmul.f32 %v3340_v7, %v3338_v1  ;;  %v6710_v1 = vld [vmem:[#allocation46_spill] sm:$0xff]  ;;  %v6711_v7 = vld [vmem:[#allocation47_spill] sm:$0xff] }
 0x13b   : > { %v662_v50 = vpack.c.bf16 %v659_v46, %v659_v46  ;;  %v6712_v46 = vld [vmem:[#allocation48_spill] sm:$0xff] }
 0x13d   : > { %1017 = vmatmul.mubr.bf16.vlgmr.msra.gmra.mrb[4].mxu0 %v662_v50  ;;  %1058 = vmatmul.mubr.bf16.vlgmr.msra.gmra.mrb[4].mxu1 %v662_v50 }
 0x13e   : > { %1101 = vmatpush1.bf16.msra.mxu0 %v3910_v2  ;;  %1142 = vmatpush1.bf16.msra.mxu1 %v3940_v8  ;;  %v6675_v2 = vld [vmem:[#allocation11_spill] sm:$0xff] }
 0x13f   : > { %1102 = vmatprep.subr.bf16.mxu0 %v3918_v4  ;;  %1143 = vmatprep.subr.bf16.mxu1 %v3959_v11  ;;  %v6676_v4 = vld [vmem:[#allocation13_spill] sm:$0xff]  ;;  %v6679_v8 = vld [vmem:[#allocation15_spill] sm:$0xff]  ;;  %v6682_v11 = vld [vmem:[#allocation18_spill] sm:$0xff] }
 0x140   : > { %1132 = vmatprep.mubr.bf16.mxu0 %v6674_v61  ;;  %1173 = vmatprep.mubr.bf16.mxu1 %v6674_v61 }
 0x142   : > { %1103 = vmatpush1.bf16.msra.mxu0 %v3924_v5  ;;  %1144 = vmatpush1.bf16.msra.mxu1 %v3964_v12  ;;  %v6677_v5 = vld [vmem:[#allocation12_spill] sm:$0xff]  ;;  %v6683_v12 = vld [vmem:[#allocation19_spill] sm:$0xff] }
 0x143   : > { %1104 = vmatprep.subr.bf16.mxu0 %v3930_v6  ;;  %1145 = vmatprep.subr.bf16.mxu1 %v3981_v15  ;;  %v6678_v6 = vld [vmem:[#allocation14_spill] sm:$0xff] }
 0x144   : > { %v6686_v15 = vld [vmem:[#allocation22_spill] sm:$0xff] }
 0x146   : > { %1105 = vmatpush1.bf16.msra.mxu0 %v3946_v9  ;;  %1146 = vmatpush1.bf16.msra.mxu1 %v3988_v16  ;;  %v6680_v9 = vld [vmem:[#allocation16_spill] sm:$0xff]  ;;  %v6687_v16 = vld [vmem:[#allocation23_spill] sm:$0xff] }
 0x147   : > { %1106 = vmatprep.subr.bf16.mxu0 %v3953_v10  ;;  %1147 = vmatprep.subr.bf16.mxu1 %v3994_v17  ;;  %v6681_v10 = vld [vmem:[#allocation17_spill] sm:$0xff]  ;;  %v6688_v17 = vld [vmem:[#allocation24_spill] sm:$0xff] }
 0x14a   : > { %1107 = vmatpush1.bf16.msra.mxu0 %v3971_v13  ;;  %1148 = vmatpush1.bf16.msra.mxu1 %v4012_v20  ;;  %v6684_v13 = vld [vmem:[#allocation20_spill] sm:$0xff]  ;;  %v6691_v20 = vld [vmem:[#allocation27_spill] sm:$0xff] }
 0x14b   : > { %1108 = vmatprep.subr.bf16.mxu0 %v3976_v14  ;;  %1149 = vmatprep.subr.bf16.mxu1 %v4018_v21  ;;  %v6685_v14 = vld [vmem:[#allocation21_spill] sm:$0xff]  ;;  %v6692_v21 = vld [vmem:[#allocation28_spill] sm:$0xff] }
 0x14e   : > { %1109 = vmatpush1.bf16.msra.mxu0 %v4000_v18  ;;  %1150 = vmatpush1.bf16.msra.mxu1 %v4036_v24  ;;  %v6689_v18 = vld [vmem:[#allocation25_spill] sm:$0xff] }
 0x14f   : > { %1110 = vmatprep.subr.bf16.mxu0 %v4006_v19  ;;  %1151 = vmatprep.subr.bf16.mxu1 %v4042_v25  ;;  %v6690_v19 = vld [vmem:[#allocation26_spill] sm:$0xff] }
 0x152   : > { %1111 = vmatpush1.bf16.msra.mxu0 %v4024_v22  ;;  %1152 = vmatpush1.bf16.msra.mxu1 %v4060_v28  ;;  %v6693_v22 = vld [vmem:[#allocation29_spill] sm:$0xff] }
 0x153   : > { %1112 = vmatprep.subr.bf16.mxu0 %v4029_v23  ;;  %1153 = vmatprep.subr.bf16.mxu1 %v4066_v29  ;;  %v6694_v23 = vld [vmem:[#allocation30_spill] sm:$0xff] }
 0x156   : > { %1113 = vmatpush1.bf16.msra.mxu0 %v4048_v26  ;;  %1154 = vmatpush1.bf16.msra.mxu1 %v4079_v32 }
 0x157   : > { %1114 = vmatprep.subr.bf16.mxu0 %v4053_v27  ;;  %1155 = vmatprep.subr.bf16.mxu1 %v4092_v34 }
 0x15a   : > { %1115 = vmatpush1.bf16.msra.mxu0 %v4071_v30  ;;  %1156 = vmatpush1.bf16.msra.mxu1 %v4100_v36 }
 0x15b   : > { %1236 = vmatprep.subr.bf16.mxu0 %v4086_v33  ;;  %1277 = vmatprep.subr.bf16.mxu1 %v4112_v38 }
 0x15d   : > { %1133 = vmatmul.mubr.bf16.vlgmr.msra.gmra.mrb[8].mxu0 %v662_v50  ;;  %1174 = vmatmul.mubr.bf16.vlgmr.msra.gmra.mrb[8].mxu1 %v662_v50  ;;  %v6713_v50 = vld [vmem:[#allocation49_spill] sm:$0xff] }
 0x15e   : > { %1237 = vmatpush1.bf16.msra.mxu0 %v4105_v37  ;;  %1278 = vmatpush1.bf16.msra.mxu1 %v4128_v41 }
 0x15f   : > { %1238 = vmatprep.subr.bf16.mxu0 %v4117_v39  ;;  %1279 = vmatprep.subr.bf16.mxu1 %v4139_v43 }
 0x162   : > { %1239 = vmatpush1.bf16.msra.mxu0 %v4123_v40  ;;  %1280 = vmatpush1.bf16.msra.mxu1 %v4152_v45 }
 0x163   : > { %1240 = vmatprep.subr.bf16.mxu0 %v4133_v42  ;;  %1281 = vmatprep.subr.bf16.mxu1 %v4163_v47 }
 0x166   : > { %1241 = vmatpush1.bf16.msra.mxu0 %v4147_v44  ;;  %1282 = vmatpush1.bf16.msra.mxu1 %v4176_v49 }
 0x167   : > { %1242 = vmatprep.subr.bf16.mxu0 %v6675_v2  ;;  %1283 = vmatprep.subr.bf16.mxu1 %v6676_v4 }
 0x16a   : > { %1243 = vmatpush1.bf16.msra.mxu0 %v6677_v5  ;;  %1284 = vmatpush1.bf16.msra.mxu1 %v6678_v6 }
 0x16b   : > { %1244 = vmatprep.subr.bf16.mxu0 %v6679_v8  ;;  %1285 = vmatprep.subr.bf16.mxu1 %v6680_v9 }
 0x16e   : > { %1245 = vmatpush1.bf16.msra.mxu0 %v6681_v10  ;;  %1286 = vmatpush1.bf16.msra.mxu1 %v6682_v11 }
 0x16f   : > { %1246 = vmatprep.subr.bf16.mxu0 %v6683_v12  ;;  %1287 = vmatprep.subr.bf16.mxu1 %v6684_v13 }
 0x172   : > { %1247 = vmatpush1.bf16.msra.mxu0 %v6685_v14  ;;  %1288 = vmatpush1.bf16.msra.mxu1 %v6686_v15 }
 0x173   : > { %1248 = vmatprep.subr.bf16.mxu0 %v6687_v16  ;;  %1289 = vmatprep.subr.bf16.mxu1 %v6688_v17 }
 0x176   : > { %1249 = vmatpush1.bf16.msra.mxu0 %v6689_v18  ;;  %1290 = vmatpush1.bf16.msra.mxu1 %v6690_v19 }
 0x177   : > { %1250 = vmatprep.subr.bf16.mxu0 %v6691_v20  ;;  %1291 = vmatprep.subr.bf16.mxu1 %v6692_v21 }
 0x17a   : > { %1251 = vmatpush1.bf16.msra.mxu0 %v6693_v22  ;;  %1292 = vmatpush1.bf16.msra.mxu1 %v6694_v23 }
 0x17b   : > { %1252 = vmatprep.subr.bf16.mxu0 %v6695_v63  ;;  %1293 = vmatprep.subr.bf16.mxu1 %v6696_v0 }
 0x17e   : > { %1253 = vmatpush1.bf16.msra.mxu0 %v6697_v62  ;;  %1294 = vmatpush1.bf16.msra.mxu1 %v6698_v35 }
 0x17f   : > { %1254 = vmatprep.subr.bf16.mxu0 %v6699_v58  ;;  %1295 = vmatprep.subr.bf16.mxu1 %v6700_v59 }
 0x182   : > { %1255 = vmatpush1.bf16.msra.mxu0 %v6701_v54  ;;  %1296 = vmatpush1.bf16.msra.mxu1 %v6702_v53 }
 0x183   : > { %1256 = vmatprep.subr.bf16.mxu0 %v6703_v55  ;;  %1297 = vmatprep.subr.bf16.mxu1 %v6704_v56  ;;  %v6714_v55 = vld [vmem:[#allocation50_spill] sm:$0xff]  ;;  %v6715_v56 = vld [vmem:[#allocation51_spill] sm:$0xff] }
 0x186   : > { %1257 = vmatpush1.bf16.msra.mxu0 %v6705_v52  ;;  %1298 = vmatpush1.bf16.msra.mxu1 %v6706_v60  ;;  %v6716_v52 = vld [vmem:[#allocation52_spill] sm:$0xff]  ;;  %v6717_v60 = vld [vmem:[#allocation53_spill] sm:$0xff] }
 0x187   : > { %1258 = vmatprep.subr.bf16.mxu0 %v6707_v3  ;;  %1299 = vmatprep.subr.bf16.mxu1 %v6708_v51  ;;  %v6718_v3 = vld [vmem:[#allocation54_spill] sm:$0xff]  ;;  %v6719_v51 = vld [vmem:[#allocation55_spill] sm:$0xff] }
 0x18a   : > { %1259 = vmatpush1.bf16.msra.mxu0 %v6709_v57  ;;  %1300 = vmatpush1.bf16.msra.mxu1 %v6710_v1  ;;  %v6720_v57 = vld [vmem:[#allocation56_spill] sm:$0xff]  ;;  %v6721_v1 = vld [vmem:[#allocation57_spill] sm:$0xff] }
 0x18b   : > { %1260 = vmatprep.subr.bf16.mxu0 %v6711_v7  ;;  %1301 = vmatprep.subr.bf16.mxu1 %v6712_v46  ;;  %v6722_v7 = vld [vmem:[#allocation58_spill] sm:$0xff]  ;;  %v6723_v46 = vld [vmem:[#allocation59_spill] sm:$0xff] }
 0x18e   : > { %1261 = vmatpush1.bf16.msra.mxu0 %v6713_v50  ;;  %1302 = vmatpush1.bf16.msra.mxu1 %v6714_v55  ;;  %v6724_v50 = vld [vmem:[#allocation60_spill] sm:$0xff]  ;;  %v6725_v55 = vld [vmem:[#allocation61_spill] sm:$0xff] }
 0x18f   : > { %1262 = vmatprep.subr.bf16.mxu0 %v6715_v56  ;;  %1303 = vmatprep.subr.bf16.mxu1 %v6716_v52  ;;  %v6726_v56 = vld [vmem:[#allocation62_spill] sm:$0xff]  ;;  %v6727_v52 = vld [vmem:[#allocation9_spill] sm:$0xff] }
 0x192   : > { %1263 = vmatpush1.bf16.msra.mxu0 %v6717_v60  ;;  %1304 = vmatpush1.bf16.msra.mxu1 %v6718_v3  ;;  %v6728_v60 = vld [vmem:[#allocation10_spill] sm:$0xff]  ;;  %v359_v3 = vlaneseq }
 0x193   : > { %1264 = vmatprep.subr.bf16.mxu0 %v6719_v51  ;;  %1305 = vmatprep.subr.bf16.mxu1 %v6720_v57 }
 0x194   : > { %v360_v51 = vshrl.u32 %v359_v3, 7 }
 0x196   : > { %1265 = vmatpush1.bf16.msra.mxu0 %v6721_v1  ;;  %1306 = vmatpush1.bf16.msra.mxu1 %v6722_v7  ;;  %v361_v53 = vsub.s32 0, %v360_v51  ;;  %v357_v1 = vld [vmem:[%s6322_s3] sm:$0xf]  ;;  %v365_v7 = vsub.s32 1, %v360_v51  ;;  %v373_v54 = vsub.s32 3, %v360_v51 }
 0x197   : > { %1266 = vmatprep.subr.bf16.mxu0 %v6723_v46  ;;  %1307 = vmatprep.subr.bf16.mxu1 %v6724_v50 }
 0x198   : > { %v4594_v57 = vrot.slane %v357_v1, %v361_v53  ;;  %v4596_v46 = vrot.slane %v357_v1, %v365_v7  ;;  %v4600_v23 = vrot.slane %v357_v1, %v373_v54  ;;  %v369_v53 = vsub.s32 2, %v360_v51 }
 0x19a   : > { %1267 = vmatpush1.bf16.msra.mxu0 %v6725_v55  ;;  %1308 = vmatpush1.bf16.msra.mxu1 %v6726_v56  ;;  %6729 = vst [vmem:[#allocation11_spill] sm:$0xff] %v4594_v57  ;;  %6730 = vst [vmem:[#allocation13_spill] sm:$0xff] %v4596_v46  ;;  %v4603_v22 = vrot.slane %v357_v1, %v369_v53 }
 0x19b   : > { %1355 = vmatprep.subr.bf16.mxu0 %v6727_v52  ;;  %1396 = vmatprep.subr.bf16.mxu1 %v6728_v60  ;;  %6731 = vst [vmem:[#allocation12_spill] sm:$0xff] %v4600_v23 }
 0x19c   : > { %6732 = vst [vmem:[#allocation14_spill] sm:$0xff] %v4603_v22 }
 0x210   : > { %v1018_v50 = vpop.f32.mrb[4].mxu0  ;;  %v1059_v55 = vpop.f32.mrb[4].mxu1 }
 0x211   : > { %v1019_v56 = vadd.f32 %v1018_v50, %v4594_v57  ;;  %v1020_v52 = vpop.f32.mrb[5].mxu0  ;;  %v1061_v59 = vpop.f32.mrb[5].mxu1  ;;  %v1060_v57 = vadd.f32 %v1059_v55, %v4603_v22 }
 0x212   : > { %v1021_v60 = vadd.f32 %v1020_v52, %v4596_v46  ;;  %v1022_v3 = vpop.f32.mrb[6].mxu0  ;;  %v1063_v58 = vpop.f32.mrb[6].mxu1  ;;  %v1062_v7 = vadd.f32 %v1061_v59, %v4600_v23  ;;  %v1094_v59 = vld [vmem:[%s3894_s28] sm:$0x22] }
 0x213   : > { %v3093_v35 = vmul.f32 -1.442695, %v1019_v56  ;;  %v1023_v62 = vpop.f32.mrb[7].mxu0  ;;  %v1064_v0 = vpop.f32.mrb[7].mxu1  ;;  %v1096_v55 = vunpack.c.l.bf16 %v1094_v59 }
 0x214   : > { %v3094_v63 = vmul.f32 -1.442695, %v1021_v60  ;;  %v3095_v50 = vmul.f32 -1.442695, %v1062_v7 }
 0x215   : > { %3341 = vpow2.f32 %v3093_v35  ;;  %v1085_v35 = vrot.slane %v4073_v31, 6 }
 0x216   : > { %3343 = vpow2.f32 %v3094_v63 }
 0x217   : > { %3345 = vpow2.f32 %v3095_v50 }
 0x218   : > { %3347 = vtanh.f32 %v1060_v57  ;;  %v1097_v57 = vunpack.c.h.bf16 %v1094_v59 }
 0x21f   : > { %v3342_v52 = vpop.eup %3341 }
 0x220   : > { %v3344_v3 = vpop.eup %3343  ;;  %v1069_v58 = vadd.f32 1.0, %v3342_v52 }
 0x221   : > { %v1075_v0 = vadd.f32 1.0, %v3344_v3  ;;  %v3346_v62 = vpop.eup %3345 }
 0x222   : > { %3349 = vrcp.f32 %v1069_v58  ;;  %v3348_v63 = vpop.eup %3347  ;;  %v1082_v1 = vadd.f32 1.0, %v3346_v62 }
 0x223   : > { %3351 = vrcp.f32 %v1075_v0 }
 0x224   : > { %3353 = vrcp.f32 %v1082_v1 }
 0x22c   : > { %v3350_v54 = vpop.eup %3349 }
 0x22d   : > { %v3352_v56 = vpop.eup %3351  ;;  %v1088_v51 = vmul.f32 %v3350_v54, %v3348_v63  ;;  %v1095_v63 = vld [vmem:[%s3894_s28 + $0x8] sm:$0x22] }
 0x22e   : > { %v1087_v60 = vmul.f32 %v3352_v56, %v1085_v35  ;;  %v3354_v1 = vpop.eup %3353 }
 0x230   : > { %v4608_v53 = vadd.f32 %v1088_v51, %v1087_v60  ;;  %v1134_v7 = vpop.f32.mrb[8].mxu0  ;;  %v1175_v50 = vpop.f32.mrb[8].mxu1  ;;  %v1099_v60 = vunpack.c.h.bf16 %v1095_v63 }
 0x231   : > { %v1186_v52 = vrot.slane %v1134_v7, 6  ;;  %v1136_v3 = vpop.f32.mrb[9].mxu0  ;;  %v1177_v58 = vpop.f32.mrb[9].mxu1  ;;  %v1098_v7 = vunpack.c.l.bf16 %v1095_v63 }
 0x232   : > { %6733 = vst [vmem:[#allocation15_spill] sm:$0xff] %v4608_v53  ;;  %v1187_v0 = vrot.slane %v1136_v3, 6  ;;  %v1138_v31 = vpop.f32.mrb[10].mxu0  ;;  %v1179_v22 = vpop.f32.mrb[10].mxu1  ;;  %3355 = vtanh.f32 %v4608_v53  ;;  %v1189_v46 = vrot.slane %v1177_v58, 6  ;;  %v1188_v3 = vrot.slane %v1175_v50, 6 }
 0x233   : > { %v1194_v23 = vadd.f32 %v1186_v52, %v1096_v55  ;;  %v1139_v62 = vpop.f32.mrb[11].mxu0  ;;  %v1180_v54 = vpop.f32.mrb[11].mxu1 }
 0x234   : > { %v1195_v35 = vadd.f32 %v1187_v0, %v1097_v57  ;;  %v1197_v59 = vadd.f32 %v1189_v46, %v1099_v60  ;;  %v1196_v53 = vadd.f32 %v1188_v3, %v1098_v7 }
 0x235   : > { %v3096_v56 = vmul.f32 -1.442695, %v1194_v23 }
 0x236   : > { %v3097_v51 = vmul.f32 -1.442695, %v1195_v35  ;;  %v3098_v21 = vmul.f32 -1.442695, %v1197_v59  ;;  %v1218_v35 = vrot.slane %v4490_v48, 6 }
 0x237   : > { %3357 = vpow2.f32 %v3096_v56  ;;  %v4620_v48 = vld [vmem:[%s6320_s1] ss:$16 sps:$4 sm:$0xff]  }
 0x238   : > { %3359 = vpow2.f32 %v3097_v51 }
 0x239   : > { %3361 = vpow2.f32 %v3098_v21 }
 0x23a   : > { %3363 = vtanh.f32 %v1196_v53 }
 0x23c   : > { %v3356_v31 = vpop.eup %3355 }
 0x23d   : > { %v1091_v22 = vmul.f32 %v3356_v31, %v3354_v1 }
 0x23f   : > { %v1092_v55 = vpack.c.bf16 %v1091_v22, %v1091_v22  ;;  %v1226_v52 = vrot.slane %v1091_v22, 6  ;;  %v4626_v22 = vld [vmem:[%s6320_s1 + $0x8] ss:$16 sps:$4 sm:$0xff]  }
 0x241   : > { %v3358_v62 = vpop.eup %3357  ;;  %1093 = vst [vmem:[%s3899_s7] sm:$0x1] %v1092_v55  ;;  %v1229_v57 = vpack.c.bf16 %v1226_v52, %v1226_v52  ;;  %v4632_v55 = vld [vmem:[%s6320_s1 + $0x24] ss:$16 sps:$4 sm:$0xff]   ;;  %v4638_v52 = vld [vmem:[%s6320_s1 + $0x2c] ss:$16 sps:$4 sm:$0xff]  }
 0x242   : > { %v3360_v23 = vpop.eup %3359  ;;  %v1201_v0 = vadd.f32 1.0, %v3358_v62  ;;  %v4646_v62 = vld [vmem:[%s6320_s1 + $0x20] ss:$16 sps:$4 sm:$0xff]  }
 0x243   : > { %v1207_v58 = vadd.f32 1.0, %v3360_v23  ;;  %v1233_v54 = vrot.slane %v1229_v57, 1  ;;  %v3362_v46 = vpop.eup %3361  ;;  %v4652_v57 = vld [vmem:[%s6320_s1 + $0x28] ss:$16 sps:$4 sm:$0xff]   ;;  %v4658_v23 = vld [vmem:[%s6320_s1 + $0x44] ss:$16 sps:$4 sm:$0xff]  }
 0x244   : > { %3365 = vrcp.f32 %v1201_v0  ;;  %v3364_v50 = vpop.eup %3363  ;;  %v1214_v60 = vadd.f32 1.0, %v3362_v46  ;;  %v4664_v0 = vld [vmem:[%s6320_s1 + $0x4c] ss:$16 sps:$4 sm:$0xff]   ;;  %v4682_v46 = vld [vmem:[%s6320_s1 + $0x64] ss:$16 sps:$4 sm:$0xff]  }
 0x245   : > { %3367 = vrcp.f32 %v1207_v58  ;;  %1268 = vmatprep.mubr.bf16.mxu0 %v1233_v54  ;;  %1309 = vmatprep.mubr.bf16.mxu1 %v1233_v54  ;;  %v4670_v58 = vld [vmem:[%s6320_s1 + $0x40] ss:$16 sps:$4 sm:$0xff]   ;;  %v4676_v54 = vld [vmem:[%s6320_s1 + $0x48] ss:$16 sps:$4 sm:$0xff]  }
 0x246   : > { %3369 = vrcp.f32 %v1214_v60  ;;  %v4718_v60 = vld [vmem:[%s6320_s1 + $0x80] ss:$16 sps:$4 sm:$0xff]  }
 0x24e   : > { %v3366_v63 = vpop.eup %3365 }
 0x24f   : > { %v3368_v56 = vpop.eup %3367  ;;  %v1221_v51 = vmul.f32 %v3366_v63, %v3364_v50  ;;  %v4688_v50 = vld [vmem:[%s6320_s1 + $0x6c] ss:$16 sps:$4 sm:$0xff]   ;;  %v4694_v63 = vld [vmem:[%s6320_s1 + $0x60] ss:$16 sps:$4 sm:$0xff]  }
 0x250   : > { %v1220_v59 = vmul.f32 %v3368_v56, %v1218_v35  ;;  %v3370_v21 = vpop.eup %3369  ;;  %v4700_v35 = vld [vmem:[%s6320_s1 + $0x68] ss:$16 sps:$4 sm:$0xff]   ;;  %v4706_v56 = vld [vmem:[%s6320_s1 + $0x84] ss:$16 sps:$4 sm:$0xff]  }
 0x252   : > { %v4614_v1 = vadd.f32 %v1221_v51, %v1220_v59  ;;  %v4712_v51 = vld [vmem:[%s6320_s1 + $0x8c] ss:$16 sps:$4 sm:$0xff]   ;;  %v4725_v59 = vld [vmem:[%s6320_s1 + $0xa4] ss:$16 sps:$4 sm:$0xff]  }
 0x254   : > { %3371 = vtanh.f32 %v4614_v1 }
 0x25e   : > { %v3372_v53 = vpop.eup %3371 }
 0x25f   : > { %v1224_v7 = vmul.f32 %v3372_v53, %v3370_v21  ;;  %v4732_v21 = vld [vmem:[%s6320_s1 + $0xa0] ss:$16 sps:$4 sm:$0xff]  }
 0x261   : > { %v1228_v3 = vpack.c.bf16 %v1224_v7, %v1224_v7  ;;  %v6771_v7 = vld [vmem:[#allocation11_spill] sm:$0xff] }
 0x263   : > { %v1232_v31 = vrot.slane %v1228_v3, 1 }
 0x265   : > { %1269 = vmatmul.mubr.bf16.vlgmr.msra.gmra.mrb[12].mxu0 %v1232_v31  ;;  %1310 = vmatmul.mubr.bf16.vlgmr.msra.gmra.mrb[12].mxu1 %v1232_v31 }
 0x266   : > { %1356 = vmatpush1.bf16.msra.mxu0 %v4620_v48  ;;  %1397 = vmatpush1.bf16.msra.mxu1 %v4626_v22 }
 0x267   : > { %1357 = vmatprep.subr.bf16.mxu0 %v4632_v55  ;;  %1398 = vmatprep.subr.bf16.mxu1 %v4638_v52 }
 0x268   : > { %1387 = vmatprep.mubr.bf16.mxu0 %v6674_v61  ;;  %1428 = vmatprep.mubr.bf16.mxu1 %v6674_v61 }
 0x26a   : > { %1358 = vmatpush1.bf16.msra.mxu0 %v4646_v62  ;;  %1399 = vmatpush1.bf16.msra.mxu1 %v4652_v57 }
 0x26b   : > { %1359 = vmatprep.subr.bf16.mxu0 %v4658_v23  ;;  %1400 = vmatprep.subr.bf16.mxu1 %v4664_v0 }
 0x26e   : > { %1360 = vmatpush1.bf16.msra.mxu0 %v4670_v58  ;;  %1401 = vmatpush1.bf16.msra.mxu1 %v4676_v54 }
 0x26f   : > { %1361 = vmatprep.subr.bf16.mxu0 %v4682_v46  ;;  %1402 = vmatprep.subr.bf16.mxu1 %v4688_v50 }
 0x272   : > { %1362 = vmatpush1.bf16.msra.mxu0 %v4694_v63  ;;  %1403 = vmatpush1.bf16.msra.mxu1 %v4700_v35 }
 0x273   : > { %1363 = vmatprep.subr.bf16.mxu0 %v4706_v56  ;;  %1404 = vmatprep.subr.bf16.mxu1 %v4712_v51 }
 0x276   : > { %1364 = vmatpush1.bf16.msra.mxu0 %v4718_v60  ;;  %1405 = vmatpush1.bf16.msra.mxu1 %v4036_v24  ;;  %v4739_v24 = vld [vmem:[%s6320_s1 + $0xc4] ss:$16 sps:$4 sm:$0xff]  }
 0x277   : > { %1365 = vmatprep.subr.bf16.mxu0 %v4725_v59  ;;  %1406 = vmatprep.subr.bf16.mxu1 %v4042_v25  ;;  %v6734_v25 = vld [vmem:[#allocation28_spill] sm:$0xff] }
 0x27a   : > { %1366 = vmatpush1.bf16.msra.mxu0 %v4732_v21  ;;  %1407 = vmatpush1.bf16.msra.mxu1 %v4060_v28  ;;  %v6737_v28 = vld [vmem:[#allocation31_spill] sm:$0xff] }
 0x27b   : > { %1367 = vmatprep.subr.bf16.mxu0 %v4739_v24  ;;  %1408 = vmatprep.subr.bf16.mxu1 %v4066_v29  ;;  %v6738_v29 = vld [vmem:[#allocation32_spill] sm:$0xff] }
 0x27e   : > { %1368 = vmatpush1.bf16.msra.mxu0 %v4048_v26  ;;  %1409 = vmatpush1.bf16.msra.mxu1 %v4079_v32  ;;  %v6735_v26 = vld [vmem:[#allocation29_spill] sm:$0xff]  ;;  %v6740_v32 = vld [vmem:[#allocation34_spill] sm:$0xff] }
 0x27f   : > { %1369 = vmatprep.subr.bf16.mxu0 %v4053_v27  ;;  %1410 = vmatprep.subr.bf16.mxu1 %v4092_v34  ;;  %v6736_v27 = vld [vmem:[#allocation30_spill] sm:$0xff]  ;;  %v6742_v34 = vld [vmem:[#allocation36_spill] sm:$0xff] }
 0x282   : > { %1370 = vmatpush1.bf16.msra.mxu0 %v4071_v30  ;;  %1411 = vmatpush1.bf16.msra.mxu1 %v4100_v36  ;;  %v6739_v30 = vld [vmem:[#allocation33_spill] sm:$0xff] }
 0x283   : > { %1491 = vmatprep.subr.bf16.mxu0 %v4086_v33  ;;  %1532 = vmatprep.subr.bf16.mxu1 %v4112_v38  ;;  %v6741_v33 = vld [vmem:[#allocation35_spill] sm:$0xff]  ;;  %v6743_v36 = vld [vmem:[#allocation37_spill] sm:$0xff] }
 0x284   : > { %v6745_v38 = vld [vmem:[#allocation39_spill] sm:$0xff] }
 0x285   : > { %1388 = vmatmul.mubr.bf16.vlgmr.msra.gmra.mrb[16].mxu0 %v1232_v31  ;;  %1429 = vmatmul.mubr.bf16.vlgmr.msra.gmra.mrb[16].mxu1 %v1232_v31 }
 0x286   : > { %1492 = vmatpush1.bf16.msra.mxu0 %v4105_v37  ;;  %1533 = vmatpush1.bf16.msra.mxu1 %v4128_v41  ;;  %v6744_v37 = vld [vmem:[#allocation38_spill] sm:$0xff] }
 0x287   : > { %1493 = vmatprep.subr.bf16.mxu0 %v4117_v39  ;;  %1534 = vmatprep.subr.bf16.mxu1 %v4139_v43  ;;  %v6746_v39 = vld [vmem:[#allocation40_spill] sm:$0xff]  ;;  %v6748_v41 = vld [vmem:[#allocation42_spill] sm:$0xff] }
 0x288   : > { %v6750_v43 = vld [vmem:[#allocation44_spill] sm:$0xff] }
 0x28a   : > { %1494 = vmatpush1.bf16.msra.mxu0 %v4123_v40  ;;  %1535 = vmatpush1.bf16.msra.mxu1 %v4152_v45  ;;  %v6747_v40 = vld [vmem:[#allocation41_spill] sm:$0xff]  ;;  %v6752_v45 = vld [vmem:[#allocation46_spill] sm:$0xff] }
 0x28b   : > { %1495 = vmatprep.subr.bf16.mxu0 %v4133_v42  ;;  %1536 = vmatprep.subr.bf16.mxu1 %v4163_v47  ;;  %v6749_v42 = vld [vmem:[#allocation43_spill] sm:$0xff] }
 0x28c   : > { %v6753_v47 = vld [vmem:[#allocation47_spill] sm:$0xff] }
 0x28e   : > { %1496 = vmatpush1.bf16.msra.mxu0 %v4147_v44  ;;  %1537 = vmatpush1.bf16.msra.mxu1 %v4176_v49  ;;  %v6751_v44 = vld [vmem:[#allocation45_spill] sm:$0xff]  ;;  %v6754_v49 = vld [vmem:[#allocation48_spill] sm:$0xff] }
 0x28f   : > { %1497 = vmatprep.subr.bf16.mxu0 %v6675_v2  ;;  %1538 = vmatprep.subr.bf16.mxu1 %v6676_v4  ;;  %v6755_v2 = vld [vmem:[#allocation49_spill] sm:$0xff]  ;;  %v6756_v4 = vld [vmem:[#allocation50_spill] sm:$0xff] }
 0x292   : > { %1498 = vmatpush1.bf16.msra.mxu0 %v6677_v5  ;;  %1539 = vmatpush1.bf16.msra.mxu1 %v6678_v6  ;;  %v6757_v5 = vld [vmem:[#allocation51_spill] sm:$0xff]  ;;  %v6758_v6 = vld [vmem:[#allocation52_spill] sm:$0xff] }
 0x293   : > { %1499 = vmatprep.subr.bf16.mxu0 %v6679_v8  ;;  %1540 = vmatprep.subr.bf16.mxu1 %v6680_v9  ;;  %v6759_v8 = vld [vmem:[#allocation53_spill] sm:$0xff]  ;;  %v6760_v9 = vld [vmem:[#allocation54_spill] sm:$0xff] }
 0x296   : > { %1500 = vmatpush1.bf16.msra.mxu0 %v6681_v10  ;;  %1541 = vmatpush1.bf16.msra.mxu1 %v6682_v11  ;;  %v6761_v10 = vld [vmem:[#allocation55_spill] sm:$0xff]  ;;  %v6762_v11 = vld [vmem:[#allocation56_spill] sm:$0xff] }
 0x297   : > { %1501 = vmatprep.subr.bf16.mxu0 %v6683_v12  ;;  %1542 = vmatprep.subr.bf16.mxu1 %v6684_v13  ;;  %v6763_v12 = vld [vmem:[#allocation57_spill] sm:$0xff]  ;;  %v6764_v13 = vld [vmem:[#allocation58_spill] sm:$0xff] }
 0x29a   : > { %1502 = vmatpush1.bf16.msra.mxu0 %v6685_v14  ;;  %1543 = vmatpush1.bf16.msra.mxu1 %v6686_v15  ;;  %v6765_v14 = vld [vmem:[#allocation59_spill] sm:$0xff]  ;;  %v6766_v15 = vld [vmem:[#allocation60_spill] sm:$0xff] }
 0x29b   : > { %1503 = vmatprep.subr.bf16.mxu0 %v6687_v16  ;;  %1544 = vmatprep.subr.bf16.mxu1 %v6688_v17  ;;  %v6767_v16 = vld [vmem:[#allocation61_spill] sm:$0xff]  ;;  %v6768_v17 = vld [vmem:[#allocation62_spill] sm:$0xff] }
 0x29e   : > { %1504 = vmatpush1.bf16.msra.mxu0 %v6689_v18  ;;  %1545 = vmatpush1.bf16.msra.mxu1 %v6690_v19  ;;  %v4816_v18 = vld [vmem:[%s6320_s1 + $0x4] ss:$16 sps:$4 sm:$0xff]   ;;  %v4822_v19 = vld [vmem:[%s6320_s1 + $0xc] ss:$16 sps:$4 sm:$0xff]  }
 0x29f   : > { %1505 = vmatprep.subr.bf16.mxu0 %v6691_v20  ;;  %1546 = vmatprep.subr.bf16.mxu1 %v6734_v25  ;;  %6769 = vst [vmem:[#allocation16_spill] sm:$0xff] %v4816_v18  ;;  %6770 = vst [vmem:[#allocation17_spill] sm:$0xff] %v4822_v19 }
 0x2a2   : > { %1506 = vmatpush1.bf16.msra.mxu0 %v6735_v26  ;;  %1547 = vmatpush1.bf16.msra.mxu1 %v6736_v27  ;;  %v6772_v26 = vld [vmem:[#allocation13_spill] sm:$0xff] }
 0x2a3   : > { %1507 = vmatprep.subr.bf16.mxu0 %v6737_v28  ;;  %1548 = vmatprep.subr.bf16.mxu1 %v6738_v29 }
 0x2a6   : > { %1508 = vmatpush1.bf16.msra.mxu0 %v6739_v30  ;;  %1549 = vmatpush1.bf16.msra.mxu1 %v6740_v32 }
 0x2a7   : > { %1509 = vmatprep.subr.bf16.mxu0 %v6741_v33  ;;  %1550 = vmatprep.subr.bf16.mxu1 %v6742_v34 }
 0x2aa   : > { %1510 = vmatpush1.bf16.msra.mxu0 %v6743_v36  ;;  %1551 = vmatpush1.bf16.msra.mxu1 %v6744_v37  ;;  %v6773_v36 = vld [vmem:[#allocation12_spill] sm:$0xff] }
 0x2ab   : > { %1511 = vmatprep.subr.bf16.mxu0 %v6745_v38  ;;  %1552 = vmatprep.subr.bf16.mxu1 %v6746_v39  ;;  %v6774_v39 = vld [vmem:[#allocation14_spill] sm:$0xff] }
 0x2ae   : > { %1512 = vmatpush1.bf16.msra.mxu0 %v6747_v40  ;;  %1553 = vmatpush1.bf16.msra.mxu1 %v6748_v41 }
 0x2af   : > { %1513 = vmatprep.subr.bf16.mxu0 %v6749_v42  ;;  %1554 = vmatprep.subr.bf16.mxu1 %v6750_v43 }
 0x2b2   : > { %1514 = vmatpush1.bf16.msra.mxu0 %v6751_v44  ;;  %1555 = vmatpush1.bf16.msra.mxu1 %v6752_v45 }
 0x2b3   : > { %1515 = vmatprep.subr.bf16.mxu0 %v6753_v47  ;;  %1556 = vmatprep.subr.bf16.mxu1 %v6754_v49 }
 0x2b6   : > { %1516 = vmatpush1.bf16.msra.mxu0 %v6755_v2  ;;  %1557 = vmatpush1.bf16.msra.mxu1 %v6756_v4  ;;  %v1349_v2 = vld [vmem:[%s3894_s28] sm:$0x44] }
 0x2b7   : > { %1517 = vmatprep.subr.bf16.mxu0 %v6757_v5  ;;  %1558 = vmatprep.subr.bf16.mxu1 %v6758_v6 }
 0x2ba   : > { %1518 = vmatpush1.bf16.msra.mxu0 %v6759_v8  ;;  %1559 = vmatpush1.bf16.msra.mxu1 %v6760_v9  ;;  %v6775_v8 = vld [vmem:[#allocation15_spill] sm:$0xff] }
 0x2bb   : > { %1519 = vmatprep.subr.bf16.mxu0 %v6761_v10  ;;  %1560 = vmatprep.subr.bf16.mxu1 %v6762_v11  ;;  %v1351_v10 = vunpack.c.l.bf16 %v1349_v2 }
 0x2be   : > { %1520 = vmatpush1.bf16.msra.mxu0 %v6763_v12  ;;  %1561 = vmatpush1.bf16.msra.mxu1 %v6764_v13 }
 0x2bf   : > { %1521 = vmatprep.subr.bf16.mxu0 %v6765_v14  ;;  %1562 = vmatprep.subr.bf16.mxu1 %v6766_v15  ;;  %v1352_v14 = vunpack.c.h.bf16 %v1349_v2 }
 0x2c2   : > { %1522 = vmatpush1.bf16.msra.mxu0 %v6767_v16  ;;  %1563 = vmatpush1.bf16.msra.mxu1 %v6768_v17 }
 0x2c3   : > { %1610 = vmatprep.subr.bf16.mxu0 %v4816_v18  ;;  %1651 = vmatprep.subr.bf16.mxu1 %v4822_v19 }
 0x338   : > { %v1270_v20 = vpop.f32.mrb[12].mxu0  ;;  %v1311_v53 = vpop.f32.mrb[12].mxu1 }
 0x339   : > { %v1271_v3 = vadd.f32 %v1270_v20, %v6771_v7  ;;  %v1272_v31 = vpop.f32.mrb[13].mxu0  ;;  %v1313_v25 = vpop.f32.mrb[13].mxu1  ;;  %v1312_v40 = vadd.f32 %v1311_v53, %v6774_v39 }
 0x33a   : > { %v1273_v27 = vadd.f32 %v1272_v31, %v6772_v26  ;;  %v1274_v28 = vpop.f32.mrb[14].mxu0  ;;  %v1315_v29 = vpop.f32.mrb[14].mxu1  ;;  %v1314_v37 = vadd.f32 %v1313_v25, %v6773_v36  ;;  %v1350_v25 = vld [vmem:[%s3894_s28 + $0x8] sm:$0x44] }
 0x33b   : > { %v3099_v30 = vmul.f32 -1.442695, %v1271_v3  ;;  %v1275_v32 = vpop.f32.mrb[15].mxu0  ;;  %v1316_v33 = vpop.f32.mrb[15].mxu1 }
 0x33c   : > { %v3100_v34 = vmul.f32 -1.442695, %v1273_v27  ;;  %v3101_v38 = vmul.f32 -1.442695, %v1314_v37  ;;  %v1354_v33 = vunpack.c.h.bf16 %v1350_v25 }
 0x33d   : > { %3373 = vpow2.f32 %v3099_v30 }
 0x33e   : > { %3375 = vpow2.f32 %v3100_v34 }
 0x33f   : > { %3377 = vpow2.f32 %v3101_v38 }
 0x340   : > { %3379 = vtanh.f32 %v1312_v40  ;;  %v1353_v40 = vunpack.c.l.bf16 %v1350_v25 }
 0x347   : > { %v3374_v41 = vpop.eup %3373 }
 0x348   : > { %v3376_v42 = vpop.eup %3375  ;;  %v1321_v43 = vadd.f32 1.0, %v3374_v41 }
 0x349   : > { %v1327_v44 = vadd.f32 1.0, %v3376_v42  ;;  %v3378_v45 = vpop.eup %3377 }
 0x34a   : > { %3381 = vrcp.f32 %v1321_v43  ;;  %v3380_v47 = vpop.eup %3379  ;;  %v1334_v6 = vadd.f32 1.0, %v3378_v45 }
 0x34b   : > { %3383 = vrcp.f32 %v1327_v44 }
 0x34c   : > { %3385 = vrcp.f32 %v1334_v6 }
 0x354   : > { %v3382_v49 = vpop.eup %3381 }
 0x355   : > { %v3384_v4 = vpop.eup %3383  ;;  %v1338_v5 = vmul.f32 %v3382_v49, %v3380_v47 }
 0x356   : > { %v1337_v9 = vmul.f32 %v3384_v4, %v6775_v8  ;;  %v3386_v38 = vpop.eup %3385 }
 0x358   : > { %v4831_v11 = vadd.f32 %v1338_v5, %v1337_v9  ;;  %v1389_v12 = vpop.f32.mrb[16].mxu0  ;;  %v1430_v13 = vpop.f32.mrb[16].mxu1 }
 0x359   : > { %v1441_v15 = vrot.slane %v1389_v12, 4  ;;  %v1391_v16 = vpop.f32.mrb[17].mxu0  ;;  %v1432_v17 = vpop.f32.mrb[17].mxu1  ;;  %v1443_v41 = vrot.slane %v1430_v13, 4 }
 0x35a   : > { %v1442_v20 = vrot.slane %v1391_v16, 4  ;;  %v1393_v53 = vpop.f32.mrb[18].mxu0  ;;  %v1434_v3 = vpop.f32.mrb[18].mxu1  ;;  %3387 = vtanh.f32 %v4831_v11  ;;  %v1444_v34 = vrot.slane %v1432_v17, 4 }
 0x35b   : > { %v1449_v31 = vadd.f32 %v1441_v15, %v1351_v10  ;;  %v1394_v27 = vpop.f32.mrb[19].mxu0  ;;  %v1435_v28 = vpop.f32.mrb[19].mxu1  ;;  %v1451_v45 = vadd.f32 %v1443_v41, %v1353_v40  ;;  %v1473_v15 = vrot.slane %v4614_v1, 6  ;;  %v4862_v1 = vld [vmem:[%s6320_s1 + $0x88] ss:$16 sps:$4 sm:$0xff]  }
 0x35c   : > { %v1450_v29 = vadd.f32 %v1442_v20, %v1352_v14  ;;  %v1452_v37 = vadd.f32 %v1444_v34, %v1354_v33  ;;  %v4883_v33 = vld [vmem:[%s6320_s1 + $0xcc] ss:$16 sps:$4 sm:$0xff]   ;;  %v4889_v34 = vld [vmem:[%s6320_s1 + $0xc0] ss:$16 sps:$4 sm:$0xff]  }
 0x35d   : > { %v3103_v30 = vmul.f32 -1.442695, %v1449_v31  ;;  %v4907_v40 = vld [vmem:[%s6320_s1 + $0xec] ss:$16 sps:$4 sm:$0xff]   ;;  %v4913_v41 = vld [vmem:[%s6320_s1 + $0xe0] ss:$16 sps:$4 sm:$0xff]  }
 0x35e   : > { %v3104_v32 = vmul.f32 -1.442695, %v1450_v29  ;;  %v3105_v44 = vmul.f32 -1.442695, %v1452_v37  ;;  %v4895_v37 = vld [vmem:[%s6320_s1 + $0xc8] ss:$16 sps:$4 sm:$0xff]  }
 0x35f   : > { %3389 = vpow2.f32 %v3103_v30  ;;  %v4869_v30 = vld [vmem:[%s6320_s1 + $0xac] ss:$16 sps:$4 sm:$0xff]  }
 0x360   : > { %3391 = vpow2.f32 %v3104_v32  ;;  %v4876_v32 = vld [vmem:[%s6320_s1 + $0xa8] ss:$16 sps:$4 sm:$0xff]  }
 0x361   : > { %3393 = vpow2.f32 %v3105_v44  ;;  %v4931_v44 = vld [vmem:[%s6321_s2 + $0xc] ss:$16 sps:$4 sm:$0xff]  }
 0x362   : > { %3395 = vtanh.f32 %v1451_v45  ;;  %v4937_v45 = vld [vmem:[%s6321_s2] ss:$16 sps:$4 sm:$0xff]  }
 0x364   : > { %v3388_v42 = vpop.eup %3387 }
 0x365   : > { %v1341_v43 = vmul.f32 %v3388_v42, %v3386_v38  ;;  %v4901_v38 = vld [vmem:[%s6320_s1 + $0xe4] ss:$16 sps:$4 sm:$0xff]   ;;  %v4919_v42 = vld [vmem:[%s6320_s1 + $0xe8] ss:$16 sps:$4 sm:$0xff]  }
 0x367   : > { %v3151_v47 = vpack.c.bf16 %v1341_v43, %v1341_v43  ;;  %v1481_v49 = vrot.slane %v1341_v43, 4  ;;  %v4925_v43 = vld [vmem:[%s6321_s2 + $0x4] ss:$16 sps:$4 sm:$0xff]  }
 0x369   : > { %v3390_v2 = vpop.eup %3389  ;;  %v1346_v4 = vrot.slane %v3151_v47, 7  ;;  %v1484_v5 = vpack.c.bf16 %v1481_v49, %v1481_v49  ;;  %v4943_v47 = vld [vmem:[%s6321_s2 + $0x8] ss:$16 sps:$4 sm:$0xff]   ;;  %v4949_v49 = vld [vmem:[%s6321_s2 + $0x24] ss:$16 sps:$4 sm:$0xff]  }
 0x36a   : > { %v3392_v6 = vpop.eup %3391  ;;  %v1456_v8 = vadd.f32 1.0, %v3390_v2  ;;  %v4955_v2 = vld [vmem:[%s6321_s2 + $0x2c] ss:$16 sps:$4 sm:$0xff]  }
 0x36b   : > { %v1462_v9 = vadd.f32 1.0, %v3392_v6  ;;  %1348 = vst [vmem:[%s3899_s7] sm:$0x2] %v1346_v4  ;;  %v1488_v10 = vrot.slane %v1484_v5, 2  ;;  %v3394_v12 = vpop.eup %3393  ;;  %v4961_v4 = vld [vmem:[%s6321_s2 + $0x20] ss:$16 sps:$4 sm:$0xff]  }
 0x36c   : > { %3397 = vrcp.f32 %v1456_v8  ;;  %v3396_v13 = vpop.eup %3395  ;;  %v1469_v20 = vadd.f32 1.0, %v3394_v12  ;;  %v4967_v5 = vld [vmem:[%s6321_s2 + $0x28] ss:$16 sps:$4 sm:$0xff]   ;;  %v4973_v6 = vld [vmem:[%s6321_s2 + $0x44] ss:$16 sps:$4 sm:$0xff]  }
 0x36d   : > { %3399 = vrcp.f32 %v1462_v9  ;;  %1523 = vmatprep.mubr.bf16.mxu0 %v1488_v10  ;;  %1564 = vmatprep.mubr.bf16.mxu1 %v1488_v10  ;;  %v4979_v8 = vld [vmem:[%s6321_s2 + $0x4c] ss:$16 sps:$4 sm:$0xff]   ;;  %v4985_v9 = vld [vmem:[%s6321_s2 + $0x40] ss:$16 sps:$4 sm:$0xff]   ;;  %v4991_v10 = vld [vmem:[%s6321_s2 + $0x48] ss:$16 sps:$4 sm:$0xff]  }
 0x36e   : > { %3401 = vrcp.f32 %v1469_v20  ;;  %6776 = vst [vmem:[#allocation18_spill] sm:$0xff] %v4979_v8  ;;  %6777 = vst [vmem:[#allocation19_spill] sm:$0xff] %v4985_v9  ;;  %v4997_v12 = vld [vmem:[%s6321_s2 + $0x64] ss:$16 sps:$4 sm:$0xff]   ;;  %v5033_v20 = vld [vmem:[%s6321_s2 + $0x80] ss:$16 sps:$4 sm:$0xff]  }
 0x36f   : > { %6778 = vst [vmem:[#allocation20_spill] sm:$0xff] %v4991_v10  ;;  %6779 = vst [vmem:[#allocation21_spill] sm:$0xff] %v4997_v12 }
 0x370   : > { %6785 = vst [vmem:[#allocation27_spill] sm:$0xff] %v5033_v20 }
 0x376   : > { %v3398_v14 = vpop.eup %3397 }
 0x377   : > { %v3400_v16 = vpop.eup %3399  ;;  %v1476_v17 = vmul.f32 %v3398_v14, %v3396_v13  ;;  %v5003_v13 = vld [vmem:[%s6321_s2 + $0x6c] ss:$16 sps:$4 sm:$0xff]   ;;  %v5009_v14 = vld [vmem:[%s6321_s2 + $0x60] ss:$16 sps:$4 sm:$0xff]  }
 0x378   : > { %v1475_v53 = vmul.f32 %v3400_v16, %v1473_v15  ;;  %v3402_v31 = vpop.eup %3401  ;;  %6780 = vst [vmem:[#allocation22_spill] sm:$0xff] %v5003_v13  ;;  %6781 = vst [vmem:[#allocation23_spill] sm:$0xff] %v5009_v14  ;;  %v5015_v15 = vld [vmem:[%s6321_s2 + $0x68] ss:$16 sps:$4 sm:$0xff]   ;;  %v5021_v16 = vld [vmem:[%s6321_s2 + $0x84] ss:$16 sps:$4 sm:$0xff]  }
 0x379   : > { %6782 = vst [vmem:[#allocation24_spill] sm:$0xff] %v5015_v15  ;;  %6783 = vst [vmem:[#allocation25_spill] sm:$0xff] %v5021_v16 }
 0x37a   : > { %v4837_v3 = vadd.f32 %v1476_v17, %v1475_v53  ;;  %v5027_v17 = vld [vmem:[%s6321_s2 + $0x8c] ss:$16 sps:$4 sm:$0xff]   ;;  %v5039_v53 = vld [vmem:[%s6321_s2 + $0x88] ss:$16 sps:$4 sm:$0xff]  }
 0x37b   : > { %6784 = vst [vmem:[#allocation26_spill] sm:$0xff] %v5027_v17  ;;  %6786 = vst [vmem:[#allocation9_spill] sm:$0xff] %v5039_v53 }
 0x37c   : > { %3403 = vtanh.f32 %v4837_v3 }
 0x386   : > { %v3404_v25 = vpop.eup %3403 }
 0x387   : > { %v1479_v27 = vmul.f32 %v3404_v25, %v3402_v31  ;;  %v5045_v31 = vld [vmem:[%s6321_s2 + $0xa4] ss:$16 sps:$4 sm:$0xff]   ;;  %v5051_v25 = vld [vmem:[%s6321_s2 + $0xac] ss:$16 sps:$4 sm:$0xff]  }
 0x388   : > { %6787 = vst [vmem:[#allocation10_spill] sm:$0xff] %v5045_v31  ;;  %6788 = vst [vmem:[#allocation28_spill] sm:$0xff] %v5051_v25 }
 0x389   : > { %v1483_v28 = vpack.c.bf16 %v1479_v27, %v1479_v27  ;;  %v5057_v27 = vld [vmem:[%s6321_s2 + $0xa0] ss:$16 sps:$4 sm:$0xff]  }
 0x38a   : > { %6789 = vst [vmem:[#allocation29_spill] sm:$0xff] %v5057_v27 }
 0x38b   : > { %v1487_v29 = vrot.slane %v1483_v28, 2  ;;  %v5063_v28 = vld [vmem:[%s6321_s2 + $0xa8] ss:$16 sps:$4 sm:$0xff]  }
 0x38c   : > { %6790 = vst [vmem:[#allocation30_spill] sm:$0xff] %v5063_v28 }
 0x38d   : > { %1524 = vmatmul.mubr.bf16.vlgmr.msra.gmra.mrb[20].mxu0 %v1487_v29  ;;  %1565 = vmatmul.mubr.bf16.vlgmr.msra.gmra.mrb[20].mxu1 %v1487_v29 }
 0x38e   : > { %1611 = vmatpush1.bf16.msra.mxu0 %v4620_v48  ;;  %1652 = vmatpush1.bf16.msra.mxu1 %v4626_v22 }
 0x38f   : > { %1612 = vmatprep.subr.bf16.mxu0 %v4632_v55  ;;  %1653 = vmatprep.subr.bf16.mxu1 %v4638_v52 }
 0x390   : > { %1642 = vmatprep.mubr.bf16.mxu0 %v6674_v61  ;;  %1683 = vmatprep.mubr.bf16.mxu1 %v6674_v61 }
 0x392   : > { %1613 = vmatpush1.bf16.msra.mxu0 %v4646_v62  ;;  %1654 = vmatpush1.bf16.msra.mxu1 %v4652_v57 }
 0x393   : > { %1614 = vmatprep.subr.bf16.mxu0 %v4658_v23  ;;  %1655 = vmatprep.subr.bf16.mxu1 %v4664_v0 }
 0x396   : > { %1615 = vmatpush1.bf16.msra.mxu0 %v4670_v58  ;;  %1656 = vmatpush1.bf16.msra.mxu1 %v4676_v54 }
 0x397   : > { %1616 = vmatprep.subr.bf16.mxu0 %v4682_v46  ;;  %1657 = vmatprep.subr.bf16.mxu1 %v4688_v50 }
 0x39a   : > { %1617 = vmatpush1.bf16.msra.mxu0 %v4694_v63  ;;  %1658 = vmatpush1.bf16.msra.mxu1 %v4700_v35 }
 0x39b   : > { %1618 = vmatprep.subr.bf16.mxu0 %v4706_v56  ;;  %1659 = vmatprep.subr.bf16.mxu1 %v4712_v51 }
 0x39e   : > { %1619 = vmatpush1.bf16.msra.mxu0 %v4718_v60  ;;  %1660 = vmatpush1.bf16.msra.mxu1 %v4862_v1 }
 0x39f   : > { %1620 = vmatprep.subr.bf16.mxu0 %v4725_v59  ;;  %1661 = vmatprep.subr.bf16.mxu1 %v4869_v30 }
 0x3a2   : > { %1621 = vmatpush1.bf16.msra.mxu0 %v4732_v21  ;;  %1662 = vmatpush1.bf16.msra.mxu1 %v4876_v32 }
 0x3a3   : > { %1622 = vmatprep.subr.bf16.mxu0 %v4739_v24  ;;  %1663 = vmatprep.subr.bf16.mxu1 %v4883_v33 }
 0x3a6   : > { %1623 = vmatpush1.bf16.msra.mxu0 %v4889_v34  ;;  %1664 = vmatpush1.bf16.msra.mxu1 %v4895_v37 }
 0x3a7   : > { %1624 = vmatprep.subr.bf16.mxu0 %v4901_v38  ;;  %1665 = vmatprep.subr.bf16.mxu1 %v4907_v40 }
 0x3aa   : > { %1625 = vmatpush1.bf16.msra.mxu0 %v4913_v41  ;;  %1666 = vmatpush1.bf16.msra.mxu1 %v4919_v42 }
 0x3ab   : > { %1746 = vmatprep.subr.bf16.mxu0 %v4925_v43  ;;  %1787 = vmatprep.subr.bf16.mxu1 %v4931_v44 }
 0x3ad   : > { %1643 = vmatmul.mubr.bf16.vlgmr.msra.gmra.mrb[24].mxu0 %v1487_v29  ;;  %1684 = vmatmul.mubr.bf16.vlgmr.msra.gmra.mrb[24].mxu1 %v1487_v29  ;;  %v5069_v29 = vld [vmem:[%s6321_s2 + $0xc4] ss:$16 sps:$4 sm:$0xff]  }
 0x3ae   : > { %1747 = vmatpush1.bf16.msra.mxu0 %v4937_v45  ;;  %1788 = vmatpush1.bf16.msra.mxu1 %v4943_v47  ;;  %6791 = vst [vmem:[#allocation31_spill] sm:$0xff] %v5069_v29 }
 0x3af   : > { %1748 = vmatprep.subr.bf16.mxu0 %v4949_v49  ;;  %1789 = vmatprep.subr.bf16.mxu1 %v4955_v2 }
 0x3b2   : > { %1749 = vmatpush1.bf16.msra.mxu0 %v4961_v4  ;;  %1790 = vmatpush1.bf16.msra.mxu1 %v4967_v5 }
 0x3b3   : > { %1750 = vmatprep.subr.bf16.mxu0 %v4973_v6  ;;  %1791 = vmatprep.subr.bf16.mxu1 %v4979_v8 }
 0x3b6   : > { %1751 = vmatpush1.bf16.msra.mxu0 %v4985_v9  ;;  %1792 = vmatpush1.bf16.msra.mxu1 %v4991_v10 }
 0x3b7   : > { %1752 = vmatprep.subr.bf16.mxu0 %v4997_v12  ;;  %1793 = vmatprep.subr.bf16.mxu1 %v5003_v13 }
 0x3ba   : > { %1753 = vmatpush1.bf16.msra.mxu0 %v5009_v14  ;;  %1794 = vmatpush1.bf16.msra.mxu1 %v5015_v15 }
 0x3bb   : > { %1754 = vmatprep.subr.bf16.mxu0 %v5021_v16  ;;  %1795 = vmatprep.subr.bf16.mxu1 %v5027_v17 }
 0x3be   : > { %1755 = vmatpush1.bf16.msra.mxu0 %v5033_v20  ;;  %1796 = vmatpush1.bf16.msra.mxu1 %v5039_v53 }
 0x3bf   : > { %1756 = vmatprep.subr.bf16.mxu0 %v5045_v31  ;;  %1797 = vmatprep.subr.bf16.mxu1 %v5051_v25  ;;  %v5075_v25 = vld [vmem:[%s6321_s2 + $0xcc] ss:$16 sps:$4 sm:$0xff]  }
 0x3c0   : > { %6792 = vst [vmem:[#allocation32_spill] sm:$0xff] %v5075_v25 }
 0x3c2   : > { %1757 = vmatpush1.bf16.msra.mxu0 %v5057_v27  ;;  %1798 = vmatpush1.bf16.msra.mxu1 %v5063_v28  ;;  %v5081_v27 = vld [vmem:[%s6321_s2 + $0xc0] ss:$16 sps:$4 sm:$0xff]   ;;  %v5087_v28 = vld [vmem:[%s6321_s2 + $0xc8] ss:$16 sps:$4 sm:$0xff]  }
 0x3c3   : > { %1758 = vmatprep.subr.bf16.mxu0 %v5069_v29  ;;  %1799 = vmatprep.subr.bf16.mxu1 %v5075_v25  ;;  %6793 = vst [vmem:[#allocation33_spill] sm:$0xff] %v5081_v27  ;;  %6794 = vst [vmem:[#allocation34_spill] sm:$0xff] %v5087_v28  ;;  %v5093_v29 = vld [vmem:[%s6321_s2 + $0xe4] ss:$16 sps:$4 sm:$0xff]   ;;  %v5099_v25 = vld [vmem:[%s6321_s2 + $0xec] ss:$16 sps:$4 sm:$0xff]  }
 0x3c4   : > { %6795 = vst [vmem:[#allocation35_spill] sm:$0xff] %v5093_v29  ;;  %6796 = vst [vmem:[#allocation36_spill] sm:$0xff] %v5099_v25 }
 0x3c6   : > { %1759 = vmatpush1.bf16.msra.mxu0 %v5081_v27  ;;  %1800 = vmatpush1.bf16.msra.mxu1 %v5087_v28  ;;  %v5105_v27 = vld [vmem:[%s6321_s2 + $0xe0] ss:$16 sps:$4 sm:$0xff]   ;;  %v5111_v28 = vld [vmem:[%s6321_s2 + $0xe8] ss:$16 sps:$4 sm:$0xff]  }
 0x3c7   : > { %1760 = vmatprep.subr.bf16.mxu0 %v5093_v29  ;;  %1801 = vmatprep.subr.bf16.mxu1 %v5099_v25  ;;  %6797 = vst [vmem:[#allocation37_spill] sm:$0xff] %v5105_v27  ;;  %6798 = vst [vmem:[#allocation38_spill] sm:$0xff] %v5111_v28  ;;  %v5117_v29 = vld [vmem:[%s6321_s2 + $0x104] ss:$16 sps:$4 sm:$0xff]   ;;  %v5123_v25 = vld [vmem:[%s6321_s2 + $0x10c] ss:$16 sps:$4 sm:$0xff]  }
 0x3c8   : > { %6799 = vst [vmem:[#allocation39_spill] sm:$0xff] %v5117_v29  ;;  %6800 = vst [vmem:[#allocation40_spill] sm:$0xff] %v5123_v25 }
 0x3ca   : > { %1761 = vmatpush1.bf16.msra.mxu0 %v5105_v27  ;;  %1802 = vmatpush1.bf16.msra.mxu1 %v5111_v28  ;;  %v5129_v27 = vld [vmem:[%s6321_s2 + $0x100] ss:$16 sps:$4 sm:$0xff]   ;;  %v5135_v28 = vld [vmem:[%s6321_s2 + $0x108] ss:$16 sps:$4 sm:$0xff]  }
 0x3cb   : > { %1762 = vmatprep.subr.bf16.mxu0 %v5117_v29  ;;  %1803 = vmatprep.subr.bf16.mxu1 %v5123_v25  ;;  %6801 = vst [vmem:[#allocation41_spill] sm:$0xff] %v5129_v27  ;;  %6802 = vst [vmem:[#allocation42_spill] sm:$0xff] %v5135_v28  ;;  %v5141_v29 = vld [vmem:[%s6321_s2 + $0x124] ss:$16 sps:$4 sm:$0xff]   ;;  %v5147_v25 = vld [vmem:[%s6321_s2 + $0x12c] ss:$16 sps:$4 sm:$0xff]  }
 0x3cc   : > { %6803 = vst [vmem:[#allocation43_spill] sm:$0xff] %v5141_v29  ;;  %6804 = vst [vmem:[#allocation44_spill] sm:$0xff] %v5147_v25 }
 0x3ce   : > { %1763 = vmatpush1.bf16.msra.mxu0 %v5129_v27  ;;  %1804 = vmatpush1.bf16.msra.mxu1 %v5135_v28  ;;  %v5153_v27 = vld [vmem:[%s6321_s2 + $0x120] ss:$16 sps:$4 sm:$0xff]   ;;  %v5159_v28 = vld [vmem:[%s6321_s2 + $0x128] ss:$16 sps:$4 sm:$0xff]  }
 0x3cf   : > { %1764 = vmatprep.subr.bf16.mxu0 %v5141_v29  ;;  %1805 = vmatprep.subr.bf16.mxu1 %v5147_v25  ;;  %6805 = vst [vmem:[#allocation45_spill] sm:$0xff] %v5153_v27  ;;  %6806 = vst [vmem:[#allocation46_spill] sm:$0xff] %v5159_v28  ;;  %v5165_v29 = vld [vmem:[%s6321_s2 + $0x144] ss:$16 sps:$4 sm:$0xff]   ;;  %v5171_v25 = vld [vmem:[%s6321_s2 + $0x14c] ss:$16 sps:$4 sm:$0xff]  }
 0x3d0   : > { %6807 = vst [vmem:[#allocation47_spill] sm:$0xff] %v5165_v29  ;;  %6808 = vst [vmem:[#allocation48_spill] sm:$0xff] %v5171_v25 }
 0x3d2   : > { %1765 = vmatpush1.bf16.msra.mxu0 %v5153_v27  ;;  %1806 = vmatpush1.bf16.msra.mxu1 %v5159_v28  ;;  %v5177_v27 = vld [vmem:[%s6321_s2 + $0x140] ss:$16 sps:$4 sm:$0xff]   ;;  %v5183_v28 = vld [vmem:[%s6321_s2 + $0x148] ss:$16 sps:$4 sm:$0xff]  }
 0x3d3   : > { %1766 = vmatprep.subr.bf16.mxu0 %v5165_v29  ;;  %1807 = vmatprep.subr.bf16.mxu1 %v5171_v25  ;;  %6809 = vst [vmem:[#allocation49_spill] sm:$0xff] %v5177_v27  ;;  %6810 = vst [vmem:[#allocation50_spill] sm:$0xff] %v5183_v28  ;;  %v5189_v29 = vld [vmem:[%s6321_s2 + $0x164] ss:$16 sps:$4 sm:$0xff]   ;;  %v5195_v25 = vld [vmem:[%s6321_s2 + $0x16c] ss:$16 sps:$4 sm:$0xff]  }
 0x3d4   : > { %6811 = vst [vmem:[#allocation51_spill] sm:$0xff] %v5189_v29  ;;  %6812 = vst [vmem:[#allocation52_spill] sm:$0xff] %v5195_v25 }
 0x3d6   : > { %1767 = vmatpush1.bf16.msra.mxu0 %v5177_v27  ;;  %1808 = vmatpush1.bf16.msra.mxu1 %v5183_v28  ;;  %v5201_v27 = vld [vmem:[%s6321_s2 + $0x160] ss:$16 sps:$4 sm:$0xff]   ;;  %v5207_v28 = vld [vmem:[%s6321_s2 + $0x168] ss:$16 sps:$4 sm:$0xff]  }
 0x3d7   : > { %1768 = vmatprep.subr.bf16.mxu0 %v5189_v29  ;;  %1809 = vmatprep.subr.bf16.mxu1 %v5195_v25  ;;  %6813 = vst [vmem:[#allocation53_spill] sm:$0xff] %v5201_v27  ;;  %6814 = vst [vmem:[#allocation54_spill] sm:$0xff] %v5207_v28  ;;  %v5213_v29 = vld [vmem:[%s6321_s2 + $0x184] ss:$16 sps:$4 sm:$0xff]   ;;  %v5219_v25 = vld [vmem:[%s6321_s2 + $0x18c] ss:$16 sps:$4 sm:$0xff]  }
 0x3d8   : > { %6815 = vst [vmem:[#allocation55_spill] sm:$0xff] %v5213_v29  ;;  %6816 = vst [vmem:[#allocation56_spill] sm:$0xff] %v5219_v25 }
 0x3da   : > { %1769 = vmatpush1.bf16.msra.mxu0 %v5201_v27  ;;  %1810 = vmatpush1.bf16.msra.mxu1 %v5207_v28  ;;  %v5225_v27 = vld [vmem:[%s6321_s2 + $0x180] ss:$16 sps:$4 sm:$0xff]   ;;  %v5231_v28 = vld [vmem:[%s6321_s2 + $0x188] ss:$16 sps:$4 sm:$0xff]  }
 0x3db   : > { %1770 = vmatprep.subr.bf16.mxu0 %v5213_v29  ;;  %1811 = vmatprep.subr.bf16.mxu1 %v5219_v25  ;;  %6817 = vst [vmem:[#allocation57_spill] sm:$0xff] %v5225_v27  ;;  %6818 = vst [vmem:[#allocation58_spill] sm:$0xff] %v5231_v28  ;;  %v5237_v29 = vld [vmem:[%s6321_s2 + $0x1a4] ss:$16 sps:$4 sm:$0xff]   ;;  %v5243_v25 = vld [vmem:[%s6321_s2 + $0x1ac] ss:$16 sps:$4 sm:$0xff]  }
 0x3dc   : > { %6819 = vst [vmem:[#allocation59_spill] sm:$0xff] %v5237_v29  ;;  %6820 = vst [vmem:[#allocation60_spill] sm:$0xff] %v5243_v25 }
 0x3de   : > { %1771 = vmatpush1.bf16.msra.mxu0 %v5225_v27  ;;  %1812 = vmatpush1.bf16.msra.mxu1 %v5231_v28  ;;  %v5249_v27 = vld [vmem:[%s6321_s2 + $0x1a0] ss:$16 sps:$4 sm:$0xff]   ;;  %v5255_v28 = vld [vmem:[%s6321_s2 + $0x1a8] ss:$16 sps:$4 sm:$0xff]  }
 0x3df   : > { %1772 = vmatprep.subr.bf16.mxu0 %v5237_v29  ;;  %1813 = vmatprep.subr.bf16.mxu1 %v5243_v25  ;;  %6821 = vst [vmem:[#allocation61_spill] sm:$0xff] %v5249_v27  ;;  %6822 = vst [vmem:[#allocation62_spill] sm:$0xff] %v5255_v28  ;;  %v5261_v29 = vld [vmem:[%s6321_s2 + $0x1c4] ss:$16 sps:$4 sm:$0xff]   ;;  %v5267_v25 = vld [vmem:[%s6321_s2 + $0x1cc] ss:$16 sps:$4 sm:$0xff]  }
 0x3e0   : > { %6823 = vst [vmem:[#allocation15_spill] sm:$0xff] %v5261_v29  ;;  %6824 = vst [vmem:[#allocation63_spill] sm:$0xff] %v5267_v25 }
 0x3e2   : > { %1773 = vmatpush1.bf16.msra.mxu0 %v5249_v27  ;;  %1814 = vmatpush1.bf16.msra.mxu1 %v5255_v28  ;;  %v5273_v27 = vld [vmem:[%s6321_s2 + $0x1c0] ss:$16 sps:$4 sm:$0xff]   ;;  %v5279_v28 = vld [vmem:[%s6321_s2 + $0x1c8] ss:$16 sps:$4 sm:$0xff]  }
 0x3e3   : > { %1774 = vmatprep.subr.bf16.mxu0 %v5261_v29  ;;  %1815 = vmatprep.subr.bf16.mxu1 %v5267_v25  ;;  %6825 = vst [vmem:[#allocation64_spill] sm:$0xff] %v5273_v27  ;;  %6826 = vst [vmem:[#allocation65_spill] sm:$0xff] %v5279_v28  ;;  %v5285_v29 = vld [vmem:[%s6321_s2 + $0x1e4] ss:$16 sps:$4 sm:$0xff]   ;;  %v5291_v25 = vld [vmem:[%s6321_s2 + $0x1ec] ss:$16 sps:$4 sm:$0xff]  }
 0x3e4   : > { %6827 = vst [vmem:[#allocation66_spill] sm:$0xff] %v5285_v29  ;;  %6828 = vst [vmem:[#allocation67_spill] sm:$0xff] %v5291_v25 }
 0x3e6   : > { %1775 = vmatpush1.bf16.msra.mxu0 %v5273_v27  ;;  %1816 = vmatpush1.bf16.msra.mxu1 %v5279_v28  ;;  %v5297_v27 = vld [vmem:[%s6321_s2 + $0x1e0] ss:$16 sps:$4 sm:$0xff]   ;;  %v5303_v28 = vld [vmem:[%s6321_s2 + $0x1e8] ss:$16 sps:$4 sm:$0xff]  }
 0x3e7   : > { %1776 = vmatprep.subr.bf16.mxu0 %v5285_v29  ;;  %1817 = vmatprep.subr.bf16.mxu1 %v5291_v25  ;;  %6829 = vst [vmem:[#allocation68_spill] sm:$0xff] %v5297_v27  ;;  %6830 = vst [vmem:[#allocation69_spill] sm:$0xff] %v5303_v28 }
 0x3ea   : > { %1777 = vmatpush1.bf16.msra.mxu0 %v5297_v27  ;;  %1818 = vmatpush1.bf16.msra.mxu1 %v5303_v28 }
 0x3eb   : > { %1865 = vmatprep.subr.bf16.mxu0 %v4816_v18  ;;  %1906 = vmatprep.subr.bf16.mxu1 %v4822_v19 }
 0x460   : > { %v1525_v29 = vpop.f32.mrb[20].mxu0  ;;  %v1566_v25 = vpop.f32.mrb[20].mxu1 }
 0x461   : > { %v1526_v31 = vadd.f32 %v1525_v29, %v6771_v7  ;;  %v1527_v53 = vpop.f32.mrb[21].mxu0  ;;  %v1568_v20 = vpop.f32.mrb[21].mxu1  ;;  %v1567_v28 = vadd.f32 %v1566_v25, %v6774_v39 }
 0x462   : > { %v1528_v17 = vadd.f32 %v1527_v53, %v6772_v26  ;;  %v1529_v27 = vpop.f32.mrb[22].mxu0  ;;  %v1570_v16 = vpop.f32.mrb[22].mxu1  ;;  %v1569_v18 = vadd.f32 %v1568_v20, %v6773_v36 }
 0x463   : > { %v3106_v15 = vmul.f32 -1.442695, %v1526_v31  ;;  %v1530_v14 = vpop.f32.mrb[23].mxu0  ;;  %v1571_v13 = vpop.f32.mrb[23].mxu1 }
 0x464   : > { %v3107_v12 = vmul.f32 -1.442695, %v1528_v17  ;;  %v3108_v19 = vmul.f32 -1.442695, %v1569_v18  ;;  %v1604_v17 = vld [vmem:[%s3894_s28] sm:$0x88] }
 0x465   : > { %3405 = vpow2.f32 %v3106_v15  ;;  %v1606_v20 = vunpack.c.l.bf16 %v1604_v17 }
 0x466   : > { %3407 = vpow2.f32 %v3107_v12 }
 0x467   : > { %3409 = vpow2.f32 %v3108_v19  ;;  %v1607_v19 = vunpack.c.h.bf16 %v1604_v17 }
 0x468   : > { %3411 = vtanh.f32 %v1567_v28 }
 0x46f   : > { %v3406_v10 = vpop.eup %3405 }
 0x470   : > { %v3408_v29 = vpop.eup %3407  ;;  %v1576_v7 = vadd.f32 1.0, %v3406_v10 }
 0x471   : > { %v1582_v53 = vadd.f32 1.0, %v3408_v29  ;;  %v3410_v16 = vpop.eup %3409 }
 0x472   : > { %3413 = vrcp.f32 %v1576_v7  ;;  %v3412_v14 = vpop.eup %3411  ;;  %v1589_v12 = vadd.f32 1.0, %v3410_v16  ;;  %v1605_v16 = vld [vmem:[%s3894_s28 + $0x8] sm:$0x88] }
 0x473   : > { %3415 = vrcp.f32 %v1582_v53 }
 0x474   : > { %3417 = vrcp.f32 %v1589_v12 }
 0x47c   : > { %v3414_v13 = vpop.eup %3413 }
 0x47d   : > { %v3416_v15 = vpop.eup %3415  ;;  %v1593_v31 = vmul.f32 %v3414_v13, %v3412_v14 }
 0x47e   : > { %v1592_v18 = vmul.f32 %v3416_v15, %v4831_v11  ;;  %v3418_v12 = vpop.eup %3417 }
 0x480   : > { %v5314_v25 = vadd.f32 %v1593_v31, %v1592_v18  ;;  %v1644_v27 = vpop.f32.mrb[24].mxu0  ;;  %v1685_v10 = vpop.f32.mrb[24].mxu1  ;;  %v1609_v18 = vunpack.c.h.bf16 %v1605_v16 }
 0x481   : > { %v1696_v28 = vrot.slane %v1644_v27, 2  ;;  %v1646_v7 = vpop.f32.mrb[25].mxu0  ;;  %v1687_v29 = vpop.f32.mrb[25].mxu1  ;;  %v1608_v27 = vunpack.c.l.bf16 %v1605_v16 }
 0x482   : > { %6831 = vst [vmem:[#allocation70_spill] sm:$0xff] %v5314_v25  ;;  %v1697_v53 = vrot.slane %v1646_v7, 2  ;;  %v1648_v39 = vpop.f32.mrb[26].mxu0  ;;  %v1689_v36 = vpop.f32.mrb[26].mxu1  ;;  %3419 = vtanh.f32 %v5314_v25  ;;  %v1699_v9 = vrot.slane %v1687_v29, 2  ;;  %v1698_v7 = vrot.slane %v1685_v10, 2 }
 0x483   : > { %v1704_v14 = vadd.f32 %v1696_v28, %v1606_v20  ;;  %v1649_v13 = vpop.f32.mrb[27].mxu0  ;;  %v1690_v26 = vpop.f32.mrb[27].mxu1 }
 0x484   : > { %v1705_v11 = vadd.f32 %v1697_v53, %v1607_v19  ;;  %v1707_v17 = vadd.f32 %v1699_v9, %v1609_v18  ;;  %v1706_v25 = vadd.f32 %v1698_v7, %v1608_v27 }
 0x485   : > { %v3110_v15 = vmul.f32 -1.442695, %v1704_v14 }
 0x486   : > { %v3111_v31 = vmul.f32 -1.442695, %v1705_v11  ;;  %v3112_v8 = vmul.f32 -1.442695, %v1707_v17 }
 0x487   : > { %3421 = vpow2.f32 %v3110_v15  ;;  %v1728_v15 = vrot.slane %v4837_v3, 6  ;;  %v6852_v3 = vld [vmem:[#allocation36_spill] sm:$0xff] }
 0x488   : > { %3423 = vpow2.f32 %v3111_v31 }
 0x489   : > { %3425 = vpow2.f32 %v3112_v8 }
 0x48a   : > { %3427 = vtanh.f32 %v1706_v25 }
 0x48c   : > { %v3420_v39 = vpop.eup %3419 }
 0x48d   : > { %v1596_v36 = vmul.f32 %v3420_v39, %v3418_v12 }
 0x48f   : > { %v3152_v20 = vpack.c.bf16 %v1596_v36, %v1596_v36  ;;  %v1736_v28 = vrot.slane %v1596_v36, 2 }
 0x491   : > { %v3422_v13 = vpop.eup %3421  ;;  %v1601_v26 = vrot.slane %v3152_v20, 6  ;;  %v1739_v19 = vpack.c.bf16 %v1736_v28, %v1736_v28  ;;  %v6853_v20 = vld [vmem:[#allocation37_spill] sm:$0xff]  ;;  %v6854_v28 = vld [vmem:[#allocation38_spill] sm:$0xff] }
 0x492   : > { %v3424_v53 = vpop.eup %3423  ;;  %v1711_v14 = vadd.f32 1.0, %v3422_v13  ;;  %v6855_v13 = vld [vmem:[#allocation39_spill] sm:$0xff] }
 0x493   : > { %v1717_v29 = vadd.f32 1.0, %v3424_v53  ;;  %1603 = vst [vmem:[%s3899_s7] sm:$0x4] %v1601_v26  ;;  %v1743_v9 = vrot.slane %v1739_v19, 3  ;;  %v3426_v10 = vpop.eup %3425  ;;  %v6856_v26 = vld [vmem:[#allocation40_spill] sm:$0xff]  ;;  %v6857_v19 = vld [vmem:[#allocation41_spill] sm:$0xff]  ;;  %v6858_v53 = vld [vmem:[#allocation42_spill] sm:$0xff] }
 0x494   : > { %3429 = vrcp.f32 %v1711_v14  ;;  %v3428_v16 = vpop.eup %3427  ;;  %v1724_v17 = vadd.f32 1.0, %v3426_v10  ;;  %v6859_v14 = vld [vmem:[#allocation43_spill] sm:$0xff]  ;;  %v6862_v10 = vld [vmem:[#allocation46_spill] sm:$0xff] }
 0x495   : > { %3431 = vrcp.f32 %v1717_v29  ;;  %1778 = vmatprep.mubr.bf16.mxu0 %v1743_v9  ;;  %1819 = vmatprep.mubr.bf16.mxu1 %v1743_v9  ;;  %v6860_v29 = vld [vmem:[#allocation44_spill] sm:$0xff]  ;;  %v6861_v9 = vld [vmem:[#allocation45_spill] sm:$0xff] }
 0x496   : > { %3433 = vrcp.f32 %v1724_v17  ;;  %v6868_v17 = vld [vmem:[#allocation52_spill] sm:$0xff] }
 0x49e   : > { %v3430_v11 = vpop.eup %3429 }
 0x49f   : > { %v3432_v31 = vpop.eup %3431  ;;  %v1731_v18 = vmul.f32 %v3430_v11, %v3428_v16  ;;  %v6863_v16 = vld [vmem:[#allocation47_spill] sm:$0xff]  ;;  %v6864_v11 = vld [vmem:[#allocation48_spill] sm:$0xff] }
 0x4a0   : > { %v1730_v12 = vmul.f32 %v3432_v31, %v1728_v15  ;;  %v3434_v8 = vpop.eup %3433  ;;  %v6865_v15 = vld [vmem:[#allocation49_spill] sm:$0xff]  ;;  %v6866_v31 = vld [vmem:[#allocation50_spill] sm:$0xff] }
 0x4a2   : > { %v5320_v27 = vadd.f32 %v1731_v18, %v1730_v12  ;;  %v6867_v18 = vld [vmem:[#allocation51_spill] sm:$0xff]  ;;  %v6869_v12 = vld [vmem:[#allocation53_spill] sm:$0xff] }
 0x4a4   : > { %3435 = vtanh.f32 %v5320_v27 }
 0x4ae   : > { %v3436_v25 = vpop.eup %3435 }
 0x4af   : > { %v1734_v7 = vmul.f32 %v3436_v25, %v3434_v8  ;;  %v6870_v8 = vld [vmem:[#allocation54_spill] sm:$0xff]  ;;  %v6871_v25 = vld [vmem:[#allocation55_spill] sm:$0xff] }
 0x4b1   : > { %v1738_v39 = vpack.c.bf16 %v1734_v7, %v1734_v7  ;;  %v6872_v7 = vld [vmem:[#allocation56_spill] sm:$0xff] }
 0x4b3   : > { %v1742_v36 = vrot.slane %v1738_v39, 3  ;;  %v6873_v39 = vld [vmem:[#allocation57_spill] sm:$0xff] }
 0x4b5   : > { %1779 = vmatmul.mubr.bf16.vlgmr.msra.gmra.mrb[28].mxu0 %v1742_v36  ;;  %1820 = vmatmul.mubr.bf16.vlgmr.msra.gmra.mrb[28].mxu1 %v1742_v36 }
 0x4b6   : > { %1866 = vmatpush1.bf16.msra.mxu0 %v4620_v48  ;;  %1907 = vmatpush1.bf16.msra.mxu1 %v4626_v22  ;;  %v6832_v48 = vld [vmem:[#allocation18_spill] sm:$0xff]  ;;  %v6833_v22 = vld [vmem:[#allocation19_spill] sm:$0xff] }
 0x4b7   : > { %1867 = vmatprep.subr.bf16.mxu0 %v4632_v55  ;;  %1908 = vmatprep.subr.bf16.mxu1 %v4638_v52  ;;  %v6834_v55 = vld [vmem:[#allocation20_spill] sm:$0xff]  ;;  %v6835_v52 = vld [vmem:[#allocation21_spill] sm:$0xff] }
 0x4b8   : > { %1897 = vmatprep.mubr.bf16.mxu0 %v6674_v61  ;;  %1938 = vmatprep.mubr.bf16.mxu1 %v6674_v61 }
 0x4ba   : > { %1868 = vmatpush1.bf16.msra.mxu0 %v4646_v62  ;;  %1909 = vmatpush1.bf16.msra.mxu1 %v4652_v57  ;;  %v6836_v62 = vld [vmem:[#allocation22_spill] sm:$0xff]  ;;  %v6837_v57 = vld [vmem:[#allocation23_spill] sm:$0xff] }
 0x4bb   : > { %1869 = vmatprep.subr.bf16.mxu0 %v4658_v23  ;;  %1910 = vmatprep.subr.bf16.mxu1 %v4664_v0  ;;  %v6838_v23 = vld [vmem:[#allocation24_spill] sm:$0xff]  ;;  %v6839_v0 = vld [vmem:[#allocation25_spill] sm:$0xff] }
 0x4be   : > { %1870 = vmatpush1.bf16.msra.mxu0 %v4670_v58  ;;  %1911 = vmatpush1.bf16.msra.mxu1 %v4676_v54  ;;  %v6840_v58 = vld [vmem:[#allocation26_spill] sm:$0xff]  ;;  %v6841_v54 = vld [vmem:[#allocation27_spill] sm:$0xff] }
 0x4bf   : > { %1871 = vmatprep.subr.bf16.mxu0 %v4682_v46  ;;  %1912 = vmatprep.subr.bf16.mxu1 %v4688_v50  ;;  %v6842_v46 = vld [vmem:[#allocation9_spill] sm:$0xff]  ;;  %v6843_v50 = vld [vmem:[#allocation10_spill] sm:$0xff] }
 0x4c2   : > { %1872 = vmatpush1.bf16.msra.mxu0 %v4694_v63  ;;  %1913 = vmatpush1.bf16.msra.mxu1 %v4700_v35  ;;  %v6844_v63 = vld [vmem:[#allocation28_spill] sm:$0xff]  ;;  %v6845_v35 = vld [vmem:[#allocation29_spill] sm:$0xff] }
 0x4c3   : > { %1873 = vmatprep.subr.bf16.mxu0 %v4706_v56  ;;  %1914 = vmatprep.subr.bf16.mxu1 %v4712_v51  ;;  %v6846_v56 = vld [vmem:[#allocation30_spill] sm:$0xff]  ;;  %v6847_v51 = vld [vmem:[#allocation31_spill] sm:$0xff] }
 0x4c6   : > { %1874 = vmatpush1.bf16.msra.mxu0 %v4718_v60  ;;  %1915 = vmatpush1.bf16.msra.mxu1 %v4862_v1  ;;  %v6848_v60 = vld [vmem:[#allocation32_spill] sm:$0xff] }
 0x4c7   : > { %1875 = vmatprep.subr.bf16.mxu0 %v4725_v59  ;;  %1916 = vmatprep.subr.bf16.mxu1 %v4869_v30  ;;  %v6849_v59 = vld [vmem:[#allocation33_spill] sm:$0xff] }
 0x4ca   : > { %1876 = vmatpush1.bf16.msra.mxu0 %v4732_v21  ;;  %1917 = vmatpush1.bf16.msra.mxu1 %v4876_v32  ;;  %v6850_v21 = vld [vmem:[#allocation34_spill] sm:$0xff] }
 0x4cb   : > { %1877 = vmatprep.subr.bf16.mxu0 %v4739_v24  ;;  %1918 = vmatprep.subr.bf16.mxu1 %v4883_v33  ;;  %v6851_v24 = vld [vmem:[#allocation35_spill] sm:$0xff] }
 0x4ce   : > { %1878 = vmatpush1.bf16.msra.mxu0 %v4889_v34  ;;  %1919 = vmatpush1.bf16.msra.mxu1 %v4895_v37 }
 0x4cf   : > { %1879 = vmatprep.subr.bf16.mxu0 %v4901_v38  ;;  %1920 = vmatprep.subr.bf16.mxu1 %v4907_v40 }
 0x4d2   : > { %1880 = vmatpush1.bf16.msra.mxu0 %v4913_v41  ;;  %1921 = vmatpush1.bf16.msra.mxu1 %v4919_v42 }
 0x4d3   : > { %1979 = vmatprep.subr.bf16.mxu0 %v4925_v43  ;;  %2020 = vmatprep.subr.bf16.mxu1 %v4931_v44 }
 0x4d5   : > { %1898 = vmatmul.mubr.bf16.vlgmr.msra.gmra.mrb[32].mxu0 %v1742_v36  ;;  %1939 = vmatmul.mubr.bf16.vlgmr.msra.gmra.mrb[32].mxu1 %v1742_v36  ;;  %v6874_v36 = vld [vmem:[#allocation58_spill] sm:$0xff] }
 0x4d6   : > { %1980 = vmatpush1.bf16.msra.mxu0 %v4937_v45  ;;  %2021 = vmatpush1.bf16.msra.mxu1 %v4943_v47 }
 0x4d7   : > { %1981 = vmatprep.subr.bf16.mxu0 %v4949_v49  ;;  %2022 = vmatprep.subr.bf16.mxu1 %v4955_v2 }
 0x4da   : > { %1982 = vmatpush1.bf16.msra.mxu0 %v4961_v4  ;;  %2023 = vmatpush1.bf16.msra.mxu1 %v4967_v5 }
 0x4db   : > { %1983 = vmatprep.subr.bf16.mxu0 %v4973_v6  ;;  %2024 = vmatprep.subr.bf16.mxu1 %v6832_v48 }
 0x4de   : > { %1984 = vmatpush1.bf16.msra.mxu0 %v6833_v22  ;;  %2025 = vmatpush1.bf16.msra.mxu1 %v6834_v55 }
 0x4df   : > { %1985 = vmatprep.subr.bf16.mxu0 %v6835_v52  ;;  %2026 = vmatprep.subr.bf16.mxu1 %v6836_v62 }
 0x4e2   : > { %1986 = vmatpush1.bf16.msra.mxu0 %v6837_v57  ;;  %2027 = vmatpush1.bf16.msra.mxu1 %v6838_v23 }
 0x4e3   : > { %1987 = vmatprep.subr.bf16.mxu0 %v6839_v0  ;;  %2028 = vmatprep.subr.bf16.mxu1 %v6840_v58 }
 0x4e6   : > { %1988 = vmatpush1.bf16.msra.mxu0 %v6841_v54  ;;  %2029 = vmatpush1.bf16.msra.mxu1 %v6842_v46 }
 0x4e7   : > { %1989 = vmatprep.subr.bf16.mxu0 %v6843_v50  ;;  %2030 = vmatprep.subr.bf16.mxu1 %v6844_v63 }
 0x4ea   : > { %1990 = vmatpush1.bf16.msra.mxu0 %v6845_v35  ;;  %2031 = vmatpush1.bf16.msra.mxu1 %v6846_v56 }
 0x4eb   : > { %1991 = vmatprep.subr.bf16.mxu0 %v6847_v51  ;;  %2032 = vmatprep.subr.bf16.mxu1 %v6848_v60 }
 0x4ee   : > { %1992 = vmatpush1.bf16.msra.mxu0 %v6849_v59  ;;  %2033 = vmatpush1.bf16.msra.mxu1 %v6850_v21 }
 0x4ef   : > { %1993 = vmatprep.subr.bf16.mxu0 %v6851_v24  ;;  %2034 = vmatprep.subr.bf16.mxu1 %v6852_v3 }
 0x4f2   : > { %1994 = vmatpush1.bf16.msra.mxu0 %v6853_v20  ;;  %2035 = vmatpush1.bf16.msra.mxu1 %v6854_v28 }
 0x4f3   : > { %1995 = vmatprep.subr.bf16.mxu0 %v6855_v13  ;;  %2036 = vmatprep.subr.bf16.mxu1 %v6856_v26 }
 0x4f6   : > { %1996 = vmatpush1.bf16.msra.mxu0 %v6857_v19  ;;  %2037 = vmatpush1.bf16.msra.mxu1 %v6858_v53  ;;  %v6892_v19 = vld [vmem:[#allocation14_spill] sm:$0xff] }
 0x4f7   : > { %1997 = vmatprep.subr.bf16.mxu0 %v6859_v14  ;;  %2038 = vmatprep.subr.bf16.mxu1 %v6860_v29 }
 0x4fa   : > { %1998 = vmatpush1.bf16.msra.mxu0 %v6861_v9  ;;  %2039 = vmatpush1.bf16.msra.mxu1 %v6862_v10  ;;  %v6890_v9 = vld [vmem:[#allocation13_spill] sm:$0xff] }
 0x4fb   : > { %1999 = vmatprep.subr.bf16.mxu0 %v6863_v16  ;;  %2040 = vmatprep.subr.bf16.mxu1 %v6864_v11  ;;  %v6875_v11 = vld [vmem:[#allocation59_spill] sm:$0xff] }
 0x4fc   : > { %v6889_v16 = vld [vmem:[#allocation11_spill] sm:$0xff] }
 0x4fe   : > { %2000 = vmatpush1.bf16.msra.mxu0 %v6865_v15  ;;  %2041 = vmatpush1.bf16.msra.mxu1 %v6866_v31  ;;  %v6876_v15 = vld [vmem:[#allocation60_spill] sm:$0xff]  ;;  %v6877_v31 = vld [vmem:[#allocation61_spill] sm:$0xff] }
 0x4ff   : > { %2001 = vmatprep.subr.bf16.mxu0 %v6867_v18  ;;  %2042 = vmatprep.subr.bf16.mxu1 %v6868_v17  ;;  %v6878_v18 = vld [vmem:[#allocation62_spill] sm:$0xff]  ;;  %v6879_v17 = vld [vmem:[#allocation15_spill] sm:$0xff] }
 0x502   : > { %2002 = vmatpush1.bf16.msra.mxu0 %v6869_v12  ;;  %2043 = vmatpush1.bf16.msra.mxu1 %v6870_v8  ;;  %v6880_v12 = vld [vmem:[#allocation63_spill] sm:$0xff]  ;;  %v6881_v8 = vld [vmem:[#allocation64_spill] sm:$0xff] }
 0x503   : > { %2003 = vmatprep.subr.bf16.mxu0 %v6871_v25  ;;  %2044 = vmatprep.subr.bf16.mxu1 %v6872_v7  ;;  %v6882_v25 = vld [vmem:[#allocation65_spill] sm:$0xff]  ;;  %v6883_v7 = vld [vmem:[#allocation66_spill] sm:$0xff] }
 0x506   : > { %2004 = vmatpush1.bf16.msra.mxu0 %v6873_v39  ;;  %2045 = vmatpush1.bf16.msra.mxu1 %v6874_v36  ;;  %v6884_v39 = vld [vmem:[#allocation67_spill] sm:$0xff]  ;;  %v6885_v36 = vld [vmem:[#allocation68_spill] sm:$0xff] }
 0x507   : > { %2005 = vmatprep.subr.bf16.mxu0 %v6875_v11  ;;  %2046 = vmatprep.subr.bf16.mxu1 %v6876_v15  ;;  %v6886_v11 = vld [vmem:[#allocation69_spill] sm:$0xff]  ;;  %v6887_v15 = vld [vmem:[#allocation16_spill] sm:$0xff] }
 0x50a   : > { %2006 = vmatpush1.bf16.msra.mxu0 %v6877_v31  ;;  %2047 = vmatpush1.bf16.msra.mxu1 %v6878_v18  ;;  %v6888_v31 = vld [vmem:[#allocation17_spill] sm:$0xff] }
 0x50b   : > { %2007 = vmatprep.subr.bf16.mxu0 %v6879_v17  ;;  %2048 = vmatprep.subr.bf16.mxu1 %v6880_v12 }
 0x50e   : > { %2008 = vmatpush1.bf16.msra.mxu0 %v6881_v8  ;;  %2049 = vmatpush1.bf16.msra.mxu1 %v6882_v25 }
 0x50f   : > { %2009 = vmatprep.subr.bf16.mxu0 %v6883_v7  ;;  %2050 = vmatprep.subr.bf16.mxu1 %v6884_v39 }
 0x512   : > { %2010 = vmatpush1.bf16.msra.mxu0 %v6885_v36  ;;  %2051 = vmatpush1.bf16.msra.mxu1 %v6886_v11 }
 0x513   : > { %2093 = vmatprep.subr.bf16.mxu0 %v6887_v15  ;;  %2134 = vmatprep.subr.bf16.mxu1 %v6888_v31  ;;  %v6891_v15 = vld [vmem:[#allocation12_spill] sm:$0xff] }
 0x588   : > { %v1780_v18 = vpop.f32.mrb[28].mxu0  ;;  %v1821_v17 = vpop.f32.mrb[28].mxu1 }
 0x589   : > { %v1781_v12 = vadd.f32 %v1780_v18, %v6889_v16  ;;  %v1782_v10 = vpop.f32.mrb[29].mxu0  ;;  %v1823_v8 = vpop.f32.mrb[29].mxu1  ;;  %v1822_v26 = vadd.f32 %v1821_v17, %v6892_v19 }
 0x58a   : > { %v1783_v25 = vadd.f32 %v1782_v10, %v6890_v9  ;;  %v1784_v29 = vpop.f32.mrb[30].mxu0  ;;  %v1825_v7 = vpop.f32.mrb[30].mxu1  ;;  %v1824_v11 = vadd.f32 %v1823_v8, %v6891_v15 }
 0x58b   : > { %v3113_v14 = vmul.f32 -1.442695, %v1781_v12  ;;  %v1785_v39 = vpop.f32.mrb[31].mxu0  ;;  %v1826_v53 = vpop.f32.mrb[31].mxu1 }
 0x58c   : > { %v3114_v36 = vmul.f32 -1.442695, %v1783_v25  ;;  %v3115_v31 = vmul.f32 -1.442695, %v1824_v11  ;;  %v1859_v53 = vld [vmem:[%s3894_s28 + $0x10] sm:$0x11] }
 0x58d   : > { %3437 = vpow2.f32 %v3113_v14  ;;  %v1861_v8 = vunpack.c.l.bf16 %v1859_v53  ;;  %v6893_v11 = vld [vmem:[#allocation70_spill] sm:$0xff]  ;;  %v1862_v17 = vunpack.c.h.bf16 %v1859_v53 }
 0x58e   : > { %3439 = vpow2.f32 %v3114_v36 }
 0x58f   : > { %3441 = vpow2.f32 %v3115_v31 }
 0x590   : > { %3443 = vtanh.f32 %v1822_v26 }
 0x597   : > { %v3438_v13 = vpop.eup %3437 }
 0x598   : > { %v3440_v18 = vpop.eup %3439  ;;  %v1831_v16 = vadd.f32 1.0, %v3438_v13 }
 0x599   : > { %v1837_v10 = vadd.f32 1.0, %v3440_v18  ;;  %v3442_v29 = vpop.eup %3441 }
 0x59a   : > { %3445 = vrcp.f32 %v1831_v16  ;;  %v3444_v12 = vpop.eup %3443  ;;  %v1844_v39 = vadd.f32 1.0, %v3442_v29  ;;  %v1860_v16 = vld [vmem:[%s3894_s28 + $0x18] sm:$0x11] }
 0x59b   : > { %3447 = vrcp.f32 %v1837_v10 }
 0x59c   : > { %3449 = vrcp.f32 %v1844_v39 }
 0x5a4   : > { %v3446_v25 = vpop.eup %3445 }
 0x5a5   : > { %v3448_v14 = vpop.eup %3447  ;;  %v1848_v7 = vmul.f32 %v3446_v25, %v3444_v12 }
 0x5a6   : > { %v1847_v36 = vmul.f32 %v3448_v14, %v6893_v11  ;;  %v1864_v14 = vunpack.c.h.bf16 %v1860_v16  ;;  %v3450_v11 = vpop.eup %3449 }
 0x5a8   : > { %v1899_v19 = vpop.f32.mrb[32].mxu0  ;;  %v1940_v15 = vpop.f32.mrb[32].mxu1  ;;  %v5427_v13 = vadd.f32 %v1848_v7, %v1847_v36  ;;  %v1863_v7 = vunpack.c.l.bf16 %v1860_v16 }
 0x5a9   : > { %v1947_v26 = vadd.f32 %v1899_v19, %v1861_v8  ;;  %v1901_v31 = vpop.f32.mrb[33].mxu0  ;;  %v1942_v18 = vpop.f32.mrb[33].mxu1 }
 0x5aa   : > { %v1948_v10 = vadd.f32 %v1901_v31, %v1862_v17  ;;  %v1903_v9 = vpop.f32.mrb[34].mxu0  ;;  %v1944_v28 = vpop.f32.mrb[34].mxu1  ;;  %3451 = vtanh.f32 %v5427_v13  ;;  %v1950_v53 = vadd.f32 %v1942_v18, %v1864_v14  ;;  %v1949_v8 = vadd.f32 %v1940_v15, %v1863_v7 }
 0x5ab   : > { %v3117_v12 = vmul.f32 -1.442695, %v1947_v26  ;;  %v1904_v29 = vpop.f32.mrb[35].mxu0  ;;  %v1945_v25 = vpop.f32.mrb[35].mxu1 }
 0x5ac   : > { %v3118_v20 = vmul.f32 -1.442695, %v1948_v10  ;;  %v3119_v19 = vmul.f32 -1.442695, %v1950_v53  ;;  %v1971_v10 = vrot.slane %v5320_v27, 6 }
 0x5ad   : > { %3453 = vpow2.f32 %v3117_v12  ;;  %v5445_v27 = vld [vmem:[%s6320_s1 + $0x8] ss:$16 sps:$4 sm:$0xff]  }
 0x5ae   : > { %3455 = vpow2.f32 %v3118_v20 }
 0x5af   : > { %3457 = vpow2.f32 %v3119_v19 }
 0x5b0   : > { %3459 = vtanh.f32 %v1949_v8  ;;  %v5439_v8 = vld [vmem:[%s6320_s1] ss:$16 sps:$4 sm:$0xff]  }
 0x5b4   : > { %v3452_v39 = vpop.eup %3451 }
 0x5b5   : > { %v1851_v36 = vmul.f32 %v3452_v39, %v3450_v11 }
 0x5b7   : > { %v3454_v17 = vpop.eup %3453  ;;  %v1852_v9 = vpack.c.bf16 %v1851_v36, %v1851_v36  ;;  %v5451_v36 = vld [vmem:[%s6320_s1 + $0x24] ss:$16 sps:$4 sm:$0xff]  }
 0x5b8   : > { %v3456_v28 = vpop.eup %3455  ;;  %v1954_v31 = vadd.f32 1.0, %v3454_v17  ;;  %v5457_v17 = vld [vmem:[%s6320_s1 + $0x2c] ss:$16 sps:$4 sm:$0xff]  }
 0x5b9   : > { %v1960_v26 = vadd.f32 1.0, %v3456_v28  ;;  %v1856_v29 = vrot.slane %v1852_v9, 5  ;;  %2011 = vmatprep.mubr.bf16.mxu0 %v1852_v9  ;;  %2052 = vmatprep.mubr.bf16.mxu1 %v1852_v9  ;;  %v3458_v20 = vpop.eup %3457  ;;  %v5465_v9 = vld [vmem:[%s6320_s1 + $0x20] ss:$16 sps:$4 sm:$0xff]   ;;  %v5471_v28 = vld [vmem:[%s6320_s1 + $0x28] ss:$16 sps:$4 sm:$0xff]  }
 0x5ba   : > { %3461 = vrcp.f32 %v1954_v31  ;;  %v3460_v16 = vpop.eup %3459  ;;  %v1967_v25 = vadd.f32 1.0, %v3458_v20  ;;  %v5477_v31 = vld [vmem:[%s6320_s1 + $0x44] ss:$16 sps:$4 sm:$0xff]   ;;  %v5495_v20 = vld [vmem:[%s6320_s1 + $0x48] ss:$16 sps:$4 sm:$0xff]  }
 0x5bb   : > { %3463 = vrcp.f32 %v1960_v26  ;;  %1858 = vst [vmem:[%s3899_s7] sm:$0x8] %v1856_v29  ;;  %v5483_v26 = vld [vmem:[%s6320_s1 + $0x4c] ss:$16 sps:$4 sm:$0xff]   ;;  %v5489_v29 = vld [vmem:[%s6320_s1 + $0x40] ss:$16 sps:$4 sm:$0xff]  }
 0x5bc   : > { %3465 = vrcp.f32 %v1967_v25  ;;  %v5531_v25 = vld [vmem:[%s6320_s1 + $0x8c] ss:$16 sps:$4 sm:$0xff]  }
 0x5c4   : > { %v3462_v18 = vpop.eup %3461 }
 0x5c5   : > { %v3464_v15 = vpop.eup %3463  ;;  %v1974_v12 = vmul.f32 %v3462_v18, %v3460_v16  ;;  %v5501_v16 = vld [vmem:[%s6320_s1 + $0x64] ss:$16 sps:$4 sm:$0xff]   ;;  %v5507_v18 = vld [vmem:[%s6320_s1 + $0x6c] ss:$16 sps:$4 sm:$0xff]  }
 0x5c6   : > { %v1973_v14 = vmul.f32 %v3464_v15, %v1971_v10  ;;  %v3466_v7 = vpop.eup %3465  ;;  %v5513_v10 = vld [vmem:[%s6320_s1 + $0x60] ss:$16 sps:$4 sm:$0xff]   ;;  %v5519_v15 = vld [vmem:[%s6320_s1 + $0x68] ss:$16 sps:$4 sm:$0xff]  }
 0x5c8   : > { %v5433_v53 = vadd.f32 %v1974_v12, %v1973_v14  ;;  %v5525_v12 = vld [vmem:[%s6320_s1 + $0x84] ss:$16 sps:$4 sm:$0xff]   ;;  %v5537_v14 = vld [vmem:[%s6320_s1 + $0x80] ss:$16 sps:$4 sm:$0xff]  }
 0x5ca   : > { %3467 = vtanh.f32 %v5433_v53 }
 0x5d4   : > { %v3468_v11 = vpop.eup %3467 }
 0x5d5   : > { %v1977_v39 = vmul.f32 %v3468_v11, %v3466_v7  ;;  %v5544_v7 = vld [vmem:[%s6320_s1 + $0xa4] ss:$16 sps:$4 sm:$0xff]   ;;  %v5551_v11 = vld [vmem:[%s6320_s1 + $0xa0] ss:$16 sps:$4 sm:$0xff]  }
 0x5d7   : > { %v1978_v19 = vpack.c.bf16 %v1977_v39, %v1977_v39 }
 0x5d9   : > { %2012 = vmatmul.mubr.bf16.vlgmr.msra.gmra.mrb[36].mxu0 %v1978_v19  ;;  %2053 = vmatmul.mubr.bf16.vlgmr.msra.gmra.mrb[36].mxu1 %v1978_v19 }
 0x5da   : > { %2094 = vmatpush1.bf16.msra.mxu0 %v5439_v8  ;;  %2135 = vmatpush1.bf16.msra.mxu1 %v5445_v27 }
 0x5db   : > { %2095 = vmatprep.subr.bf16.mxu0 %v5451_v36  ;;  %2136 = vmatprep.subr.bf16.mxu1 %v5457_v17 }
 0x5dc   : > { %2125 = vmatprep.mubr.bf16.mxu0 %v6674_v61  ;;  %2166 = vmatprep.mubr.bf16.mxu1 %v6674_v61 }
 0x5de   : > { %2096 = vmatpush1.bf16.msra.mxu0 %v5465_v9  ;;  %2137 = vmatpush1.bf16.msra.mxu1 %v5471_v28 }
 0x5df   : > { %2097 = vmatprep.subr.bf16.mxu0 %v5477_v31  ;;  %2138 = vmatprep.subr.bf16.mxu1 %v5483_v26 }
 0x5e2   : > { %2098 = vmatpush1.bf16.msra.mxu0 %v5489_v29  ;;  %2139 = vmatpush1.bf16.msra.mxu1 %v5495_v20 }
 0x5e3   : > { %2099 = vmatprep.subr.bf16.mxu0 %v5501_v16  ;;  %2140 = vmatprep.subr.bf16.mxu1 %v5507_v18 }
 0x5e6   : > { %2100 = vmatpush1.bf16.msra.mxu0 %v5513_v10  ;;  %2141 = vmatpush1.bf16.msra.mxu1 %v5519_v15 }
 0x5e7   : > { %2101 = vmatprep.subr.bf16.mxu0 %v5525_v12  ;;  %2142 = vmatprep.subr.bf16.mxu1 %v5531_v25 }
 0x5ea   : > { %2102 = vmatpush1.bf16.msra.mxu0 %v5537_v14  ;;  %2143 = vmatpush1.bf16.msra.mxu1 %v4862_v1  ;;  %v5558_v1 = vld [vmem:[%s6320_s1 + $0xc4] ss:$16 sps:$4 sm:$0xff]  }
 0x5eb   : > { %2103 = vmatprep.subr.bf16.mxu0 %v5544_v7  ;;  %2144 = vmatprep.subr.bf16.mxu1 %v4869_v30  ;;  %v6894_v30 = vld [vmem:[#allocation37_spill] sm:$0xff] }
 0x5ee   : > { %2104 = vmatpush1.bf16.msra.mxu0 %v5551_v11  ;;  %2145 = vmatpush1.bf16.msra.mxu1 %v4876_v32  ;;  %v6895_v32 = vld [vmem:[#allocation38_spill] sm:$0xff] }
 0x5ef   : > { %2105 = vmatprep.subr.bf16.mxu0 %v5558_v1  ;;  %2146 = vmatprep.subr.bf16.mxu1 %v4883_v33  ;;  %v6896_v33 = vld [vmem:[#allocation39_spill] sm:$0xff] }
 0x5f2   : > { %2106 = vmatpush1.bf16.msra.mxu0 %v4889_v34  ;;  %2147 = vmatpush1.bf16.msra.mxu1 %v4895_v37  ;;  %v6897_v34 = vld [vmem:[#allocation40_spill] sm:$0xff]  ;;  %v6898_v37 = vld [vmem:[#allocation41_spill] sm:$0xff] }
 0x5f3   : > { %2107 = vmatprep.subr.bf16.mxu0 %v4901_v38  ;;  %2148 = vmatprep.subr.bf16.mxu1 %v4907_v40  ;;  %v6899_v38 = vld [vmem:[#allocation42_spill] sm:$0xff]  ;;  %v6900_v40 = vld [vmem:[#allocation43_spill] sm:$0xff] }
 0x5f6   : > { %2108 = vmatpush1.bf16.msra.mxu0 %v4913_v41  ;;  %2149 = vmatpush1.bf16.msra.mxu1 %v4919_v42  ;;  %v6901_v41 = vld [vmem:[#allocation44_spill] sm:$0xff]  ;;  %v6902_v42 = vld [vmem:[#allocation45_spill] sm:$0xff] }
 0x5f7   : > { %2229 = vmatprep.subr.bf16.mxu0 %v4925_v43  ;;  %2270 = vmatprep.subr.bf16.mxu1 %v4931_v44  ;;  %v6903_v43 = vld [vmem:[#allocation46_spill] sm:$0xff]  ;;  %v6904_v44 = vld [vmem:[#allocation47_spill] sm:$0xff] }
 0x5f9   : > { %2126 = vmatmul.mubr.bf16.vlgmr.msra.gmra.mrb[40].mxu0 %v1978_v19  ;;  %2167 = vmatmul.mubr.bf16.vlgmr.msra.gmra.mrb[40].mxu1 %v1978_v19 }
 0x5fa   : > { %2230 = vmatpush1.bf16.msra.mxu0 %v4937_v45  ;;  %2271 = vmatpush1.bf16.msra.mxu1 %v4943_v47  ;;  %v6905_v45 = vld [vmem:[#allocation48_spill] sm:$0xff]  ;;  %v6906_v47 = vld [vmem:[#allocation49_spill] sm:$0xff] }
 0x5fb   : > { %2231 = vmatprep.subr.bf16.mxu0 %v4949_v49  ;;  %2272 = vmatprep.subr.bf16.mxu1 %v4955_v2  ;;  %v6907_v49 = vld [vmem:[#allocation50_spill] sm:$0xff]  ;;  %v6908_v2 = vld [vmem:[#allocation51_spill] sm:$0xff] }
 0x5fe   : > { %2232 = vmatpush1.bf16.msra.mxu0 %v4961_v4  ;;  %2273 = vmatpush1.bf16.msra.mxu1 %v4967_v5  ;;  %v6909_v4 = vld [vmem:[#allocation52_spill] sm:$0xff]  ;;  %v6910_v5 = vld [vmem:[#allocation53_spill] sm:$0xff] }
 0x5ff   : > { %2233 = vmatprep.subr.bf16.mxu0 %v4973_v6  ;;  %2274 = vmatprep.subr.bf16.mxu1 %v6832_v48  ;;  %v6911_v6 = vld [vmem:[#allocation54_spill] sm:$0xff]  ;;  %v6912_v48 = vld [vmem:[#allocation55_spill] sm:$0xff] }
 0x602   : > { %2234 = vmatpush1.bf16.msra.mxu0 %v6833_v22  ;;  %2275 = vmatpush1.bf16.msra.mxu1 %v6834_v55  ;;  %v6913_v22 = vld [vmem:[#allocation56_spill] sm:$0xff]  ;;  %v6914_v55 = vld [vmem:[#allocation57_spill] sm:$0xff] }
 0x603   : > { %2235 = vmatprep.subr.bf16.mxu0 %v6835_v52  ;;  %2276 = vmatprep.subr.bf16.mxu1 %v6836_v62  ;;  %v6915_v52 = vld [vmem:[#allocation58_spill] sm:$0xff]  ;;  %v6916_v62 = vld [vmem:[#allocation59_spill] sm:$0xff] }
 0x606   : > { %2236 = vmatpush1.bf16.msra.mxu0 %v6837_v57  ;;  %2277 = vmatpush1.bf16.msra.mxu1 %v6838_v23  ;;  %v6917_v57 = vld [vmem:[#allocation60_spill] sm:$0xff]  ;;  %v6918_v23 = vld [vmem:[#allocation61_spill] sm:$0xff] }
 0x607   : > { %2237 = vmatprep.subr.bf16.mxu0 %v6839_v0  ;;  %2278 = vmatprep.subr.bf16.mxu1 %v6840_v58  ;;  %v6919_v0 = vld [vmem:[#allocation62_spill] sm:$0xff]  ;;  %v6920_v58 = vld [vmem:[#allocation15_spill] sm:$0xff] }
 0x60a   : > { %2238 = vmatpush1.bf16.msra.mxu0 %v6841_v54  ;;  %2279 = vmatpush1.bf16.msra.mxu1 %v6842_v46  ;;  %v6921_v54 = vld [vmem:[#allocation63_spill] sm:$0xff]  ;;  %v6922_v46 = vld [vmem:[#allocation64_spill] sm:$0xff] }
 0x60b   : > { %2239 = vmatprep.subr.bf16.mxu0 %v6843_v50  ;;  %2280 = vmatprep.subr.bf16.mxu1 %v6844_v63  ;;  %v6923_v50 = vld [vmem:[#allocation65_spill] sm:$0xff]  ;;  %v6924_v63 = vld [vmem:[#allocation66_spill] sm:$0xff] }
 0x60e   : > { %2240 = vmatpush1.bf16.msra.mxu0 %v6845_v35  ;;  %2281 = vmatpush1.bf16.msra.mxu1 %v6846_v56  ;;  %v6925_v35 = vld [vmem:[#allocation67_spill] sm:$0xff]  ;;  %v6926_v56 = vld [vmem:[#allocation68_spill] sm:$0xff] }
 0x60f   : > { %2241 = vmatprep.subr.bf16.mxu0 %v6847_v51  ;;  %2282 = vmatprep.subr.bf16.mxu1 %v6848_v60  ;;  %v6927_v51 = vld [vmem:[#allocation69_spill] sm:$0xff] }
 0x610   : > { %v5635_v60 = vld [vmem:[%s6320_s1 + $0x4] ss:$16 sps:$4 sm:$0xff]  }
 0x612   : > { %2242 = vmatpush1.bf16.msra.mxu0 %v6849_v59  ;;  %2283 = vmatpush1.bf16.msra.mxu1 %v6850_v21  ;;  %v5641_v59 = vld [vmem:[%s6320_s1 + $0xc] ss:$16 sps:$4 sm:$0xff]  }
 0x613   : > { %2243 = vmatprep.subr.bf16.mxu0 %v6851_v24  ;;  %2284 = vmatprep.subr.bf16.mxu1 %v6852_v3  ;;  %v6928_v3 = vld [vmem:[#allocation11_spill] sm:$0xff] }
 0x616   : > { %2244 = vmatpush1.bf16.msra.mxu0 %v6894_v30  ;;  %2285 = vmatpush1.bf16.msra.mxu1 %v6895_v32  ;;  %v6929_v32 = vld [vmem:[#allocation13_spill] sm:$0xff] }
 0x617   : > { %2245 = vmatprep.subr.bf16.mxu0 %v6896_v33  ;;  %2286 = vmatprep.subr.bf16.mxu1 %v6897_v34 }
 0x61a   : > { %2246 = vmatpush1.bf16.msra.mxu0 %v6898_v37  ;;  %2287 = vmatpush1.bf16.msra.mxu1 %v6899_v38 }
 0x61b   : > { %2247 = vmatprep.subr.bf16.mxu0 %v6900_v40  ;;  %2288 = vmatprep.subr.bf16.mxu1 %v6901_v41 }
 0x61e   : > { %2248 = vmatpush1.bf16.msra.mxu0 %v6902_v42  ;;  %2289 = vmatpush1.bf16.msra.mxu1 %v6903_v43  ;;  %v6930_v43 = vld [vmem:[#allocation12_spill] sm:$0xff] }
 0x61f   : > { %2249 = vmatprep.subr.bf16.mxu0 %v6904_v44  ;;  %2290 = vmatprep.subr.bf16.mxu1 %v6905_v45 }
 0x622   : > { %2250 = vmatpush1.bf16.msra.mxu0 %v6906_v47  ;;  %2291 = vmatpush1.bf16.msra.mxu1 %v6907_v49  ;;  %v6931_v47 = vld [vmem:[#allocation14_spill] sm:$0xff] }
 0x623   : > { %2251 = vmatprep.subr.bf16.mxu0 %v6908_v2  ;;  %2292 = vmatprep.subr.bf16.mxu1 %v6909_v4 }
 0x626   : > { %2252 = vmatpush1.bf16.msra.mxu0 %v6910_v5  ;;  %2293 = vmatpush1.bf16.msra.mxu1 %v6911_v6 }
 0x627   : > { %2253 = vmatprep.subr.bf16.mxu0 %v6912_v48  ;;  %2294 = vmatprep.subr.bf16.mxu1 %v6913_v22 }
 0x62a   : > { %2254 = vmatpush1.bf16.msra.mxu0 %v6914_v55  ;;  %2295 = vmatpush1.bf16.msra.mxu1 %v6915_v52  ;;  %v2087_v52 = vld [vmem:[%s3894_s28 + $0x10] sm:$0x22] }
 0x62b   : > { %2255 = vmatprep.subr.bf16.mxu0 %v6916_v62  ;;  %2296 = vmatprep.subr.bf16.mxu1 %v6917_v57 }
 0x62e   : > { %2256 = vmatpush1.bf16.msra.mxu0 %v6918_v23  ;;  %2297 = vmatpush1.bf16.msra.mxu1 %v6919_v0 }
 0x62f   : > { %2257 = vmatprep.subr.bf16.mxu0 %v6920_v58  ;;  %2298 = vmatprep.subr.bf16.mxu1 %v6921_v54  ;;  %v2089_v58 = vunpack.c.l.bf16 %v2087_v52 }
 0x632   : > { %2258 = vmatpush1.bf16.msra.mxu0 %v6922_v46  ;;  %2299 = vmatpush1.bf16.msra.mxu1 %v6923_v50 }
 0x633   : > { %2259 = vmatprep.subr.bf16.mxu0 %v6924_v63  ;;  %2300 = vmatprep.subr.bf16.mxu1 %v6925_v35  ;;  %v2090_v63 = vunpack.c.h.bf16 %v2087_v52 }
 0x636   : > { %2260 = vmatpush1.bf16.msra.mxu0 %v6926_v56  ;;  %2301 = vmatpush1.bf16.msra.mxu1 %v6927_v51 }
 0x637   : > { %2348 = vmatprep.subr.bf16.mxu0 %v5635_v60  ;;  %2389 = vmatprep.subr.bf16.mxu1 %v5641_v59 }
 0x6ac   : > { %v2013_v21 = vpop.f32.mrb[36].mxu0  ;;  %v2054_v24 = vpop.f32.mrb[36].mxu1 }
 0x6ad   : > { %v2014_v39 = vadd.f32 %v2013_v21, %v6928_v3  ;;  %v2015_v19 = vpop.f32.mrb[37].mxu0  ;;  %v2056_v30 = vpop.f32.mrb[37].mxu1  ;;  %v2055_v49 = vadd.f32 %v2054_v24, %v6931_v47 }
 0x6ae   : > { %v2016_v33 = vadd.f32 %v2015_v19, %v6929_v32  ;;  %v2017_v34 = vpop.f32.mrb[38].mxu0  ;;  %v2058_v37 = vpop.f32.mrb[38].mxu1  ;;  %v2057_v44 = vadd.f32 %v2056_v30, %v6930_v43  ;;  %v2088_v30 = vld [vmem:[%s3894_s28 + $0x18] sm:$0x22] }
 0x6af   : > { %v3120_v38 = vmul.f32 -1.442695, %v2014_v39  ;;  %v2018_v40 = vpop.f32.mrb[39].mxu0  ;;  %v2059_v41 = vpop.f32.mrb[39].mxu1 }
 0x6b0   : > { %v3121_v42 = vmul.f32 -1.442695, %v2016_v33  ;;  %v3122_v45 = vmul.f32 -1.442695, %v2057_v44  ;;  %v2092_v40 = vunpack.c.h.bf16 %v2088_v30 }
 0x6b1   : > { %3469 = vpow2.f32 %v3120_v38 }
 0x6b2   : > { %3471 = vpow2.f32 %v3121_v42 }
 0x6b3   : > { %3473 = vpow2.f32 %v3122_v45  ;;  %v2091_v45 = vunpack.c.l.bf16 %v2088_v30 }
 0x6b4   : > { %3475 = vtanh.f32 %v2055_v49 }
 0x6bb   : > { %v3470_v2 = vpop.eup %3469 }
 0x6bc   : > { %v3472_v4 = vpop.eup %3471  ;;  %v2064_v5 = vadd.f32 1.0, %v3470_v2 }
 0x6bd   : > { %v2070_v6 = vadd.f32 1.0, %v3472_v4  ;;  %v3474_v48 = vpop.eup %3473 }
 0x6be   : > { %3477 = vrcp.f32 %v2064_v5  ;;  %v3476_v22 = vpop.eup %3475  ;;  %v2077_v23 = vadd.f32 1.0, %v3474_v48 }
 0x6bf   : > { %3479 = vrcp.f32 %v2070_v6 }
 0x6c0   : > { %3481 = vrcp.f32 %v2077_v23 }
 0x6c8   : > { %v3478_v55 = vpop.eup %3477 }
 0x6c9   : > { %v3480_v62 = vpop.eup %3479  ;;  %v2081_v57 = vmul.f32 %v3478_v55, %v3476_v22 }
 0x6ca   : > { %v2080_v0 = vmul.f32 %v3480_v62, %v5427_v13  ;;  %v3482_v44 = vpop.eup %3481 }
 0x6cc   : > { %v5650_v54 = vadd.f32 %v2081_v57, %v2080_v0  ;;  %v2127_v46 = vpop.f32.mrb[40].mxu0  ;;  %v2168_v50 = vpop.f32.mrb[40].mxu1 }
 0x6cd   : > { %v2179_v35 = vrot.slane %v2127_v46, 6  ;;  %v2129_v56 = vpop.f32.mrb[41].mxu0  ;;  %v2170_v51 = vpop.f32.mrb[41].mxu1  ;;  %v2181_v49 = vrot.slane %v2168_v50, 6 }
 0x6ce   : > { %v2180_v21 = vrot.slane %v2129_v56, 6  ;;  %v2131_v24 = vpop.f32.mrb[42].mxu0  ;;  %v2172_v39 = vpop.f32.mrb[42].mxu1  ;;  %3483 = vtanh.f32 %v5650_v54  ;;  %v2182_v41 = vrot.slane %v2170_v51, 6 }
 0x6cf   : > { %v2187_v19 = vadd.f32 %v2179_v35, %v2089_v58  ;;  %v2132_v33 = vpop.f32.mrb[43].mxu0  ;;  %v2173_v34 = vpop.f32.mrb[43].mxu1  ;;  %v2189_v6 = vadd.f32 %v2181_v49, %v2091_v45  ;;  %v5732_v45 = vld [vmem:[%s6320_s1 + $0xe0] ss:$16 sps:$4 sm:$0xff]   ;;  %v5738_v49 = vld [vmem:[%s6320_s1 + $0xe8] ss:$16 sps:$4 sm:$0xff]  }
 0x6d0   : > { %v2188_v13 = vadd.f32 %v2180_v21, %v2090_v63  ;;  %v2190_v42 = vadd.f32 %v2182_v41, %v2092_v40  ;;  %v2211_v63 = vrot.slane %v5433_v53, 6  ;;  %v5681_v53 = vld [vmem:[%s6320_s1 + $0x88] ss:$16 sps:$4 sm:$0xff]   ;;  %v5708_v40 = vld [vmem:[%s6320_s1 + $0xc0] ss:$16 sps:$4 sm:$0xff]  }
 0x6d1   : > { %v3123_v37 = vmul.f32 -1.442695, %v2187_v19  ;;  %v5714_v41 = vld [vmem:[%s6320_s1 + $0xc8] ss:$16 sps:$4 sm:$0xff]  }
 0x6d2   : > { %v3124_v38 = vmul.f32 -1.442695, %v2188_v13  ;;  %v3125_v5 = vmul.f32 -1.442695, %v2190_v42  ;;  %v5688_v13 = vld [vmem:[%s6320_s1 + $0xac] ss:$16 sps:$4 sm:$0xff]  }
 0x6d3   : > { %3485 = vpow2.f32 %v3123_v37  ;;  %v5695_v37 = vld [vmem:[%s6320_s1 + $0xa8] ss:$16 sps:$4 sm:$0xff]   ;;  %v5720_v42 = vld [vmem:[%s6320_s1 + $0xe4] ss:$16 sps:$4 sm:$0xff]  }
 0x6d4   : > { %3487 = vpow2.f32 %v3124_v38  ;;  %v5702_v38 = vld [vmem:[%s6320_s1 + $0xcc] ss:$16 sps:$4 sm:$0xff]  }
 0x6d5   : > { %3489 = vpow2.f32 %v3125_v5  ;;  %v5756_v5 = vld [vmem:[%s6321_s2] ss:$16 sps:$4 sm:$0xff]  }
 0x6d6   : > { %3491 = vtanh.f32 %v2189_v6  ;;  %v5762_v6 = vld [vmem:[%s6321_s2 + $0x8] ss:$16 sps:$4 sm:$0xff]  }
 0x6d8   : > { %v3484_v2 = vpop.eup %3483 }
 0x6d9   : > { %v2084_v4 = vmul.f32 %v3484_v2, %v3482_v44  ;;  %v5726_v44 = vld [vmem:[%s6320_s1 + $0xec] ss:$16 sps:$4 sm:$0xff]   ;;  %v5744_v2 = vld [vmem:[%s6321_s2 + $0x4] ss:$16 sps:$4 sm:$0xff]  }
 0x6db   : > { %v2085_v48 = vpack.c.bf16 %v2084_v4, %v2084_v4  ;;  %v2219_v22 = vrot.slane %v2084_v4, 6  ;;  %v5750_v4 = vld [vmem:[%s6321_s2 + $0xc] ss:$16 sps:$4 sm:$0xff]  }
 0x6dd   : > { %v3486_v55 = vpop.eup %3485  ;;  %2086 = vst [vmem:[%s3899_s7 + $0x4] sm:$0x1] %v2085_v48  ;;  %v2222_v52 = vpack.c.bf16 %v2219_v22, %v2219_v22  ;;  %v5768_v48 = vld [vmem:[%s6321_s2 + $0x24] ss:$16 sps:$4 sm:$0xff]   ;;  %v5774_v22 = vld [vmem:[%s6321_s2 + $0x2c] ss:$16 sps:$4 sm:$0xff]  }
 0x6de   : > { %v3488_v62 = vpop.eup %3487  ;;  %v2194_v57 = vadd.f32 1.0, %v3486_v55  ;;  %v5780_v55 = vld [vmem:[%s6321_s2 + $0x20] ss:$16 sps:$4 sm:$0xff]  }
 0x6df   : > { %v2200_v23 = vadd.f32 1.0, %v3488_v62  ;;  %v2226_v0 = vrot.slane %v2222_v52, 1  ;;  %v3490_v58 = vpop.eup %3489  ;;  %v5786_v52 = vld [vmem:[%s6321_s2 + $0x28] ss:$16 sps:$4 sm:$0xff]   ;;  %v5792_v62 = vld [vmem:[%s6321_s2 + $0x44] ss:$16 sps:$4 sm:$0xff]  }
 0x6e0   : > { %3493 = vrcp.f32 %v2194_v57  ;;  %v3492_v46 = vpop.eup %3491  ;;  %v2207_v51 = vadd.f32 1.0, %v3490_v58  ;;  %v5798_v57 = vld [vmem:[%s6321_s2 + $0x4c] ss:$16 sps:$4 sm:$0xff]   ;;  %v5816_v58 = vld [vmem:[%s6321_s2 + $0x64] ss:$16 sps:$4 sm:$0xff]  }
 0x6e1   : > { %3495 = vrcp.f32 %v2200_v23  ;;  %2261 = vmatprep.mubr.bf16.mxu0 %v2226_v0  ;;  %2302 = vmatprep.mubr.bf16.mxu1 %v2226_v0  ;;  %6932 = vst [vmem:[#allocation18_spill] sm:$0xff] %v5798_v57  ;;  %v5804_v23 = vld [vmem:[%s6321_s2 + $0x40] ss:$16 sps:$4 sm:$0xff]   ;;  %v5810_v0 = vld [vmem:[%s6321_s2 + $0x48] ss:$16 sps:$4 sm:$0xff]   ;;  %6935 = vst [vmem:[#allocation21_spill] sm:$0xff] %v5816_v58 }
 0x6e2   : > { %3497 = vrcp.f32 %v2207_v51  ;;  %6933 = vst [vmem:[#allocation19_spill] sm:$0xff] %v5804_v23  ;;  %6934 = vst [vmem:[#allocation20_spill] sm:$0xff] %v5810_v0  ;;  %v5852_v51 = vld [vmem:[%s6321_s2 + $0x80] ss:$16 sps:$4 sm:$0xff]  }
 0x6e3   : > { %6941 = vst [vmem:[#allocation27_spill] sm:$0xff] %v5852_v51 }
 0x6ea   : > { %v3494_v50 = vpop.eup %3493 }
 0x6eb   : > { %v3496_v35 = vpop.eup %3495  ;;  %v2214_v56 = vmul.f32 %v3494_v50, %v3492_v46  ;;  %v5822_v46 = vld [vmem:[%s6321_s2 + $0x6c] ss:$16 sps:$4 sm:$0xff]   ;;  %v5828_v50 = vld [vmem:[%s6321_s2 + $0x60] ss:$16 sps:$4 sm:$0xff]  }
 0x6ec   : > { %v2213_v21 = vmul.f32 %v3496_v35, %v2211_v63  ;;  %v3498_v39 = vpop.eup %3497  ;;  %6936 = vst [vmem:[#allocation22_spill] sm:$0xff] %v5822_v46  ;;  %6937 = vst [vmem:[#allocation23_spill] sm:$0xff] %v5828_v50  ;;  %v5834_v63 = vld [vmem:[%s6321_s2 + $0x68] ss:$16 sps:$4 sm:$0xff]   ;;  %v5840_v35 = vld [vmem:[%s6321_s2 + $0x84] ss:$16 sps:$4 sm:$0xff]  }
 0x6ed   : > { %6938 = vst [vmem:[#allocation24_spill] sm:$0xff] %v5834_v63  ;;  %6939 = vst [vmem:[#allocation25_spill] sm:$0xff] %v5840_v35 }
 0x6ee   : > { %v5656_v24 = vadd.f32 %v2214_v56, %v2213_v21  ;;  %v5846_v56 = vld [vmem:[%s6321_s2 + $0x8c] ss:$16 sps:$4 sm:$0xff]   ;;  %v5858_v21 = vld [vmem:[%s6321_s2 + $0x88] ss:$16 sps:$4 sm:$0xff]  }
 0x6ef   : > { %6940 = vst [vmem:[#allocation26_spill] sm:$0xff] %v5846_v56  ;;  %6942 = vst [vmem:[#allocation9_spill] sm:$0xff] %v5858_v21 }
 0x6f0   : > { %3499 = vtanh.f32 %v5656_v24 }
 0x6fa   : > { %v3500_v19 = vpop.eup %3499 }
 0x6fb   : > { %v2217_v30 = vmul.f32 %v3500_v19, %v3498_v39  ;;  %v5864_v39 = vld [vmem:[%s6321_s2 + $0xa4] ss:$16 sps:$4 sm:$0xff]   ;;  %v5870_v19 = vld [vmem:[%s6321_s2 + $0xac] ss:$16 sps:$4 sm:$0xff]  }
 0x6fc   : > { %6943 = vst [vmem:[#allocation10_spill] sm:$0xff] %v5864_v39  ;;  %6944 = vst [vmem:[#allocation28_spill] sm:$0xff] %v5870_v19 }
 0x6fd   : > { %v2221_v33 = vpack.c.bf16 %v2217_v30, %v2217_v30  ;;  %v5876_v30 = vld [vmem:[%s6321_s2 + $0xa0] ss:$16 sps:$4 sm:$0xff]  }
 0x6fe   : > { %6945 = vst [vmem:[#allocation29_spill] sm:$0xff] %v5876_v30 }
 0x6ff   : > { %v2225_v34 = vrot.slane %v2221_v33, 1  ;;  %v5882_v33 = vld [vmem:[%s6321_s2 + $0xa8] ss:$16 sps:$4 sm:$0xff]  }
 0x700   : > { %6946 = vst [vmem:[#allocation30_spill] sm:$0xff] %v5882_v33 }
 0x701   : > { %2262 = vmatmul.mubr.bf16.vlgmr.msra.gmra.mrb[44].mxu0 %v2225_v34  ;;  %2303 = vmatmul.mubr.bf16.vlgmr.msra.gmra.mrb[44].mxu1 %v2225_v34 }
 0x702   : > { %2349 = vmatpush1.bf16.msra.mxu0 %v5439_v8  ;;  %2390 = vmatpush1.bf16.msra.mxu1 %v5445_v27 }
 0x703   : > { %2350 = vmatprep.subr.bf16.mxu0 %v5451_v36  ;;  %2391 = vmatprep.subr.bf16.mxu1 %v5457_v17 }
 0x704   : > { %2380 = vmatprep.mubr.bf16.mxu0 %v6674_v61  ;;  %2421 = vmatprep.mubr.bf16.mxu1 %v6674_v61 }
 0x706   : > { %2351 = vmatpush1.bf16.msra.mxu0 %v5465_v9  ;;  %2392 = vmatpush1.bf16.msra.mxu1 %v5471_v28 }
 0x707   : > { %2352 = vmatprep.subr.bf16.mxu0 %v5477_v31  ;;  %2393 = vmatprep.subr.bf16.mxu1 %v5483_v26 }
 0x70a   : > { %2353 = vmatpush1.bf16.msra.mxu0 %v5489_v29  ;;  %2394 = vmatpush1.bf16.msra.mxu1 %v5495_v20 }
 0x70b   : > { %2354 = vmatprep.subr.bf16.mxu0 %v5501_v16  ;;  %2395 = vmatprep.subr.bf16.mxu1 %v5507_v18 }
 0x70e   : > { %2355 = vmatpush1.bf16.msra.mxu0 %v5513_v10  ;;  %2396 = vmatpush1.bf16.msra.mxu1 %v5519_v15 }
 0x70f   : > { %2356 = vmatprep.subr.bf16.mxu0 %v5525_v12  ;;  %2397 = vmatprep.subr.bf16.mxu1 %v5531_v25 }
 0x712   : > { %2357 = vmatpush1.bf16.msra.mxu0 %v5537_v14  ;;  %2398 = vmatpush1.bf16.msra.mxu1 %v5681_v53 }
 0x713   : > { %2358 = vmatprep.subr.bf16.mxu0 %v5544_v7  ;;  %2399 = vmatprep.subr.bf16.mxu1 %v5688_v13 }
 0x716   : > { %2359 = vmatpush1.bf16.msra.mxu0 %v5551_v11  ;;  %2400 = vmatpush1.bf16.msra.mxu1 %v5695_v37 }
 0x717   : > { %2360 = vmatprep.subr.bf16.mxu0 %v5558_v1  ;;  %2401 = vmatprep.subr.bf16.mxu1 %v5702_v38 }
 0x71a   : > { %2361 = vmatpush1.bf16.msra.mxu0 %v5708_v40  ;;  %2402 = vmatpush1.bf16.msra.mxu1 %v5714_v41 }
 0x71b   : > { %2362 = vmatprep.subr.bf16.mxu0 %v5720_v42  ;;  %2403 = vmatprep.subr.bf16.mxu1 %v5726_v44 }
 0x71e   : > { %2363 = vmatpush1.bf16.msra.mxu0 %v5732_v45  ;;  %2404 = vmatpush1.bf16.msra.mxu1 %v5738_v49 }
 0x71f   : > { %2484 = vmatprep.subr.bf16.mxu0 %v5744_v2  ;;  %2525 = vmatprep.subr.bf16.mxu1 %v5750_v4 }
 0x721   : > { %2381 = vmatmul.mubr.bf16.vlgmr.msra.gmra.mrb[48].mxu0 %v2225_v34  ;;  %2422 = vmatmul.mubr.bf16.vlgmr.msra.gmra.mrb[48].mxu1 %v2225_v34  ;;  %v5888_v34 = vld [vmem:[%s6321_s2 + $0xc4] ss:$16 sps:$4 sm:$0xff]  }
 0x722   : > { %2485 = vmatpush1.bf16.msra.mxu0 %v5756_v5  ;;  %2526 = vmatpush1.bf16.msra.mxu1 %v5762_v6  ;;  %6947 = vst [vmem:[#allocation31_spill] sm:$0xff] %v5888_v34 }
 0x723   : > { %2486 = vmatprep.subr.bf16.mxu0 %v5768_v48  ;;  %2527 = vmatprep.subr.bf16.mxu1 %v5774_v22 }
 0x726   : > { %2487 = vmatpush1.bf16.msra.mxu0 %v5780_v55  ;;  %2528 = vmatpush1.bf16.msra.mxu1 %v5786_v52 }
 0x727   : > { %2488 = vmatprep.subr.bf16.mxu0 %v5792_v62  ;;  %2529 = vmatprep.subr.bf16.mxu1 %v5798_v57 }
 0x72a   : > { %2489 = vmatpush1.bf16.msra.mxu0 %v5804_v23  ;;  %2530 = vmatpush1.bf16.msra.mxu1 %v5810_v0 }
 0x72b   : > { %2490 = vmatprep.subr.bf16.mxu0 %v5816_v58  ;;  %2531 = vmatprep.subr.bf16.mxu1 %v5822_v46 }
 0x72e   : > { %2491 = vmatpush1.bf16.msra.mxu0 %v5828_v50  ;;  %2532 = vmatpush1.bf16.msra.mxu1 %v5834_v63 }
 0x72f   : > { %2492 = vmatprep.subr.bf16.mxu0 %v5840_v35  ;;  %2533 = vmatprep.subr.bf16.mxu1 %v5846_v56 }
 0x732   : > { %2493 = vmatpush1.bf16.msra.mxu0 %v5852_v51  ;;  %2534 = vmatpush1.bf16.msra.mxu1 %v5858_v21 }
 0x733   : > { %2494 = vmatprep.subr.bf16.mxu0 %v5864_v39  ;;  %2535 = vmatprep.subr.bf16.mxu1 %v5870_v19  ;;  %v5894_v19 = vld [vmem:[%s6321_s2 + $0xcc] ss:$16 sps:$4 sm:$0xff]  }
 0x734   : > { %6948 = vst [vmem:[#allocation32_spill] sm:$0xff] %v5894_v19 }
 0x736   : > { %2495 = vmatpush1.bf16.msra.mxu0 %v5876_v30  ;;  %2536 = vmatpush1.bf16.msra.mxu1 %v5882_v33  ;;  %v5900_v30 = vld [vmem:[%s6321_s2 + $0xc0] ss:$16 sps:$4 sm:$0xff]   ;;  %v5906_v33 = vld [vmem:[%s6321_s2 + $0xc8] ss:$16 sps:$4 sm:$0xff]  }
 0x737   : > { %2496 = vmatprep.subr.bf16.mxu0 %v5888_v34  ;;  %2537 = vmatprep.subr.bf16.mxu1 %v5894_v19  ;;  %6949 = vst [vmem:[#allocation33_spill] sm:$0xff] %v5900_v30  ;;  %6950 = vst [vmem:[#allocation34_spill] sm:$0xff] %v5906_v33  ;;  %v5912_v34 = vld [vmem:[%s6321_s2 + $0xe4] ss:$16 sps:$4 sm:$0xff]   ;;  %v5918_v19 = vld [vmem:[%s6321_s2 + $0xec] ss:$16 sps:$4 sm:$0xff]  }
 0x738   : > { %6951 = vst [vmem:[#allocation35_spill] sm:$0xff] %v5912_v34  ;;  %6952 = vst [vmem:[#allocation36_spill] sm:$0xff] %v5918_v19 }
 0x73a   : > { %2497 = vmatpush1.bf16.msra.mxu0 %v5900_v30  ;;  %2538 = vmatpush1.bf16.msra.mxu1 %v5906_v33  ;;  %v5924_v30 = vld [vmem:[%s6321_s2 + $0xe0] ss:$16 sps:$4 sm:$0xff]   ;;  %v5930_v33 = vld [vmem:[%s6321_s2 + $0xe8] ss:$16 sps:$4 sm:$0xff]  }
 0x73b   : > { %2498 = vmatprep.subr.bf16.mxu0 %v5912_v34  ;;  %2539 = vmatprep.subr.bf16.mxu1 %v5918_v19  ;;  %6953 = vst [vmem:[#allocation16_spill] sm:$0xff] %v5924_v30  ;;  %6954 = vst [vmem:[#allocation17_spill] sm:$0xff] %v5930_v33  ;;  %v5936_v34 = vld [vmem:[%s6321_s2 + $0x104] ss:$16 sps:$4 sm:$0xff]   ;;  %v5942_v19 = vld [vmem:[%s6321_s2 + $0x10c] ss:$16 sps:$4 sm:$0xff]  }
 0x73c   : > { %6955 = vst [vmem:[#allocation70_spill] sm:$0xff] %v5936_v34  ;;  %6956 = vst [vmem:[#allocation37_spill] sm:$0xff] %v5942_v19 }
 0x73e   : > { %2499 = vmatpush1.bf16.msra.mxu0 %v5924_v30  ;;  %2540 = vmatpush1.bf16.msra.mxu1 %v5930_v33  ;;  %v5948_v30 = vld [vmem:[%s6321_s2 + $0x100] ss:$16 sps:$4 sm:$0xff]   ;;  %v5954_v33 = vld [vmem:[%s6321_s2 + $0x108] ss:$16 sps:$4 sm:$0xff]  }
 0x73f   : > { %2500 = vmatprep.subr.bf16.mxu0 %v5936_v34  ;;  %2541 = vmatprep.subr.bf16.mxu1 %v5942_v19  ;;  %6957 = vst [vmem:[#allocation38_spill] sm:$0xff] %v5948_v30  ;;  %6958 = vst [vmem:[#allocation39_spill] sm:$0xff] %v5954_v33  ;;  %v5960_v34 = vld [vmem:[%s6321_s2 + $0x124] ss:$16 sps:$4 sm:$0xff]   ;;  %v5966_v19 = vld [vmem:[%s6321_s2 + $0x12c] ss:$16 sps:$4 sm:$0xff]  }
 0x740   : > { %6959 = vst [vmem:[#allocation40_spill] sm:$0xff] %v5960_v34  ;;  %6960 = vst [vmem:[#allocation41_spill] sm:$0xff] %v5966_v19 }
 0x742   : > { %2501 = vmatpush1.bf16.msra.mxu0 %v5948_v30  ;;  %2542 = vmatpush1.bf16.msra.mxu1 %v5954_v33  ;;  %v5972_v30 = vld [vmem:[%s6321_s2 + $0x120] ss:$16 sps:$4 sm:$0xff]   ;;  %v5978_v33 = vld [vmem:[%s6321_s2 + $0x128] ss:$16 sps:$4 sm:$0xff]  }
 0x743   : > { %2502 = vmatprep.subr.bf16.mxu0 %v5960_v34  ;;  %2543 = vmatprep.subr.bf16.mxu1 %v5966_v19  ;;  %6961 = vst [vmem:[#allocation42_spill] sm:$0xff] %v5972_v30  ;;  %6962 = vst [vmem:[#allocation43_spill] sm:$0xff] %v5978_v33  ;;  %v5984_v34 = vld [vmem:[%s6321_s2 + $0x144] ss:$16 sps:$4 sm:$0xff]   ;;  %v5990_v19 = vld [vmem:[%s6321_s2 + $0x14c] ss:$16 sps:$4 sm:$0xff]  }
 0x744   : > { %6963 = vst [vmem:[#allocation44_spill] sm:$0xff] %v5984_v34  ;;  %6964 = vst [vmem:[#allocation45_spill] sm:$0xff] %v5990_v19 }
 0x746   : > { %2503 = vmatpush1.bf16.msra.mxu0 %v5972_v30  ;;  %2544 = vmatpush1.bf16.msra.mxu1 %v5978_v33  ;;  %v5996_v30 = vld [vmem:[%s6321_s2 + $0x140] ss:$16 sps:$4 sm:$0xff]   ;;  %v6002_v33 = vld [vmem:[%s6321_s2 + $0x148] ss:$16 sps:$4 sm:$0xff]  }
 0x747   : > { %2504 = vmatprep.subr.bf16.mxu0 %v5984_v34  ;;  %2545 = vmatprep.subr.bf16.mxu1 %v5990_v19  ;;  %6965 = vst [vmem:[#allocation46_spill] sm:$0xff] %v5996_v30  ;;  %6966 = vst [vmem:[#allocation47_spill] sm:$0xff] %v6002_v33  ;;  %v6008_v34 = vld [vmem:[%s6321_s2 + $0x164] ss:$16 sps:$4 sm:$0xff]   ;;  %v6014_v19 = vld [vmem:[%s6321_s2 + $0x16c] ss:$16 sps:$4 sm:$0xff]  }
 0x748   : > { %6967 = vst [vmem:[#allocation48_spill] sm:$0xff] %v6008_v34  ;;  %6968 = vst [vmem:[#allocation49_spill] sm:$0xff] %v6014_v19 }
 0x74a   : > { %2505 = vmatpush1.bf16.msra.mxu0 %v5996_v30  ;;  %2546 = vmatpush1.bf16.msra.mxu1 %v6002_v33  ;;  %v6020_v30 = vld [vmem:[%s6321_s2 + $0x160] ss:$16 sps:$4 sm:$0xff]   ;;  %v6026_v33 = vld [vmem:[%s6321_s2 + $0x168] ss:$16 sps:$4 sm:$0xff]  }
 0x74b   : > { %2506 = vmatprep.subr.bf16.mxu0 %v6008_v34  ;;  %2547 = vmatprep.subr.bf16.mxu1 %v6014_v19  ;;  %6969 = vst [vmem:[#allocation50_spill] sm:$0xff] %v6020_v30  ;;  %6970 = vst [vmem:[#allocation51_spill] sm:$0xff] %v6026_v33  ;;  %v6032_v34 = vld [vmem:[%s6321_s2 + $0x184] ss:$16 sps:$4 sm:$0xff]   ;;  %v6038_v19 = vld [vmem:[%s6321_s2 + $0x18c] ss:$16 sps:$4 sm:$0xff]  }
 0x74c   : > { %6971 = vst [vmem:[#allocation52_spill] sm:$0xff] %v6032_v34  ;;  %6972 = vst [vmem:[#allocation53_spill] sm:$0xff] %v6038_v19 }
 0x74e   : > { %2507 = vmatpush1.bf16.msra.mxu0 %v6020_v30  ;;  %2548 = vmatpush1.bf16.msra.mxu1 %v6026_v33  ;;  %v6044_v30 = vld [vmem:[%s6321_s2 + $0x180] ss:$16 sps:$4 sm:$0xff]   ;;  %v6050_v33 = vld [vmem:[%s6321_s2 + $0x188] ss:$16 sps:$4 sm:$0xff]  }
 0x74f   : > { %2508 = vmatprep.subr.bf16.mxu0 %v6032_v34  ;;  %2549 = vmatprep.subr.bf16.mxu1 %v6038_v19  ;;  %6973 = vst [vmem:[#allocation54_spill] sm:$0xff] %v6044_v30  ;;  %6974 = vst [vmem:[#allocation55_spill] sm:$0xff] %v6050_v33  ;;  %v6056_v34 = vld [vmem:[%s6321_s2 + $0x1a4] ss:$16 sps:$4 sm:$0xff]   ;;  %v6062_v19 = vld [vmem:[%s6321_s2 + $0x1ac] ss:$16 sps:$4 sm:$0xff]  }
 0x750   : > { %6975 = vst [vmem:[#allocation56_spill] sm:$0xff] %v6056_v34  ;;  %6976 = vst [vmem:[#allocation57_spill] sm:$0xff] %v6062_v19 }
 0x752   : > { %2509 = vmatpush1.bf16.msra.mxu0 %v6044_v30  ;;  %2550 = vmatpush1.bf16.msra.mxu1 %v6050_v33  ;;  %v6068_v30 = vld [vmem:[%s6321_s2 + $0x1a0] ss:$16 sps:$4 sm:$0xff]   ;;  %v6074_v33 = vld [vmem:[%s6321_s2 + $0x1a8] ss:$16 sps:$4 sm:$0xff]  }
 0x753   : > { %2510 = vmatprep.subr.bf16.mxu0 %v6056_v34  ;;  %2551 = vmatprep.subr.bf16.mxu1 %v6062_v19  ;;  %6977 = vst [vmem:[#allocation58_spill] sm:$0xff] %v6068_v30  ;;  %6978 = vst [vmem:[#allocation59_spill] sm:$0xff] %v6074_v33  ;;  %v6080_v34 = vld [vmem:[%s6321_s2 + $0x1c4] ss:$16 sps:$4 sm:$0xff]   ;;  %v6086_v19 = vld [vmem:[%s6321_s2 + $0x1cc] ss:$16 sps:$4 sm:$0xff]  }
 0x754   : > { %6979 = vst [vmem:[#allocation60_spill] sm:$0xff] %v6080_v34  ;;  %6980 = vst [vmem:[#allocation61_spill] sm:$0xff] %v6086_v19 }
 0x756   : > { %2511 = vmatpush1.bf16.msra.mxu0 %v6068_v30  ;;  %2552 = vmatpush1.bf16.msra.mxu1 %v6074_v33  ;;  %v6092_v30 = vld [vmem:[%s6321_s2 + $0x1c0] ss:$16 sps:$4 sm:$0xff]   ;;  %v6098_v33 = vld [vmem:[%s6321_s2 + $0x1c8] ss:$16 sps:$4 sm:$0xff]  }
 0x757   : > { %2512 = vmatprep.subr.bf16.mxu0 %v6080_v34  ;;  %2553 = vmatprep.subr.bf16.mxu1 %v6086_v19  ;;  %6981 = vst [vmem:[#allocation62_spill] sm:$0xff] %v6092_v30  ;;  %6982 = vst [vmem:[#allocation15_spill] sm:$0xff] %v6098_v33  ;;  %v6104_v34 = vld [vmem:[%s6321_s2 + $0x1e4] ss:$16 sps:$4 sm:$0xff]   ;;  %v6110_v19 = vld [vmem:[%s6321_s2 + $0x1ec] ss:$16 sps:$4 sm:$0xff]  }
 0x758   : > { %6983 = vst [vmem:[#allocation63_spill] sm:$0xff] %v6104_v34  ;;  %6984 = vst [vmem:[#allocation64_spill] sm:$0xff] %v6110_v19 }
 0x75a   : > { %2513 = vmatpush1.bf16.msra.mxu0 %v6092_v30  ;;  %2554 = vmatpush1.bf16.msra.mxu1 %v6098_v33  ;;  %v6116_v30 = vld [vmem:[%s6321_s2 + $0x1e0] ss:$16 sps:$4 sm:$0xff]   ;;  %v6122_v33 = vld [vmem:[%s6321_s2 + $0x1e8] ss:$16 sps:$4 sm:$0xff]  }
 0x75b   : > { %2514 = vmatprep.subr.bf16.mxu0 %v6104_v34  ;;  %2555 = vmatprep.subr.bf16.mxu1 %v6110_v19  ;;  %6985 = vst [vmem:[#allocation65_spill] sm:$0xff] %v6116_v30  ;;  %6986 = vst [vmem:[#allocation66_spill] sm:$0xff] %v6122_v33 }
 0x75e   : > { %2515 = vmatpush1.bf16.msra.mxu0 %v6116_v30  ;;  %2556 = vmatpush1.bf16.msra.mxu1 %v6122_v33 }
 0x75f   : > { %2603 = vmatprep.subr.bf16.mxu0 %v5635_v60  ;;  %2644 = vmatprep.subr.bf16.mxu1 %v5641_v59 }
 0x7d4   : > { %v2263_v34 = vpop.f32.mrb[44].mxu0  ;;  %v2304_v19 = vpop.f32.mrb[44].mxu1 }
 0x7d5   : > { %v2264_v39 = vadd.f32 %v2263_v34, %v6928_v3  ;;  %v2265_v21 = vpop.f32.mrb[45].mxu0  ;;  %v2306_v51 = vpop.f32.mrb[45].mxu1  ;;  %v2305_v33 = vadd.f32 %v2304_v19, %v6931_v47 }
 0x7d6   : > { %v2266_v56 = vadd.f32 %v2265_v21, %v6929_v32  ;;  %v2267_v30 = vpop.f32.mrb[46].mxu0  ;;  %v2308_v35 = vpop.f32.mrb[46].mxu1  ;;  %v2307_v60 = vadd.f32 %v2306_v51, %v6930_v43 }
 0x7d7   : > { %v3126_v63 = vmul.f32 -1.442695, %v2264_v39  ;;  %v2268_v50 = vpop.f32.mrb[47].mxu0  ;;  %v2309_v46 = vpop.f32.mrb[47].mxu1 }
 0x7d8   : > { %v3127_v58 = vmul.f32 -1.442695, %v2266_v56  ;;  %v3128_v59 = vmul.f32 -1.442695, %v2307_v60  ;;  %v2342_v56 = vld [vmem:[%s3894_s28 + $0x10] sm:$0x44] }
 0x7d9   : > { %3501 = vpow2.f32 %v3126_v63  ;;  %v2344_v30 = vunpack.c.l.bf16 %v2342_v56 }
 0x7da   : > { %3503 = vpow2.f32 %v3127_v58 }
 0x7db   : > { %3505 = vpow2.f32 %v3128_v59  ;;  %v2345_v59 = vunpack.c.h.bf16 %v2342_v56 }
 0x7dc   : > { %3507 = vtanh.f32 %v2305_v33 }
 0x7e3   : > { %v3502_v0 = vpop.eup %3501 }
 0x7e4   : > { %v3504_v34 = vpop.eup %3503  ;;  %v2314_v3 = vadd.f32 1.0, %v3502_v0 }
 0x7e5   : > { %v2320_v21 = vadd.f32 1.0, %v3504_v34  ;;  %v3506_v35 = vpop.eup %3505 }
 0x7e6   : > { %3509 = vrcp.f32 %v2314_v3  ;;  %v3508_v50 = vpop.eup %3507  ;;  %v2327_v58 = vadd.f32 1.0, %v3506_v35  ;;  %v2343_v35 = vld [vmem:[%s3894_s28 + $0x18] sm:$0x44] }
 0x7e7   : > { %3511 = vrcp.f32 %v2320_v21 }
 0x7e8   : > { %3513 = vrcp.f32 %v2327_v58 }
 0x7f0   : > { %v3510_v46 = vpop.eup %3509 }
 0x7f1   : > { %v3512_v63 = vpop.eup %3511  ;;  %v2331_v39 = vmul.f32 %v3510_v46, %v3508_v50 }
 0x7f2   : > { %v2330_v51 = vmul.f32 %v3512_v63, %v5650_v54  ;;  %v3514_v58 = vpop.eup %3513 }
 0x7f4   : > { %v6133_v19 = vadd.f32 %v2331_v39, %v2330_v51  ;;  %v2382_v60 = vpop.f32.mrb[48].mxu0  ;;  %v2423_v0 = vpop.f32.mrb[48].mxu1  ;;  %v2347_v51 = vunpack.c.h.bf16 %v2343_v35 }
 0x7f5   : > { %v2434_v33 = vrot.slane %v2382_v60, 4  ;;  %v2384_v3 = vpop.f32.mrb[49].mxu0  ;;  %v2425_v34 = vpop.f32.mrb[49].mxu1  ;;  %v2346_v60 = vunpack.c.l.bf16 %v2343_v35 }
 0x7f6   : > { %6987 = vst [vmem:[#allocation67_spill] sm:$0xff] %v6133_v19  ;;  %v2435_v21 = vrot.slane %v2384_v3, 4  ;;  %v2386_v47 = vpop.f32.mrb[50].mxu0  ;;  %v2427_v43 = vpop.f32.mrb[50].mxu1  ;;  %3515 = vtanh.f32 %v6133_v19  ;;  %v2437_v23 = vrot.slane %v2425_v34, 4  ;;  %v2436_v3 = vrot.slane %v2423_v0, 4 }
 0x7f7   : > { %v2442_v50 = vadd.f32 %v2434_v33, %v2344_v30  ;;  %v2387_v46 = vpop.f32.mrb[51].mxu0  ;;  %v2428_v32 = vpop.f32.mrb[51].mxu1 }
 0x7f8   : > { %v2443_v54 = vadd.f32 %v2435_v21, %v2345_v59  ;;  %v2445_v56 = vadd.f32 %v2437_v23, %v2347_v51  ;;  %v2444_v19 = vadd.f32 %v2436_v3, %v2346_v60 }
 0x7f9   : > { %v3130_v63 = vmul.f32 -1.442695, %v2442_v50 }
 0x7fa   : > { %v3131_v39 = vmul.f32 -1.442695, %v2443_v54  ;;  %v3132_v57 = vmul.f32 -1.442695, %v2445_v56 }
 0x7fb   : > { %3517 = vpow2.f32 %v3130_v63  ;;  %v2466_v63 = vrot.slane %v5656_v24, 6  ;;  %v7009_v24 = vld [vmem:[#allocation16_spill] sm:$0xff] }
 0x7fc   : > { %3519 = vpow2.f32 %v3131_v39 }
 0x7fd   : > { %3521 = vpow2.f32 %v3132_v57 }
 0x7fe   : > { %3523 = vtanh.f32 %v2444_v19 }
 0x800   : > { %v3516_v47 = vpop.eup %3515 }
 0x801   : > { %v2334_v43 = vmul.f32 %v3516_v47, %v3514_v58 }
 0x803   : > { %v3154_v30 = vpack.c.bf16 %v2334_v43, %v2334_v43  ;;  %v2474_v33 = vrot.slane %v2334_v43, 4 }
 0x805   : > { %v3518_v46 = vpop.eup %3517  ;;  %v2339_v32 = vrot.slane %v3154_v30, 7  ;;  %v2477_v59 = vpack.c.bf16 %v2474_v33, %v2474_v33  ;;  %v7029_v30 = vld [vmem:[#allocation54_spill] sm:$0xff]  ;;  %v7030_v33 = vld [vmem:[#allocation55_spill] sm:$0xff] }
 0x806   : > { %v3520_v21 = vpop.eup %3519  ;;  %v2449_v50 = vadd.f32 1.0, %v3518_v46  ;;  %v7031_v46 = vld [vmem:[#allocation56_spill] sm:$0xff] }
 0x807   : > { %v2455_v34 = vadd.f32 1.0, %v3520_v21  ;;  %2341 = vst [vmem:[%s3899_s7 + $0x4] sm:$0x2] %v2339_v32  ;;  %v2481_v23 = vrot.slane %v2477_v59, 2  ;;  %v3522_v0 = vpop.eup %3521  ;;  %v7032_v32 = vld [vmem:[#allocation57_spill] sm:$0xff]  ;;  %v7033_v59 = vld [vmem:[#allocation58_spill] sm:$0xff] }
 0x808   : > { %3525 = vrcp.f32 %v2449_v50  ;;  %v3524_v35 = vpop.eup %3523  ;;  %v2462_v56 = vadd.f32 1.0, %v3522_v0  ;;  %v7034_v21 = vld [vmem:[#allocation59_spill] sm:$0xff]  ;;  %v7035_v50 = vld [vmem:[#allocation60_spill] sm:$0xff] }
 0x809   : > { %3527 = vrcp.f32 %v2455_v34  ;;  %2516 = vmatprep.mubr.bf16.mxu0 %v2481_v23  ;;  %2557 = vmatprep.mubr.bf16.mxu1 %v2481_v23  ;;  %v7036_v34 = vld [vmem:[#allocation61_spill] sm:$0xff]  ;;  %v7037_v23 = vld [vmem:[#allocation62_spill] sm:$0xff]  ;;  %v7038_v0 = vld [vmem:[#allocation15_spill] sm:$0xff] }
 0x80a   : > { %3529 = vrcp.f32 %v2462_v56 }
 0x812   : > { %v3526_v54 = vpop.eup %3525 }
 0x813   : > { %v3528_v39 = vpop.eup %3527  ;;  %v2469_v51 = vmul.f32 %v3526_v54, %v3524_v35  ;;  %v7039_v35 = vld [vmem:[#allocation63_spill] sm:$0xff]  ;;  %v7040_v54 = vld [vmem:[#allocation64_spill] sm:$0xff] }
 0x814   : > { %v2468_v58 = vmul.f32 %v3528_v39, %v2466_v63  ;;  %v3530_v57 = vpop.eup %3529  ;;  %v7041_v63 = vld [vmem:[#allocation65_spill] sm:$0xff]  ;;  %v7042_v39 = vld [vmem:[#allocation66_spill] sm:$0xff] }
 0x816   : > { %v6139_v60 = vadd.f32 %v2469_v51, %v2468_v58  ;;  %v7043_v58 = vld [vmem:[#allocation11_spill] sm:$0xff] }
 0x818   : > { %3531 = vtanh.f32 %v6139_v60 }
 0x822   : > { %v3532_v19 = vpop.eup %3531 }
 0x823   : > { %v2472_v3 = vmul.f32 %v3532_v19, %v3530_v57 }
 0x825   : > { %v2476_v47 = vpack.c.bf16 %v2472_v3, %v2472_v3 }
 0x827   : > { %v2480_v43 = vrot.slane %v2476_v47, 2  ;;  %v7044_v47 = vld [vmem:[#allocation13_spill] sm:$0xff] }
 0x829   : > { %2517 = vmatmul.mubr.bf16.vlgmr.msra.gmra.mrb[52].mxu0 %v2480_v43  ;;  %2558 = vmatmul.mubr.bf16.vlgmr.msra.gmra.mrb[52].mxu1 %v2480_v43 }
 0x82a   : > { %2604 = vmatpush1.bf16.msra.mxu0 %v5439_v8  ;;  %2645 = vmatpush1.bf16.msra.mxu1 %v5445_v27  ;;  %v6989_v8 = vld [vmem:[#allocation19_spill] sm:$0xff]  ;;  %v6990_v27 = vld [vmem:[#allocation20_spill] sm:$0xff] }
 0x82b   : > { %2605 = vmatprep.subr.bf16.mxu0 %v5451_v36  ;;  %2646 = vmatprep.subr.bf16.mxu1 %v5457_v17  ;;  %v6991_v36 = vld [vmem:[#allocation21_spill] sm:$0xff]  ;;  %v6992_v17 = vld [vmem:[#allocation22_spill] sm:$0xff] }
 0x82c   : > { %2635 = vmatprep.mubr.bf16.mxu0 %v6674_v61  ;;  %2676 = vmatprep.mubr.bf16.mxu1 %v6674_v61  ;;  %v6988_v61 = vld [vmem:[#allocation18_spill] sm:$0xff] }
 0x82e   : > { %2606 = vmatpush1.bf16.msra.mxu0 %v5465_v9  ;;  %2647 = vmatpush1.bf16.msra.mxu1 %v5471_v28  ;;  %v6993_v9 = vld [vmem:[#allocation23_spill] sm:$0xff]  ;;  %v6994_v28 = vld [vmem:[#allocation24_spill] sm:$0xff] }
 0x82f   : > { %2607 = vmatprep.subr.bf16.mxu0 %v5477_v31  ;;  %2648 = vmatprep.subr.bf16.mxu1 %v5483_v26  ;;  %v6995_v31 = vld [vmem:[#allocation25_spill] sm:$0xff]  ;;  %v6996_v26 = vld [vmem:[#allocation26_spill] sm:$0xff] }
 0x832   : > { %2608 = vmatpush1.bf16.msra.mxu0 %v5489_v29  ;;  %2649 = vmatpush1.bf16.msra.mxu1 %v5495_v20  ;;  %v6997_v29 = vld [vmem:[#allocation27_spill] sm:$0xff]  ;;  %v6998_v20 = vld [vmem:[#allocation9_spill] sm:$0xff] }
 0x833   : > { %2609 = vmatprep.subr.bf16.mxu0 %v5501_v16  ;;  %2650 = vmatprep.subr.bf16.mxu1 %v5507_v18  ;;  %v6999_v16 = vld [vmem:[#allocation10_spill] sm:$0xff]  ;;  %v7000_v18 = vld [vmem:[#allocation28_spill] sm:$0xff] }
 0x836   : > { %2610 = vmatpush1.bf16.msra.mxu0 %v5513_v10  ;;  %2651 = vmatpush1.bf16.msra.mxu1 %v5519_v15  ;;  %v7001_v10 = vld [vmem:[#allocation29_spill] sm:$0xff]  ;;  %v7002_v15 = vld [vmem:[#allocation30_spill] sm:$0xff] }
 0x837   : > { %2611 = vmatprep.subr.bf16.mxu0 %v5525_v12  ;;  %2652 = vmatprep.subr.bf16.mxu1 %v5531_v25  ;;  %v7003_v12 = vld [vmem:[#allocation31_spill] sm:$0xff]  ;;  %v7004_v25 = vld [vmem:[#allocation32_spill] sm:$0xff] }
 0x83a   : > { %2612 = vmatpush1.bf16.msra.mxu0 %v5537_v14  ;;  %2653 = vmatpush1.bf16.msra.mxu1 %v5681_v53  ;;  %v7005_v14 = vld [vmem:[#allocation33_spill] sm:$0xff] }
 0x83b   : > { %2613 = vmatprep.subr.bf16.mxu0 %v5544_v7  ;;  %2654 = vmatprep.subr.bf16.mxu1 %v5688_v13  ;;  %v7006_v7 = vld [vmem:[#allocation34_spill] sm:$0xff]  ;;  %v7010_v53 = vld [vmem:[#allocation17_spill] sm:$0xff] }
 0x83c   : > { %v7011_v13 = vld [vmem:[#allocation70_spill] sm:$0xff] }
 0x83e   : > { %2614 = vmatpush1.bf16.msra.mxu0 %v5551_v11  ;;  %2655 = vmatpush1.bf16.msra.mxu1 %v5695_v37  ;;  %v7007_v11 = vld [vmem:[#allocation35_spill] sm:$0xff]  ;;  %v7012_v37 = vld [vmem:[#allocation37_spill] sm:$0xff] }
 0x83f   : > { %2615 = vmatprep.subr.bf16.mxu0 %v5558_v1  ;;  %2656 = vmatprep.subr.bf16.mxu1 %v5702_v38  ;;  %v7008_v1 = vld [vmem:[#allocation36_spill] sm:$0xff]  ;;  %v7013_v38 = vld [vmem:[#allocation38_spill] sm:$0xff] }
 0x842   : > { %2616 = vmatpush1.bf16.msra.mxu0 %v5708_v40  ;;  %2657 = vmatpush1.bf16.msra.mxu1 %v5714_v41  ;;  %v7014_v40 = vld [vmem:[#allocation39_spill] sm:$0xff]  ;;  %v7015_v41 = vld [vmem:[#allocation40_spill] sm:$0xff] }
 0x843   : > { %2617 = vmatprep.subr.bf16.mxu0 %v5720_v42  ;;  %2658 = vmatprep.subr.bf16.mxu1 %v5726_v44  ;;  %v7016_v42 = vld [vmem:[#allocation41_spill] sm:$0xff]  ;;  %v7017_v44 = vld [vmem:[#allocation42_spill] sm:$0xff] }
 0x846   : > { %2618 = vmatpush1.bf16.msra.mxu0 %v5732_v45  ;;  %2659 = vmatpush1.bf16.msra.mxu1 %v5738_v49  ;;  %v7018_v45 = vld [vmem:[#allocation43_spill] sm:$0xff]  ;;  %v7019_v49 = vld [vmem:[#allocation44_spill] sm:$0xff] }
 0x847   : > { %2739 = vmatprep.subr.bf16.mxu0 %v5744_v2  ;;  %2780 = vmatprep.subr.bf16.mxu1 %v5750_v4  ;;  %v7020_v2 = vld [vmem:[#allocation45_spill] sm:$0xff]  ;;  %v7021_v4 = vld [vmem:[#allocation46_spill] sm:$0xff] }
 0x849   : > { %2636 = vmatmul.mubr.bf16.vlgmr.msra.gmra.mrb[56].mxu0 %v2480_v43  ;;  %2677 = vmatmul.mubr.bf16.vlgmr.msra.gmra.mrb[56].mxu1 %v2480_v43 }
 0x84a   : > { %2740 = vmatpush1.bf16.msra.mxu0 %v5756_v5  ;;  %2781 = vmatpush1.bf16.msra.mxu1 %v5762_v6  ;;  %v7022_v5 = vld [vmem:[#allocation47_spill] sm:$0xff]  ;;  %v7023_v6 = vld [vmem:[#allocation48_spill] sm:$0xff] }
 0x84b   : > { %2741 = vmatprep.subr.bf16.mxu0 %v5768_v48  ;;  %2782 = vmatprep.subr.bf16.mxu1 %v5774_v22  ;;  %v7024_v48 = vld [vmem:[#allocation49_spill] sm:$0xff]  ;;  %v7025_v22 = vld [vmem:[#allocation50_spill] sm:$0xff] }
 0x84e   : > { %2742 = vmatpush1.bf16.msra.mxu0 %v5780_v55  ;;  %2783 = vmatpush1.bf16.msra.mxu1 %v5786_v52  ;;  %v7026_v55 = vld [vmem:[#allocation51_spill] sm:$0xff]  ;;  %v7027_v52 = vld [vmem:[#allocation52_spill] sm:$0xff] }
 0x84f   : > { %2743 = vmatprep.subr.bf16.mxu0 %v5792_v62  ;;  %2784 = vmatprep.subr.bf16.mxu1 %v6988_v61  ;;  %v7028_v62 = vld [vmem:[#allocation53_spill] sm:$0xff] }
 0x852   : > { %2744 = vmatpush1.bf16.msra.mxu0 %v6989_v8  ;;  %2785 = vmatpush1.bf16.msra.mxu1 %v6990_v27 }
 0x853   : > { %2745 = vmatprep.subr.bf16.mxu0 %v6991_v36  ;;  %2786 = vmatprep.subr.bf16.mxu1 %v6992_v17 }
 0x856   : > { %2746 = vmatpush1.bf16.msra.mxu0 %v6993_v9  ;;  %2787 = vmatpush1.bf16.msra.mxu1 %v6994_v28  ;;  %v7045_v28 = vld [vmem:[#allocation12_spill] sm:$0xff] }
 0x857   : > { %2747 = vmatprep.subr.bf16.mxu0 %v6995_v31  ;;  %2788 = vmatprep.subr.bf16.mxu1 %v6996_v26 }
 0x85a   : > { %2748 = vmatpush1.bf16.msra.mxu0 %v6997_v29  ;;  %2789 = vmatpush1.bf16.msra.mxu1 %v6998_v20  ;;  %v7046_v29 = vld [vmem:[#allocation14_spill] sm:$0xff] }
 0x85b   : > { %2749 = vmatprep.subr.bf16.mxu0 %v6999_v16  ;;  %2790 = vmatprep.subr.bf16.mxu1 %v7000_v18 }
 0x85e   : > { %2750 = vmatpush1.bf16.msra.mxu0 %v7001_v10  ;;  %2791 = vmatpush1.bf16.msra.mxu1 %v7002_v15 }
 0x85f   : > { %2751 = vmatprep.subr.bf16.mxu0 %v7003_v12  ;;  %2792 = vmatprep.subr.bf16.mxu1 %v7004_v25 }
 0x862   : > { %2752 = vmatpush1.bf16.msra.mxu0 %v7005_v14  ;;  %2793 = vmatpush1.bf16.msra.mxu1 %v7006_v7  ;;  %v2597_v7 = vld [vmem:[%s3894_s28 + $0x10] sm:$0x88] }
 0x863   : > { %2753 = vmatprep.subr.bf16.mxu0 %v7007_v11  ;;  %2794 = vmatprep.subr.bf16.mxu1 %v7008_v1 }
 0x866   : > { %2754 = vmatpush1.bf16.msra.mxu0 %v7009_v24  ;;  %2795 = vmatpush1.bf16.msra.mxu1 %v7010_v53  ;;  %v7047_v53 = vld [vmem:[#allocation67_spill] sm:$0xff] }
 0x867   : > { %2755 = vmatprep.subr.bf16.mxu0 %v7011_v13  ;;  %2796 = vmatprep.subr.bf16.mxu1 %v7012_v37  ;;  %v2599_v37 = vunpack.c.l.bf16 %v2597_v7 }
 0x86a   : > { %2756 = vmatpush1.bf16.msra.mxu0 %v7013_v38  ;;  %2797 = vmatpush1.bf16.msra.mxu1 %v7014_v40 }
 0x86b   : > { %2757 = vmatprep.subr.bf16.mxu0 %v7015_v41  ;;  %2798 = vmatprep.subr.bf16.mxu1 %v7016_v42  ;;  %v2600_v42 = vunpack.c.h.bf16 %v2597_v7 }
 0x86e   : > { %2758 = vmatpush1.bf16.msra.mxu0 %v7017_v44  ;;  %2799 = vmatpush1.bf16.msra.mxu1 %v7018_v45 }
 0x86f   : > { %2759 = vmatprep.subr.bf16.mxu0 %v7019_v49  ;;  %2800 = vmatprep.subr.bf16.mxu1 %v7020_v2 }
 0x872   : > { %2760 = vmatpush1.bf16.msra.mxu0 %v7021_v4  ;;  %2801 = vmatpush1.bf16.msra.mxu1 %v7022_v5 }
 0x873   : > { %2761 = vmatprep.subr.bf16.mxu0 %v7023_v6  ;;  %2802 = vmatprep.subr.bf16.mxu1 %v7024_v48  ;;  %v2598_v48 = vld [vmem:[%s3894_s28 + $0x18] sm:$0x88]  ;;  %s3843_s28 = smov [#allocation5]  }
 0x874   : > { %s2908_s29 = sshll.u32 %s3843_s28, 4  ;;  %s2909_s29 = int_to_ptr.vmem [resolvable:$true] %s2908_s29 }
 0x875   : > { %s3773_s30 = scalar_lea.vmem %s2909_s29, 64  ;;  %p3780_p9 = scmp.lt.s32.totalorder %s2909_s29, %s2909_s29 }
 0x876   : > { %2762 = vmatpush1.bf16.msra.mxu0 %v7025_v22  ;;  %2803 = vmatpush1.bf16.msra.mxu1 %v7026_v55  ;;  %p3774_p6 = scmp.ne.s32.totalorder %s2909_s29, %s3773_s30  ;;  %p3781_p10 = scmp.lt.s32.totalorder %s3773_s30, %s3773_s30 }
 0x877   : > { %2763 = vmatprep.subr.bf16.mxu0 %v7027_v52  ;;  %2804 = vmatprep.subr.bf16.mxu1 %v7028_v62 }
 0x878   : > { %p3775_p7 = pnand %p3774_p6, %p3165_p5  ;;  %p3782_p11 = por %p3781_p10, %p3780_p9 }
 0x87a   : > { %2764 = vmatpush1.bf16.msra.mxu0 %v7029_v30  ;;  %2805 = vmatpush1.bf16.msra.mxu1 %v7030_v33  ;;  %v2602_v33 = vunpack.c.h.bf16 %v2598_v48  ;;  %p3776_p8 = pneg %p3775_p7 }
 0x87b   : > { %2765 = vmatprep.subr.bf16.mxu0 %v7031_v46  ;;  %2806 = vmatprep.subr.bf16.mxu1 %v7032_v32 }
 0x87c   : > { %p3783_p12 = pnand %p3782_p11, %p3776_p8 }
 0x87e   : > { %2766 = vmatpush1.bf16.msra.mxu0 %v7033_v59  ;;  %2807 = vmatpush1.bf16.msra.mxu1 %v7034_v21  ;;  %v2601_v21 = vunpack.c.l.bf16 %v2598_v48 }
 0x87f   : > { %2767 = vmatprep.subr.bf16.mxu0 %v7035_v50  ;;  %2808 = vmatprep.subr.bf16.mxu1 %v7036_v34 }
 0x882   : > { %2768 = vmatpush1.bf16.msra.mxu0 %v7037_v23  ;;  %2809 = vmatpush1.bf16.msra.mxu1 %v7038_v0 }
 0x883   : > { %2769 = vmatprep.subr.bf16.mxu0 %v7039_v35  ;;  %2810 = vmatprep.subr.bf16.mxu1 %v7040_v54 }
 0x886   : > { %2770 = vmatpush1.bf16.msra.mxu0 %v7041_v63  ;;  %2811 = vmatpush1.bf16.msra.mxu1 %v7042_v39 }
 0x8fc   : > { %v2518_v51 = vpop.f32.mrb[52].mxu0  ;;  %v2559_v56 = vpop.f32.mrb[52].mxu1 }
 0x8fd   : > { %v2519_v57 = vadd.f32 %v2518_v51, %v7043_v58  ;;  %v2520_v19 = vpop.f32.mrb[53].mxu0  ;;  %v2561_v3 = vpop.f32.mrb[53].mxu1  ;;  %v2560_v20 = vadd.f32 %v2559_v56, %v7046_v29 }
 0x8fe   : > { %v2521_v43 = vadd.f32 %v2520_v19, %v7044_v47  ;;  %v2522_v61 = vpop.f32.mrb[54].mxu0  ;;  %v2563_v8 = vpop.f32.mrb[54].mxu1  ;;  %v2562_v31 = vadd.f32 %v2561_v3, %v7045_v28 }
 0x8ff   : > { %v3133_v27 = vmul.f32 -1.442695, %v2519_v57  ;;  %v2523_v36 = vpop.f32.mrb[55].mxu0  ;;  %v2564_v17 = vpop.f32.mrb[55].mxu1 }
 0x900   : > { %v3134_v9 = vmul.f32 -1.442695, %v2521_v43  ;;  %v3135_v26 = vmul.f32 -1.442695, %v2562_v31  ;;  %v2721_v36 = vrot.slane %v6139_v60, 6 }
 0x901   : > { %3533 = vpow2.f32 %v3133_v27 }
 0x902   : > { %3535 = vpow2.f32 %v3134_v9 }
 0x903   : > { %3537 = vpow2.f32 %v3135_v26 }
 0x904   : > { %3539 = vtanh.f32 %v2560_v20 }
 0x90b   : > { %v3534_v16 = vpop.eup %3533 }
 0x90c   : > { %v3536_v18 = vpop.eup %3535  ;;  %v2569_v10 = vadd.f32 1.0, %v3534_v16 }
 0x90d   : > { %v2575_v15 = vadd.f32 1.0, %v3536_v18  ;;  %v3538_v12 = vpop.eup %3537 }
 0x90e   : > { %3541 = vrcp.f32 %v2569_v10  ;;  %v3540_v25 = vpop.eup %3539  ;;  %v2582_v24 = vadd.f32 1.0, %v3538_v12 }
 0x90f   : > { %3543 = vrcp.f32 %v2575_v15 }
 0x910   : > { %3545 = vrcp.f32 %v2582_v24 }
 0x918   : > { %v3542_v14 = vpop.eup %3541 }
 0x919   : > { %v3544_v11 = vpop.eup %3543  ;;  %v2586_v1 = vmul.f32 %v3542_v14, %v3540_v25 }
 0x91a   : > { %v2585_v13 = vmul.f32 %v3544_v11, %v7047_v53  ;;  %v3546_v59 = vpop.eup %3545 }
 0x91c   : > { %v6244_v38 = vadd.f32 %v2586_v1, %v2585_v13  ;;  %v2637_v40 = vpop.f32.mrb[56].mxu0  ;;  %v2678_v41 = vpop.f32.mrb[56].mxu1 }
 0x91d   : > { %v2689_v44 = vrot.slane %v2637_v40, 2  ;;  %v2639_v45 = vpop.f32.mrb[57].mxu0  ;;  %v2680_v49 = vpop.f32.mrb[57].mxu1  ;;  %v2691_v50 = vrot.slane %v2678_v41, 2 }
 0x91e   : > { %v2690_v2 = vrot.slane %v2639_v45, 2  ;;  %v2641_v4 = vpop.f32.mrb[58].mxu0  ;;  %v2682_v5 = vpop.f32.mrb[58].mxu1  ;;  %3547 = vtanh.f32 %v6244_v38  ;;  %v2692_v46 = vrot.slane %v2680_v49, 2 }
 0x91f   : > { %v2697_v6 = vadd.f32 %v2689_v44, %v2599_v37  ;;  %v2642_v22 = vpop.f32.mrb[59].mxu0  ;;  %v2683_v55 = vpop.f32.mrb[59].mxu1  ;;  %v2699_v35 = vadd.f32 %v2691_v50, %v2601_v21 }
 0x920   : > { %v2698_v52 = vadd.f32 %v2690_v2, %v2600_v42  ;;  %v2700_v32 = vadd.f32 %v2692_v46, %v2602_v33 }
 0x921   : > { %v3137_v62 = vmul.f32 -1.442695, %v2697_v6 }
 0x922   : > { %v3138_v30 = vmul.f32 -1.442695, %v2698_v52  ;;  %v3139_v0 = vmul.f32 -1.442695, %v2700_v32 }
 0x923   : > { %3549 = vpow2.f32 %v3137_v62 }
 0x924   : > { %3551 = vpow2.f32 %v3138_v30 }
 0x925   : > { %3553 = vpow2.f32 %v3139_v0 }
 0x926   : > { %3555 = vtanh.f32 %v2699_v35 }
 0x928   : > { %v3548_v34 = vpop.eup %3547 }
 0x929   : > { %v2589_v23 = vmul.f32 %v3548_v34, %v3546_v59 }
 0x92b   : > { %v3155_v54 = vpack.c.bf16 %v2589_v23, %v2589_v23  ;;  %v2729_v63 = vrot.slane %v2589_v23, 2 }
 0x92d   : > { %v3550_v39 = vpop.eup %3549  ;;  %v2594_v51 = vrot.slane %v3155_v54, 6  ;;  %v2732_v56 = vpack.c.bf16 %v2729_v63, %v2729_v63 }
 0x92e   : > { %v3552_v57 = vpop.eup %3551  ;;  %v2704_v19 = vadd.f32 1.0, %v3550_v39 }
 0x92f   : > { %v2710_v3 = vadd.f32 1.0, %v3552_v57  ;;  %2596 = vst [vmem:[%s3899_s7 + $0x4] sm:$0x4] %v2594_v51  ;;  %v2736_v43 = vrot.slane %v2732_v56, 3  ;;  %v3554_v61 = vpop.eup %3553 }
 0x930   : > { %3557 = vrcp.f32 %v2704_v19  ;;  %v3556_v8 = vpop.eup %3555  ;;  %v2717_v31 = vadd.f32 1.0, %v3554_v61 }
 0x931   : > { %3559 = vrcp.f32 %v2710_v3  ;;  %2771 = vmatprep.mubr.bf16.mxu0 %v2736_v43  ;;  %2812 = vmatprep.mubr.bf16.mxu1 %v2736_v43 }
 0x932   : > { %3561 = vrcp.f32 %v2717_v31 }
 0x93a   : > { %v3558_v27 = vpop.eup %3557 }
 0x93b   : > { %v3560_v17 = vpop.eup %3559  ;;  %v2724_v9 = vmul.f32 %v3558_v27, %v3556_v8 }
 0x93c   : > { %v2723_v26 = vmul.f32 %v3560_v17, %v2721_v36  ;;  %v3562_v16 = vpop.eup %3561 }
 0x93e   : > { %v2725_v20 = vadd.f32 %v2724_v9, %v2723_v26 }
 0x940   : > { %3563 = vtanh.f32 %v2725_v20  ;;  %v2856_v25 = vrot.slane %v2725_v20, 4 }
 0x94a   : > { %v3564_v18 = vpop.eup %3563 }
 0x94b   : > { %v6250_v10 = vmul.f32 %v3564_v18, %v3562_v16 }
 0x94d   : > { %v2731_v15 = vpack.c.bf16 %v6250_v10, %v6250_v10  ;;  %v2853_v12 = vrot.slane %v6250_v10, 6 }
 0x94f   : > { %v2735_v14 = vrot.slane %v2731_v15, 3  ;;  %v6258_v60 = vsel %vm2864_vm0, %v2853_v12, %v2856_v25 }
 0x951   : > { %2772 = vmatmul.mubr.bf16.vlgmr.msra.gmra.mrb[60].mxu0 %v2735_v14  ;;  %2813 = vmatmul.mubr.bf16.vlgmr.msra.gmra.mrb[60].mxu1 %v2735_v14 }
 0xa24   : > { %v2773_v7 = vpop.f32.mrb[60].mxu0  ;;  %v2814_v11 = vpop.f32.mrb[60].mxu1 }
 0xa25   : > { %v2774_v1 = vadd.f32 %v2773_v7, %v7043_v58  ;;  %v2775_v24 = vpop.f32.mrb[61].mxu0  ;;  %v2816_v53 = vpop.f32.mrb[61].mxu1  ;;  %v2815_v4 = vadd.f32 %v2814_v11, %v7046_v29  ;;  %v2875_v29 = vrot.slane %v2725_v20, 6 }
 0xa26   : > { %v2776_v13 = vadd.f32 %v2775_v24, %v7044_v47  ;;  %v2777_v37 = vpop.f32.mrb[62].mxu0  ;;  %v2818_v40 = vpop.f32.mrb[62].mxu1  ;;  %v2817_v49 = vadd.f32 %v2816_v53, %v7045_v28 }
 0xa27   : > { %v3140_v41 = vmul.f32 -1.442695, %v2774_v1  ;;  %v2778_v42 = vpop.f32.mrb[63].mxu0  ;;  %v2819_v44 = vpop.f32.mrb[63].mxu1 }
 0xa28   : > { %v3141_v45 = vmul.f32 -1.442695, %v2776_v13  ;;  %v3142_v2 = vmul.f32 -1.442695, %v2817_v49 }
 0xa29   : > { %3565 = vpow2.f32 %v3140_v41 }
 0xa2a   : > { %3567 = vpow2.f32 %v3141_v45 }
 0xa2b   : > { %3569 = vpow2.f32 %v3142_v2 }
 0xa2c   : > { %3571 = vtanh.f32 %v2815_v4 }
 0xa33   : > { %v3566_v5 = vpop.eup %3565 }
 0xa34   : > { %v3568_v6 = vpop.eup %3567  ;;  %v2824_v58 = vadd.f32 1.0, %v3566_v5 }
 0xa35   : > { %v2830_v47 = vadd.f32 1.0, %v3568_v6  ;;  %v3570_v48 = vpop.eup %3569 }
 0xa36   : > { %3573 = vrcp.f32 %v2824_v58  ;;  %v3572_v22 = vpop.eup %3571  ;;  %v2837_v30 = vadd.f32 1.0, %v3570_v48 }
 0xa37   : > { %3575 = vrcp.f32 %v2830_v47 }
 0xa38   : > { %3577 = vrcp.f32 %v2837_v30 }
 0xa40   : > { %v3574_v55 = vpop.eup %3573 }
 0xa41   : > { %v3576_v52 = vpop.eup %3575  ;;  %v2841_v62 = vmul.f32 %v3574_v55, %v3572_v22 }
 0xa42   : > { %v2840_v28 = vmul.f32 %v3576_v52, %v6244_v38 }
 0xa44   : > { %v2842_v33 = vadd.f32 %v2841_v62, %v2840_v28 }
 0xa46   : > { %3579 = vtanh.f32 %v2842_v33  ;;  %v2877_v46 = vrot.slane %v2842_v33, 6 }
 0xa48   : > { %v2879_v32 = vsel %vm2864_vm0, %v2875_v29, %v2877_v46 }
 0xa49   : > { %2880 = vst [vmem:[#allocation5] sm:$0xf] %v2879_v32 }
 0xa4a   : > { %3786 = shalt.err (!%p3783_p12)
}
 0xa4b   : > { %s3787_s10 = scalar_lea.hbm %s6325_s6, 64 }
 0xa4c   : > { %p3788_p13 = scmp.ne.s32.totalorder %s6325_s6, %s3787_s10  ;;  %p3793_p2 = scmp.lt.u32.totalorder %s3787_s10, %s6325_s6 }
 0xa4e   : > { %p3789_p0 = pnand %p3788_p13, %p3165_p5 }
 0xa50   : > { %p3790_p1 = pneg %p3789_p0 }
 0xa52   : > { %p3795_p3 = pnand %p3793_p2, %p3790_p1 }
 0xa54   : > { %3798 = shalt.err (!%p3795_p3)
}
 0xa55   : > { %3160 = dma.vmem_to_hbm [thread:$0]  (%p3165_p5), %s2909_s29, 64, %s6325_s6, [#allocation6]   ;;  %v3578_v38 = vpop.eup %3577  ;;  %vm2866_vm1 = vcmask 1043456   ;;  %vm2868_vm2 = vcmask 1045504   ;;  %v2862_v0 = vrot.slane %v2842_v33, 2 }
 0xa56   : > { %v3580_v59 = vpop.eup %3579  ;;  %s3844_s17 = smov [#allocation3]  }
 0xa57   : > { %v2844_v21 = vmul.f32 %v3580_v59, %v3578_v38  ;;  %s2897_s18 = sshll.u32 %s3844_s17, 4  ;;  %s2898_s18 = int_to_ptr.vmem [resolvable:$true] %s2897_s18 }
 0xa58   : > { %s3799_s19 = scalar_lea.vmem %s2898_s18, 64  ;;  %p3806_p8 = scmp.lt.s32.totalorder %s2898_s18, %s2898_s18 }
 0xa59   : > { %v3156_v50 = vpack.c.bf16 %v2844_v21, %v2844_v21  ;;  %v2859_v34 = vrot.slane %v2844_v21, 4  ;;  %v2871_v23 = vrot.slane %v2844_v21, 6  ;;  %p3800_p4 = scmp.ne.s32.totalorder %s2898_s18, %s3799_s19  ;;  %p3807_p9 = scmp.lt.s32.totalorder %s3799_s19, %s3799_s19 }
 0xa5b   : > { %v2849_v35 = vrot.slane %v3156_v50, 5  ;;  %v2867_v54 = vsel %vm2866_vm1, %v6258_v60, %v2859_v34  ;;  %v2873_v63 = vsel %vm2864_vm0, %v2853_v12, %v2871_v23  ;;  %p3801_p6 = pnand %p3800_p4, %p3165_p5  ;;  %p3808_p10 = por %p3807_p9, %p3806_p8 }
 0xa5c   : > { %v2869_v39 = vsel %vm2868_vm2, %v2867_v54, %v2862_v0  ;;  %2874 = vst [vmem:[#allocation3] sm:$0xf] %v2873_v63 }
 0xa5d   : > { %2851 = vst [vmem:[%s3899_s7 + $0x4] sm:$0x8] %v2849_v35  ;;  %2870 = vst [vmem:[#allocation2] sm:$0xff] %v2869_v39  ;;  %p3802_p7 = pneg %p3801_p6 }
 0xa5f   : > { %p3809_p11 = pnand %p3808_p10, %p3802_p7 }
 0xa61   : > { %3812 = shalt.err (!%p3809_p11)
}
 0xa62   : > { %s3813_s24 = scalar_lea.hbm %s6324_s5, 64 }
 0xa63   : > { %p3814_p12 = scmp.ne.s32.totalorder %s6324_s5, %s3813_s24  ;;  %p3819_p1 = scmp.lt.u32.totalorder %s3813_s24, %s6324_s5 }
 0xa65   : > { %p3815_p13 = pnand %p3814_p12, %p3165_p5 }
 0xa67   : > { %p3816_p0 = pneg %p3815_p13 }
 0xa69   : > { %p3821_p2 = pnand %p3819_p1, %p3816_p0 }
 0xa6b   : > { %3824 = shalt.err (!%p3821_p2)
}
 0xa6c   : > { %3158 = dma.vmem_to_hbm [thread:$0]  (%p3165_p5), %s2898_s18, 64, %s6324_s5, [#allocation4]  }
 0xa6d   : > { %3830 = dma.done.wait (%p3165_p5), [#allocation4], 64  }
 0xa6e   : > { %3832 = vsyncadd (%p3165_p5), [#allocation4], 4294967232 }
 0xa6f   : > { %3834 = dma.done.wait (%p3165_p5), [#allocation6], 64  }
 0xa70   : > { %3836 = vsyncadd (%p3165_p5), [#allocation6], 4294967232 }
 0xa71 PF: > { %s19_s21 = sadd.s32 1, %s3839_s21  }
 0xa72   : > { %p16_p3 = scmp.ge.s32.totalorder %s19_s21, 4  }
 0xa74   :  { %18 = sbr.rel (!%p16_p3) target bundleno = 2 (0x2), region = 87 }
 0xa7b   :  { %2933 = vsyncpa [#allocation4], 1 }
 0xa7c   :  { %2935 = vsyncpa [#allocation4 + $0x1], 1 }
 0xa7d   :  { %2936 = vsyncpa [#allocation6], 1 }

</bundles_post_ra>
